<compile_context>
chip_gen: v7x
topology: tpu7x:2x2x1
jax: 0.10.0
libtpu: 0.0.40
codegen_flags: <defaults>
</compile_context>

<pallas_src>
import functools
import math

import numpy as np

import jax
import jax.numpy as jnp
from jax import lax
from jax.experimental import pallas as pl
from jax.experimental.pallas import tpu as pltpu


# ---------------------------------------------------------------------------
# Fused FCOS head kernel: one grid step = one FPN level (whole batch).
# ---------------------------------------------------------------------------
def _fcos_head_kernel(x_ref, m_ref, w_ref, b_ref, o_ref, fpad_ref, *,
                      pitch, L, OFF, C, n_cls, n_shared, n_indep,
                      ctr_on_reg, scales):
    f32 = jnp.float32

    # Zero ONLY the two OFF-wide margins of the padded-feature scratch (the
    # centre is fully rewritten by every conv).  Unconditional per grid step
    # so each TensorCore of the v7x "parallel" split initialises its own copy;
    # the margins only need to be finite (masked taps still read them).
    fpad_ref[:, 0:OFF] = jnp.zeros((C, OFF), f32)
    fpad_ref[:, OFF + L:2 * OFF + L] = jnp.zeros((C, OFF), f32)

    def conv(feat, row0, cout, relu):
        # One 3x3 "same" conv over the lane-flattened feature: one aligned
        # store of `feat` into the padded scratch, then nine lane-shifted tap
        # views (masked at image/batch borders) feeding nine small MXU
        # matmuls accumulated in f32.  No im2col patch matrix, no padded K.
        fpad_ref[:, OFF:OFF + L] = feat
        acc = None
        t = 0
        for ty in (-1, 0, 1):
            for tx in (-1, 0, 1):
                s = ty * pitch + tx
                tap = fpad_ref[:, OFF + s:OFF + s + L] * m_ref[0, t:t + 1, :]
                part = jnp.dot(w_ref[t, row0:row0 + cout, :], tap,
                               preferred_element_type=f32)
                acc = part if acc is None else acc + part
                t += 1
        out = acc + b_ref[row0:row0 + cout, :]
        if relu:
            out = jnp.maximum(out, 0.0)
        return out

    x = x_ref[0].astype(f32)                       # (C, L)
    cls_feat = x
    reg_feat = x
    row = 0
    for _ in range(n_shared):
        # Shared tower: cls_feat == reg_feat here -> compute once.
        cls_feat = conv(cls_feat, row, C, relu=True)
        reg_feat = cls_feat
        row += C
    if n_indep >= 1:
        # First cls/reg tower convs read the same tensor -> fused Cout=2C.
        both = conv(cls_feat, row, 2 * C, relu=True)
        cls_feat = both[0:C, :]
        reg_feat = both[C:2 * C, :]
        row += 2 * C
    for _ in range(n_indep - 1):
        cls_feat = conv(cls_feat, row, C, relu=True)
        row += C
    for _ in range(n_indep - 1):
        reg_feat = conv(reg_feat, row, C, relu=True)
        row += C

    if ctr_on_reg:
        cls_score = conv(cls_feat, row, n_cls, relu=False)
        row += n_cls
        bc = conv(reg_feat, row, 4 + 1, relu=False)        # fused bbox + ctr
        bbox = bc[0:4, :]
        ctr = bc[4:5, :]
    else:
        cc = conv(cls_feat, row, n_cls + 1, relu=False)    # fused logits + ctr
        cls_score = cc[0:n_cls, :]
        ctr = cc[n_cls:n_cls + 1, :]
        row += n_cls + 1
        bbox = conv(reg_feat, row, 4, relu=False)

    if any(float(s) != 1.0 for s in scales):
        # TODO(synk): if the Scale parameters become learned/traced arrays,
        # feed them through SMEM instead of baking them at trace time.
        lvl = pl.program_id(0)
        s = jnp.float32(scales[0])
        for i in range(1, len(scales)):
            s = jnp.where(lvl == i, jnp.float32(scales[i]), s)
        bbox = bbox * s
    bbox = jnp.exp(bbox)

    # Packed, lane-dense output slab: rows = [cls | bbox | ctr].
    o_ref[0, 0:n_cls, :] = cls_score.astype(o_ref.dtype)
    o_ref[0, n_cls:n_cls + 4, :] = bbox.astype(o_ref.dtype)
    o_ref[0, n_cls + 4:n_cls + 5, :] = ctr.astype(o_ref.dtype)


def _group_weight(w_hwio):
    """(3,3,Cin,Cout) HWIO conv weight -> (9, Cout, Cin), tap-major
    (t = 3*(ky+1) + (kx+1)) so tap t multiplies the feature shifted by
    (ky, kx) -- the cross-correlation orientation used by PyTorch/lax."""
    kh, kw, cin, cout = w_hwio.shape
    return jnp.transpose(w_hwio.reshape(kh * kw, cin, cout), (0, 2, 1))


@functools.partial(jax.jit, static_argnames=(
    "num_classes", "n_shared", "n_indep", "ctr_on_reg", "scales"))
def fcos_head_forward(features, w_all, b_all, *, num_classes, n_shared,
                      n_indep, ctr_on_reg, scales):
    """Whole FCOS head (all FPN levels, whole batch) in ONE pallas_call."""
    shapes = tuple(f.shape for f in features)
    n_lvl = len(shapes)
    C = shapes[0][1]
    R = w_all.shape[1]

    # Common row pitch across levels so all levels share one static set of
    # tap offsets; batch is folded into the lane dimension.
    pitch = max(s[3] for s in shapes)
    used = [s[0] * s[2] * pitch for s in shapes]          # N * H * pitch
    Lmax = ((max(used) + 127) // 128) * 128               # lane-dense blocks
    off = ((pitch + 1 + 127) // 128) * 128                # aligned margin

    # Pack each level to (C, Lmax): lane p = n*H*pitch + r*pitch + c.
    xs = []
    for (N, _, H, W), f in zip(shapes, features):
        fp = f if W == pitch else jnp.pad(
            f, ((0, 0), (0, 0), (0, 0), (0, pitch - W)))
        v = jnp.transpose(fp, (1, 0, 2, 3)).reshape(C, N * H * pitch)
        if v.shape[1] < Lmax:
            v = jnp.pad(v, ((0, 0), (0, Lmax - v.shape[1])))
        xs.append(v)
    x_packed = jnp.stack(xs, axis=0).astype(jnp.float32)  # (n_lvl, C, Lmax)

    # Per-level, per-tap validity masks (NumPy on static shapes -> constants).
    masks_np = np.zeros((n_lvl, 9, Lmax), np.float32)
    for li, (N, _, H, W) in enumerate(shapes):
        lu = N * H * pitch
        p = np.arange(lu)
        r = (p % (H * pitch)) // pitch
        c = p % pitch
        t = 0
        for ty in (-1, 0, 1):
            for tx in (-1, 0, 1):
                ok = ((c < W) & (r + ty >= 0) & (r + ty < H)
                      & (c + tx >= 0) & (c + tx < W))
                masks_np[li, t, :lu] = ok.astype(np.float32)
                t += 1
    masks = jnp.asarray(masks_np)

    kernel = functools.partial(
        _fcos_head_kernel, pitch=pitch, L=Lmax, OFF=off, C=C,
        n_cls=num_classes, n_shared=n_shared, n_indep=n_indep,
        ctr_on_reg=ctr_on_reg, scales=scales)

    out = pl.pallas_call(
        kernel,
        out_shape=jax.ShapeDtypeStruct((n_lvl, num_classes + 5, Lmax),
                                       jnp.float32),
        grid_spec=pltpu.PrefetchScalarGridSpec(
            num_scalar_prefetch=0,
            grid=(n_lvl,),
            in_specs=[
                pl.BlockSpec((1, C, Lmax), lambda l: (l, 0, 0)),     # features
                pl.BlockSpec((1, 9, Lmax), lambda l: (l, 0, 0)),     # tap masks
                pl.BlockSpec((9, R, C), lambda l: (0, 0, 0)),        # weights
                pl.BlockSpec((R, 1), lambda l: (0, 0)),              # biases
            ],
            out_specs=pl.BlockSpec((1, num_classes + 5, Lmax),
                                   lambda l: (l, 0, 0)),
            scratch_shapes=[pltpu.VMEM((C, 2 * off + Lmax), jnp.float32)],
        ),
        compiler_params=pltpu.CompilerParams(
            dimension_semantics=("parallel",)),
    )(x_packed, masks, w_all, b_all)

    cls_scores, bbox_preds, centernesses = [], [], []
    for li, (N, _, H, W) in enumerate(shapes):
        lu = N * H * pitch
        o = out[li, :, :lu].reshape(num_classes + 5, N, H, pitch)[..., :W]
        o = jnp.transpose(o, (1, 0, 2, 3)).astype(features[li].dtype)
        cls_scores.append(o[:, 0:num_classes])
        bbox_preds.append(o[:, num_classes:num_classes + 4])
        centernesses.append(o[:, num_classes + 4:num_classes + 5])
    return tuple(cls_scores), tuple(bbox_preds), tuple(centernesses)


# ---------------------------------------------------------------------------
# FCOS head parameters + forward
# ---------------------------------------------------------------------------
class FCOSHeadPallas:
    def __init__(self, key, in_channels=4, num_classes=4, fpn_strides=(8, 16),
                 num_shared_convs=1, num_stacked_convs=2, prior_prob=0.01,
                 ctr_on_reg=True):
        self.in_channels = in_channels
        self.num_classes = num_classes
        self.fpn_strides = fpn_strides
        self.ctr_on_reg = ctr_on_reg
        self.prior_prob = prior_prob
        self.num_indep = num_stacked_convs - num_shared_convs

        std = prior_prob                     # normal_init(m, std=prior_prob)
        keys = iter(jax.random.split(key, 64))

        def conv_params(cin, cout, bias_val=0.0):
            w_hwio = std * jax.random.normal(next(keys), (3, 3, cin, cout),
                                             jnp.float32)
            b = jnp.full((cout,), bias_val, jnp.float32)
            return {"hwio": w_hwio, "b": b}

        c = in_channels
        self.shared_convs = [conv_params(c, c) for _ in range(num_shared_convs)]
        self.cls_convs = [conv_params(c, c) for _ in range(self.num_indep)]
        self.reg_convs = [conv_params(c, c) for _ in range(self.num_indep)]
        bias_cls = -math.log((1.0 - prior_prob) / prior_prob)
        self.cls_logits = conv_params(c, num_classes, bias_val=bias_cls)
        self.bbox_pred = conv_params(c, 4)
        self.centerness = conv_params(c, 1)
        self.scales = tuple(1.0 for _ in fpn_strides)     # Scale(1.0) / level

        # Stack every conv of the head into ONE weight tensor (9, R, C) and
        # ONE bias tensor (R, 1), in the exact row order the kernel consumes:
        # shared convs, fused first cls/reg conv, remaining cls convs,
        # remaining reg convs, then the fused output heads.
        groups = list(self.shared_convs)
        if self.num_indep >= 1:
            groups += [self.cls_convs[0], self.reg_convs[0]]
            groups += self.cls_convs[1:]
            groups += self.reg_convs[1:]
        if ctr_on_reg:
            groups += [self.cls_logits, self.bbox_pred, self.centerness]
        else:
            groups += [self.cls_logits, self.centerness, self.bbox_pred]
        self._w_all = jnp.concatenate(
            [_group_weight(p["hwio"]) for p in groups], axis=1)
        self._b_all = jnp.concatenate([p["b"] for p in groups]).reshape(-1, 1)

    # ---- Pallas forward -----------------------------------------------------
    def forward(self, features_nchw):
        cls_scores, bbox_preds, centernesses = fcos_head_forward(
            tuple(features_nchw), self._w_all, self._b_all,
            num_classes=self.num_classes, n_shared=len(self.shared_convs),
            n_indep=self.num_indep, ctr_on_reg=self.ctr_on_reg,
            scales=self.scales)
        return list(cls_scores), list(bbox_preds), list(centernesses)

    # ---- Pure-JAX reference (correctness check only) ------------------------
    def forward_ref(self, features_nchw):
        def conv_ref(x, p, relu=False, scale=1.0, do_exp=False):
            y = lax.conv_general_dilated(
                x, p["hwio"], window_strides=(1, 1), padding="SAME",
                dimension_numbers=("NHWC", "HWIO", "NHWC")) + p["b"]
            if relu:
                y = jnp.maximum(y, 0.0)
            if scale != 1.0:
                y = y * jnp.float32(scale)
            if do_exp:
                y = jnp.exp(y)
            return y

        cls_scores, bbox_preds, centernesses = [], [], []
        for lvl, feat in enumerate(features_nchw):
            x = jnp.transpose(feat, (0, 2, 3, 1))   # NCHW -> NHWC
            cls_feat = x
            reg_feat = x
            for p in self.shared_convs:
                cls_feat = conv_ref(cls_feat, p, relu=True)
                reg_feat = cls_feat
            for p in self.cls_convs:
                cls_feat = conv_ref(cls_feat, p, relu=True)
            cls_score = conv_ref(cls_feat, self.cls_logits)
            for p in self.reg_convs:
                reg_feat = conv_ref(reg_feat, p, relu=True)
            bbox = conv_ref(reg_feat, self.bbox_pred,
                            scale=self.scales[lvl], do_exp=True)
            ctr_src = reg_feat if self.ctr_on_reg else cls_feat
            ctr = conv_ref(ctr_src, self.centerness)
            cls_scores.append(jnp.transpose(cls_score, (0, 3, 1, 2)))
            bbox_preds.append(jnp.transpose(bbox, (0, 3, 1, 2)))
            centernesses.append(jnp.transpose(ctr, (0, 3, 1, 2)))
        return cls_scores, bbox_preds, centernesses


if __name__ == "__main__":
    root = jax.random.PRNGKey(0)
    k_params, k_f0, k_f1 = jax.random.split(root, 3)

    head = FCOSHeadPallas(k_params, in_channels=4, num_classes=4,
                          fpn_strides=(8, 16), num_shared_convs=1,
                          num_stacked_convs=2, prior_prob=0.01,
                          ctr_on_reg=True)

    # Two FPN levels, high-to-low resolution, NCHW like PyTorch.
    features = [
        jax.random.normal(k_f0, (2, 4, 16, 16), jnp.float32),
        jax.random.normal(k_f1, (2, 4, 8, 8), jnp.float32),
    ]

    outs = head.forward(features)
    jax.block_until_ready(outs)

    refs = head.forward_ref(features)
    for got, exp in zip(jax.tree_util.tree_leaves(outs),
                        jax.tree_util.tree_leaves(refs)):
        assert got.shape == exp.shape and got.dtype == exp.dtype
        err = float(jnp.max(jnp.abs(got - exp)))
        assert jnp.allclose(got, exp, atol=2e-4, rtol=2e-4), \
            f"mismatch: max abs err {err}"

    print("KERNEL_OK")
</pallas_src>

<mosaic_0001>
module attributes {stable_mosaic.version = 11 : i64} {
  func.func @_fcos_head_kernel(%arg0: i32, %arg1: memref<1x4x512xf32, #tpu.memory_space<vmem>>, %arg2: memref<1x9x512xf32, #tpu.memory_space<vmem>>, %arg3: memref<9x21x4xf32, #tpu.memory_space<vmem>>, %arg4: memref<21x1xf32, #tpu.memory_space<vmem>>, %arg5: memref<1x9x512xf32, #tpu.memory_space<vmem>>, %arg6: memref<4x768xf32, #tpu.memory_space<vmem>>) attributes {dimension_semantics = [#tpu.dimension_semantics<parallel>], iteration_bounds = array<i64: 2>, scalar_prefetch = 0 : i64, scratch_operands = 1 : i64, tpu.core_type = #tpu.core_type<tc>, window_params = [{transform_indices = @transform_0, window_bounds = array<i64: 1, 4, 512>}, {transform_indices = @transform_1, window_bounds = array<i64: 1, 9, 512>}, {pipeline_mode = #tpu.pipeline_mode<synchronous>, transform_indices = @transform_2, window_bounds = array<i64: 9, 21, 4>}, {pipeline_mode = #tpu.pipeline_mode<synchronous>, transform_indices = @transform_3, window_bounds = array<i64: 21, 1>}, {transform_indices = @transform_4, window_bounds = array<i64: 1, 9, 512>}]} {
    %cst = arith.constant 0.000000e+00 : f32
    %0 = vector.broadcast %cst : f32 to vector<4x128xf32>
    %c0 = arith.constant 0 : index
    %c0_0 = arith.constant 0 : index
    %1 = vector.load %arg6[%c0, %c0_0] : memref<4x768xf32, #tpu.memory_space<vmem>>, vector<4x128xf32>
    tpu.vector_store %arg6[%c0, %c0_0], %0 {strides = array<i32>} : memref<4x768xf32, #tpu.memory_space<vmem>>, vector<4x128xf32>,
    %cst_1 = arith.constant 0.000000e+00 : f32
    %2 = vector.broadcast %cst_1 : f32 to vector<4x128xf32>
    %c0_2 = arith.constant 0 : index
    %c640 = arith.constant 640 : index
    %3 = vector.load %arg6[%c0_2, %c640] : memref<4x768xf32, #tpu.memory_space<vmem>>, vector<4x128xf32>
    tpu.vector_store %arg6[%c0_2, %c640], %2 {strides = array<i32>} : memref<4x768xf32, #tpu.memory_space<vmem>>, vector<4x128xf32>,
    %c0_3 = arith.constant 0 : index
    %c0_4 = arith.constant 0 : index
    %c0_5 = arith.constant 0 : index
    %4 = vector.load %arg1[%c0_3, %c0_4, %c0_5] : memref<1x4x512xf32, #tpu.memory_space<vmem>>, vector<1x4x512xf32>
    %5 = vector.shape_cast %4 : vector<1x4x512xf32> to vector<4x512xf32>
    %c0_6 = arith.constant 0 : index
    %c128 = arith.constant 128 : index
    %6 = vector.load %arg6[%c0_6, %c128] : memref<4x768xf32, #tpu.memory_space<vmem>>, vector<4x512xf32>
    tpu.vector_store %arg6[%c0_6, %c128], %5 {strides = array<i32>} : memref<4x768xf32, #tpu.memory_space<vmem>>, vector<4x512xf32>,
    %c0_7 = arith.constant 0 : index
    %c111 = arith.constant 111 : index
    %7 = vector.load %arg6[%c0_7, %c111] : memref<4x768xf32, #tpu.memory_space<vmem>>, vector<4x512xf32>
    %c0_8 = arith.constant 0 : index
    %c0_9 = arith.constant 0 : index
    %c0_10 = arith.constant 0 : index
    %8 = vector.load %arg2[%c0_8, %c0_9, %c0_10] : memref<1x9x512xf32, #tpu.memory_space<vmem>>, vector<1x1x512xf32>
    %9 = vector.shape_cast %8 : vector<1x1x512xf32> to vector<1x512xf32>
    %10 = vector.broadcast %9 : vector<1x512xf32> to vector<4x512xf32>
    %11 = arith.mulf %7, %10 : vector<4x512xf32>
    %c0_11 = arith.constant 0 : index
    %c0_12 = arith.constant 0 : index
    %c0_13 = arith.constant 0 : index
    %12 = vector.load %arg3[%c0_11, %c0_12, %c0_13] : memref<9x21x4xf32, #tpu.memory_space<vmem>>, vector<1x4x4xf32>
    %13 = vector.shape_cast %12 : vector<1x4x4xf32> to vector<4x4xf32>
    %cst_14 = arith.constant dense<0.000000e+00> : vector<4x512xf32>
    %14 = tpu.matmul %13, %11, %cst_14 {dimension_numbers = #tpu.dot_dimension_numbers<[1], [0], [0], [1], [0, 0, 1, 1], [], []>} : vector<4x4xf32>, vector<4x512xf32>, vector<4x512xf32> -> vector<4x512xf32>
    %c0_15 = arith.constant 0 : index
    %c112 = arith.constant 112 : index
    %15 = vector.load %arg6[%c0_15, %c112] : memref<4x768xf32, #tpu.memory_space<vmem>>, vector<4x512xf32>
    %c0_16 = arith.constant 0 : index
    %c1 = arith.constant 1 : index
    %c0_17 = arith.constant 0 : index
    %16 = vector.load %arg2[%c0_16, %c1, %c0_17] : memref<1x9x512xf32, #tpu.memory_space<vmem>>, vector<1x1x512xf32>
    %17 = vector.shape_cast %16 : vector<1x1x512xf32> to vector<1x512xf32>
    %18 = vector.broadcast %17 : vector<1x512xf32> to vector<4x512xf32>
    %19 = arith.mulf %15, %18 : vector<4x512xf32>
    %c1_18 = arith.constant 1 : index
    %c0_19 = arith.constant 0 : index
    %c0_20 = arith.constant 0 : index
    %20 = vector.load %arg3[%c1_18, %c0_19, %c0_20] : memref<9x21x4xf32, #tpu.memory_space<vmem>>, vector<1x4x4xf32>
    %21 = vector.shape_cast %20 : vector<1x4x4xf32> to vector<4x4xf32>
    %cst_21 = arith.constant dense<0.000000e+00> : vector<4x512xf32>
    %22 = tpu.matmul %21, %19, %cst_21 {dimension_numbers = #tpu.dot_dimension_numbers<[1], [0], [0], [1], [0, 0, 1, 1], [], []>} : vector<4x4xf32>, vector<4x512xf32>, vector<4x512xf32> -> vector<4x512xf32>
    %23 = arith.addf %14, %22 : vector<4x512xf32>
    %c0_22 = arith.constant 0 : index
    %c113 = arith.constant 113 : index
    %24 = vector.load %arg6[%c0_22, %c113] : memref<4x768xf32, #tpu.memory_space<vmem>>, vector<4x512xf32>
    %c0_23 = arith.constant 0 : index
    %c2 = arith.constant 2 : index
    %c0_24 = arith.constant 0 : index
    %25 = vector.load %arg2[%c0_23, %c2, %c0_24] : memref<1x9x512xf32, #tpu.memory_space<vmem>>, vector<1x1x512xf32>
    %26 = vector.shape_cast %25 : vector<1x1x512xf32> to vector<1x512xf32>
    %27 = vector.broadcast %26 : vector<1x512xf32> to vector<4x512xf32>
    %28 = arith.mulf %24, %27 : vector<4x512xf32>
    %c2_25 = arith.constant 2 : index
    %c0_26 = arith.constant 0 : index
    %c0_27 = arith.constant 0 : index
    %29 = vector.load %arg3[%c2_25, %c0_26, %c0_27] : memref<9x21x4xf32, #tpu.memory_space<vmem>>, vector<1x4x4xf32>
    %30 = vector.shape_cast %29 : vector<1x4x4xf32> to vector<4x4xf32>
    %cst_28 = arith.constant dense<0.000000e+00> : vector<4x512xf32>
    %31 = tpu.matmul %30, %28, %cst_28 {dimension_numbers = #tpu.dot_dimension_numbers<[1], [0], [0], [1], [0, 0, 1, 1], [], []>} : vector<4x4xf32>, vector<4x512xf32>, vector<4x512xf32> -> vector<4x512xf32>
    %32 = arith.addf %23, %31 : vector<4x512xf32>
    %c0_29 = arith.constant 0 : index
    %c127 = arith.constant 127 : index
    %33 = vector.load %arg6[%c0_29, %c127] : memref<4x768xf32, #tpu.memory_space<vmem>>, vector<4x512xf32>
    %c0_30 = arith.constant 0 : index
    %c3 = arith.constant 3 : index
    %c0_31 = arith.constant 0 : index
    %34 = vector.load %arg2[%c0_30, %c3, %c0_31] : memref<1x9x512xf32, #tpu.memory_space<vmem>>, vector<1x1x512xf32>
    %35 = vector.shape_cast %34 : vector<1x1x512xf32> to vector<1x512xf32>
    %36 = vector.broadcast %35 : vector<1x512xf32> to vector<4x512xf32>
    %37 = arith.mulf %33, %36 : vector<4x512xf32>
    %c3_32 = arith.constant 3 : index
    %c0_33 = arith.constant 0 : index
    %c0_34 = arith.constant 0 : index
    %38 = vector.load %arg3[%c3_32, %c0_33, %c0_34] : memref<9x21x4xf32, #tpu.memory_space<vmem>>, vector<1x4x4xf32>
    %39 = vector.shape_cast %38 : vector<1x4x4xf32> to vector<4x4xf32>
    %cst_35 = arith.constant dense<0.000000e+00> : vector<4x512xf32>
    %40 = tpu.matmul %39, %37, %cst_35 {dimension_numbers = #tpu.dot_dimension_numbers<[1], [0], [0], [1], [0, 0, 1, 1], [], []>} : vector<4x4xf32>, vector<4x512xf32>, vector<4x512xf32> -> vector<4x512xf32>
    %41 = arith.addf %32, %40 : vector<4x512xf32>
    %c0_36 = arith.constant 0 : index
    %c128_37 = arith.constant 128 : index
    %42 = vector.load %arg6[%c0_36, %c128_37] : memref<4x768xf32, #tpu.memory_space<vmem>>, vector<4x512xf32>
    %c0_38 = arith.constant 0 : index
    %c4 = arith.constant 4 : index
    %c0_39 = arith.constant 0 : index
    %43 = vector.load %arg2[%c0_38, %c4, %c0_39] : memref<1x9x512xf32, #tpu.memory_space<vmem>>, vector<1x1x512xf32>
    %44 = vector.shape_cast %43 : vector<1x1x512xf32> to vector<1x512xf32>
    %45 = vector.broadcast %44 : vector<1x512xf32> to vector<4x512xf32>
    %46 = arith.mulf %42, %45 : vector<4x512xf32>
    %c4_40 = arith.constant 4 : index
    %c0_41 = arith.constant 0 : index
    %c0_42 = arith.constant 0 : index
    %47 = vector.load %arg3[%c4_40, %c0_41, %c0_42] : memref<9x21x4xf32, #tpu.memory_space<vmem>>, vector<1x4x4xf32>
    %48 = vector.shape_cast %47 : vector<1x4x4xf32> to vector<4x4xf32>
    %cst_43 = arith.constant dense<0.000000e+00> : vector<4x512xf32>
    %49 = tpu.matmul %48, %46, %cst_43 {dimension_numbers = #tpu.dot_dimension_numbers<[1], [0], [0], [1], [0, 0, 1, 1], [], []>} : vector<4x4xf32>, vector<4x512xf32>, vector<4x512xf32> -> vector<4x512xf32>
    %50 = arith.addf %41, %49 : vector<4x512xf32>
    %c0_44 = arith.constant 0 : index
    %c129 = arith.constant 129 : index
    %51 = vector.load %arg6[%c0_44, %c129] : memref<4x768xf32, #tpu.memory_space<vmem>>, vector<4x512xf32>
    %c0_45 = arith.constant 0 : index
    %c5 = arith.constant 5 : index
    %c0_46 = arith.constant 0 : index
    %52 = vector.load %arg2[%c0_45, %c5, %c0_46] : memref<1x9x512xf32, #tpu.memory_space<vmem>>, vector<1x1x512xf32>
    %53 = vector.shape_cast %52 : vector<1x1x512xf32> to vector<1x512xf32>
    %54 = vector.broadcast %53 : vector<1x512xf32> to vector<4x512xf32>
    %55 = arith.mulf %51, %54 : vector<4x512xf32>
    %c5_47 = arith.constant 5 : index
    %c0_48 = arith.constant 0 : index
    %c0_49 = arith.constant 0 : index
    %56 = vector.load %arg3[%c5_47, %c0_48, %c0_49] : memref<9x21x4xf32, #tpu.memory_space<vmem>>, vector<1x4x4xf32>
    %57 = vector.shape_cast %56 : vector<1x4x4xf32> to vector<4x4xf32>
    %cst_50 = arith.constant dense<0.000000e+00> : vector<4x512xf32>
    %58 = tpu.matmul %57, %55, %cst_50 {dimension_numbers = #tpu.dot_dimension_numbers<[1], [0], [0], [1], [0, 0, 1, 1], [], []>} : vector<4x4xf32>, vector<4x512xf32>, vector<4x512xf32> -> vector<4x512xf32>
    %59 = arith.addf %50, %58 : vector<4x512xf32>
    %c0_51 = arith.constant 0 : index
    %c143 = arith.constant 143 : index
    %60 = vector.load %arg6[%c0_51, %c143] : memref<4x768xf32, #tpu.memory_space<vmem>>, vector<4x512xf32>
    %c0_52 = arith.constant 0 : index
    %c6 = arith.constant 6 : index
    %c0_53 = arith.constant 0 : index
    %61 = vector.load %arg2[%c0_52, %c6, %c0_53] : memref<1x9x512xf32, #tpu.memory_space<vmem>>, vector<1x1x512xf32>
    %62 = vector.shape_cast %61 : vector<1x1x512xf32> to vector<1x512xf32>
    %63 = vector.broadcast %62 : vector<1x512xf32> to vector<4x512xf32>
    %64 = arith.mulf %60, %63 : vector<4x512xf32>
    %c6_54 = arith.constant 6 : index
    %c0_55 = arith.constant 0 : index
    %c0_56 = arith.constant 0 : index
    %65 = vector.load %arg3[%c6_54, %c0_55, %c0_56] : memref<9x21x4xf32, #tpu.memory_space<vmem>>, vector<1x4x4xf32>
    %66 = vector.shape_cast %65 : vector<1x4x4xf32> to vector<4x4xf32>
    %cst_57 = arith.constant dense<0.000000e+00> : vector<4x512xf32>
    %67 = tpu.matmul %66, %64, %cst_57 {dimension_numbers = #tpu.dot_dimension_numbers<[1], [0], [0], [1], [0, 0, 1, 1], [], []>} : vector<4x4xf32>, vector<4x512xf32>, vector<4x512xf32> -> vector<4x512xf32>
    %68 = arith.addf %59, %67 : vector<4x512xf32>
    %c0_58 = arith.constant 0 : index
    %c144 = arith.constant 144 : index
    %69 = vector.load %arg6[%c0_58, %c144] : memref<4x768xf32, #tpu.memory_space<vmem>>, vector<4x512xf32>
    %c0_59 = arith.constant 0 : index
    %c7 = arith.constant 7 : index
    %c0_60 = arith.constant 0 : index
    %70 = vector.load %arg2[%c0_59, %c7, %c0_60] : memref<1x9x512xf32, #tpu.memory_space<vmem>>, vector<1x1x512xf32>
    %71 = vector.shape_cast %70 : vector<1x1x512xf32> to vector<1x512xf32>
    %72 = vector.broadcast %71 : vector<1x512xf32> to vector<4x512xf32>
    %73 = arith.mulf %69, %72 : vector<4x512xf32>
    %c7_61 = arith.constant 7 : index
    %c0_62 = arith.constant 0 : index
    %c0_63 = arith.constant 0 : index
    %74 = vector.load %arg3[%c7_61, %c0_62, %c0_63] : memref<9x21x4xf32, #tpu.memory_space<vmem>>, vector<1x4x4xf32>
    %75 = vector.shape_cast %74 : vector<1x4x4xf32> to vector<4x4xf32>
    %cst_64 = arith.constant dense<0.000000e+00> : vector<4x512xf32>
    %76 = tpu.matmul %75, %73, %cst_64 {dimension_numbers = #tpu.dot_dimension_numbers<[1], [0], [0], [1], [0, 0, 1, 1], [], []>} : vector<4x4xf32>, vector<4x512xf32>, vector<4x512xf32> -> vector<4x512xf32>
    %77 = arith.addf %68, %76 : vector<4x512xf32>
    %c0_65 = arith.constant 0 : index
    %c145 = arith.constant 145 : index
    %78 = vector.load %arg6[%c0_65, %c145] : memref<4x768xf32, #tpu.memory_space<vmem>>, vector<4x512xf32>
    %c0_66 = arith.constant 0 : index
    %c8 = arith.constant 8 : index
    %c0_67 = arith.constant 0 : index
    %79 = vector.load %arg2[%c0_66, %c8, %c0_67] : memref<1x9x512xf32, #tpu.memory_space<vmem>>, vector<1x1x512xf32>
    %80 = vector.shape_cast %79 : vector<1x1x512xf32> to vector<1x512xf32>
    %81 = vector.broadcast %80 : vector<1x512xf32> to vector<4x512xf32>
    %82 = arith.mulf %78, %81 : vector<4x512xf32>
    %c8_68 = arith.constant 8 : index
    %c0_69 = arith.constant 0 : index
    %c0_70 = arith.constant 0 : index
    %83 = vector.load %arg3[%c8_68, %c0_69, %c0_70] : memref<9x21x4xf32, #tpu.memory_space<vmem>>, vector<1x4x4xf32>
    %84 = vector.shape_cast %83 : vector<1x4x4xf32> to vector<4x4xf32>
    %cst_71 = arith.constant dense<0.000000e+00> : vector<4x512xf32>
    %85 = tpu.matmul %84, %82, %cst_71 {dimension_numbers = #tpu.dot_dimension_numbers<[1], [0], [0], [1], [0, 0, 1, 1], [], []>} : vector<4x4xf32>, vector<4x512xf32>, vector<4x512xf32> -> vector<4x512xf32>
    %86 = arith.addf %77, %85 : vector<4x512xf32>
    %c0_72 = arith.constant 0 : index
    %c0_73 = arith.constant 0 : index
    %87 = vector.load %arg4[%c0_72, %c0_73] : memref<21x1xf32, #tpu.memory_space<vmem>>, vector<4x1xf32>
    %88 = vector.broadcast %87 : vector<4x1xf32> to vector<4x512xf32>
    %89 = arith.addf %86, %88 : vector<4x512xf32>
    %cst_74 = arith.constant 0.000000e+00 : f32
    %90 = vector.broadcast %cst_74 : f32 to vector<4x512xf32>
    %91 = arith.maximumf %89, %90 : vector<4x512xf32>
    %c0_75 = arith.constant 0 : index
    %c128_76 = arith.constant 128 : index
    %92 = vector.load %arg6[%c0_75, %c128_76] : memref<4x768xf32, #tpu.memory_space<vmem>>, vector<4x512xf32>
    tpu.vector_store %arg6[%c0_75, %c128_76], %91 {strides = array<i32>} : memref<4x768xf32, #tpu.memory_space<vmem>>, vector<4x512xf32>,
    %c0_77 = arith.constant 0 : index
    %c111_78 = arith.constant 111 : index
    %93 = vector.load %arg6[%c0_77, %c111_78] : memref<4x768xf32, #tpu.memory_space<vmem>>, vector<4x512xf32>
    %c0_79 = arith.constant 0 : index
    %c0_80 = arith.constant 0 : index
    %c0_81 = arith.constant 0 : index
    %94 = vector.load %arg2[%c0_79, %c0_80, %c0_81] : memref<1x9x512xf32, #tpu.memory_space<vmem>>, vector<1x1x512xf32>
    %95 = vector.shape_cast %94 : vector<1x1x512xf32> to vector<1x512xf32>
    %96 = vector.broadcast %95 : vector<1x512xf32> to vector<4x512xf32>
    %97 = arith.mulf %93, %96 : vector<4x512xf32>
    %c0_82 = arith.constant 0 : index
    %c4_83 = arith.constant 4 : index
    %c0_84 = arith.constant 0 : index
    %98 = vector.load %arg3[%c0_82, %c4_83, %c0_84] : memref<9x21x4xf32, #tpu.memory_space<vmem>>, vector<1x8x4xf32>
    %99 = vector.shape_cast %98 : vector<1x8x4xf32> to vector<8x4xf32>
    %cst_85 = arith.constant dense<0.000000e+00> : vector<8x512xf32>
    %100 = tpu.matmul %99, %97, %cst_85 {dimension_numbers = #tpu.dot_dimension_numbers<[1], [0], [0], [1], [0, 0, 1, 1], [], []>} : vector<8x4xf32>, vector<4x512xf32>, vector<8x512xf32> -> vector<8x512xf32>
    %c0_86 = arith.constant 0 : index
    %c112_87 = arith.constant 112 : index
    %101 = vector.load %arg6[%c0_86, %c112_87] : memref<4x768xf32, #tpu.memory_space<vmem>>, vector<4x512xf32>
    %c0_88 = arith.constant 0 : index
    %c1_89 = arith.constant 1 : index
    %c0_90 = arith.constant 0 : index
    %102 = vector.load %arg2[%c0_88, %c1_89, %c0_90] : memref<1x9x512xf32, #tpu.memory_space<vmem>>, vector<1x1x512xf32>
    %103 = vector.shape_cast %102 : vector<1x1x512xf32> to vector<1x512xf32>
    %104 = vector.broadcast %103 : vector<1x512xf32> to vector<4x512xf32>
    %105 = arith.mulf %101, %104 : vector<4x512xf32>
    %c1_91 = arith.constant 1 : index
    %c4_92 = arith.constant 4 : index
    %c0_93 = arith.constant 0 : index
    %106 = vector.load %arg3[%c1_91, %c4_92, %c0_93] : memref<9x21x4xf32, #tpu.memory_space<vmem>>, vector<1x8x4xf32>
    %107 = vector.shape_cast %106 : vector<1x8x4xf32> to vector<8x4xf32>
    %cst_94 = arith.constant dense<0.000000e+00> : vector<8x512xf32>
    %108 = tpu.matmul %107, %105, %cst_94 {dimension_numbers = #tpu.dot_dimension_numbers<[1], [0], [0], [1], [0, 0, 1, 1], [], []>} : vector<8x4xf32>, vector<4x512xf32>, vector<8x512xf32> -> vector<8x512xf32>
    %109 = arith.addf %100, %108 : vector<8x512xf32>
    %c0_95 = arith.constant 0 : index
    %c113_96 = arith.constant 113 : index
    %110 = vector.load %arg6[%c0_95, %c113_96] : memref<4x768xf32, #tpu.memory_space<vmem>>, vector<4x512xf32>
    %c0_97 = arith.constant 0 : index
    %c2_98 = arith.constant 2 : index
    %c0_99 = arith.constant 0 : index
    %111 = vector.load %arg2[%c0_97, %c2_98, %c0_99] : memref<1x9x512xf32, #tpu.memory_space<vmem>>, vector<1x1x512xf32>
    %112 = vector.shape_cast %111 : vector<1x1x512xf32> to vector<1x512xf32>
    %113 = vector.broadcast %112 : vector<1x512xf32> to vector<4x512xf32>
    %114 = arith.mulf %110, %113 : vector<4x512xf32>
    %c2_100 = arith.constant 2 : index
    %c4_101 = arith.constant 4 : index
    %c0_102 = arith.constant 0 : index
    %115 = vector.load %arg3[%c2_100, %c4_101, %c0_102] : memref<9x21x4xf32, #tpu.memory_space<vmem>>, vector<1x8x4xf32>
    %116 = vector.shape_cast %115 : vector<1x8x4xf32> to vector<8x4xf32>
    %cst_103 = arith.constant dense<0.000000e+00> : vector<8x512xf32>
    %117 = tpu.matmul %116, %114, %cst_103 {dimension_numbers = #tpu.dot_dimension_numbers<[1], [0], [0], [1], [0, 0, 1, 1], [], []>} : vector<8x4xf32>, vector<4x512xf32>, vector<8x512xf32> -> vector<8x512xf32>
    %118 = arith.addf %109, %117 : vector<8x512xf32>
    %c0_104 = arith.constant 0 : index
    %c127_105 = arith.constant 127 : index
    %119 = vector.load %arg6[%c0_104, %c127_105] : memref<4x768xf32, #tpu.memory_space<vmem>>, vector<4x512xf32>
    %c0_106 = arith.constant 0 : index
    %c3_107 = arith.constant 3 : index
    %c0_108 = arith.constant 0 : index
    %120 = vector.load %arg2[%c0_106, %c3_107, %c0_108] : memref<1x9x512xf32, #tpu.memory_space<vmem>>, vector<1x1x512xf32>
    %121 = vector.shape_cast %120 : vector<1x1x512xf32> to vector<1x512xf32>
    %122 = vector.broadcast %121 : vector<1x512xf32> to vector<4x512xf32>
    %123 = arith.mulf %119, %122 : vector<4x512xf32>
    %c3_109 = arith.constant 3 : index
    %c4_110 = arith.constant 4 : index
    %c0_111 = arith.constant 0 : index
    %124 = vector.load %arg3[%c3_109, %c4_110, %c0_111] : memref<9x21x4xf32, #tpu.memory_space<vmem>>, vector<1x8x4xf32>
    %125 = vector.shape_cast %124 : vector<1x8x4xf32> to vector<8x4xf32>
    %cst_112 = arith.constant dense<0.000000e+00> : vector<8x512xf32>
    %126 = tpu.matmul %125, %123, %cst_112 {dimension_numbers = #tpu.dot_dimension_numbers<[1], [0], [0], [1], [0, 0, 1, 1], [], []>} : vector<8x4xf32>, vector<4x512xf32>, vector<8x512xf32> -> vector<8x512xf32>
    %127 = arith.addf %118, %126 : vector<8x512xf32>
    %c0_113 = arith.constant 0 : index
    %c128_114 = arith.constant 128 : index
    %128 = vector.load %arg6[%c0_113, %c128_114] : memref<4x768xf32, #tpu.memory_space<vmem>>, vector<4x512xf32>
    %c0_115 = arith.constant 0 : index
    %c4_116 = arith.constant 4 : index
    %c0_117 = arith.constant 0 : index
    %129 = vector.load %arg2[%c0_115, %c4_116, %c0_117] : memref<1x9x512xf32, #tpu.memory_space<vmem>>, vector<1x1x512xf32>
    %130 = vector.shape_cast %129 : vector<1x1x512xf32> to vector<1x512xf32>
    %131 = vector.broadcast %130 : vector<1x512xf32> to vector<4x512xf32>
    %132 = arith.mulf %128, %131 : vector<4x512xf32>
    %c4_118 = arith.constant 4 : index
    %c4_119 = arith.constant 4 : index
    %c0_120 = arith.constant 0 : index
    %133 = vector.load %arg3[%c4_118, %c4_119, %c0_120] : memref<9x21x4xf32, #tpu.memory_space<vmem>>, vector<1x8x4xf32>
    %134 = vector.shape_cast %133 : vector<1x8x4xf32> to vector<8x4xf32>
    %cst_121 = arith.constant dense<0.000000e+00> : vector<8x512xf32>
    %135 = tpu.matmul %134, %132, %cst_121 {dimension_numbers = #tpu.dot_dimension_numbers<[1], [0], [0], [1], [0, 0, 1, 1], [], []>} : vector<8x4xf32>, vector<4x512xf32>, vector<8x512xf32> -> vector<8x512xf32>
    %136 = arith.addf %127, %135 : vector<8x512xf32>
    %c0_122 = arith.constant 0 : index
    %c129_123 = arith.constant 129 : index
    %137 = vector.load %arg6[%c0_122, %c129_123] : memref<4x768xf32, #tpu.memory_space<vmem>>, vector<4x512xf32>
    %c0_124 = arith.constant 0 : index
    %c5_125 = arith.constant 5 : index
    %c0_126 = arith.constant 0 : index
    %138 = vector.load %arg2[%c0_124, %c5_125, %c0_126] : memref<1x9x512xf32, #tpu.memory_space<vmem>>, vector<1x1x512xf32>
    %139 = vector.shape_cast %138 : vector<1x1x512xf32> to vector<1x512xf32>
    %140 = vector.broadcast %139 : vector<1x512xf32> to vector<4x512xf32>
    %141 = arith.mulf %137, %140 : vector<4x512xf32>
    %c5_127 = arith.constant 5 : index
    %c4_128 = arith.constant 4 : index
    %c0_129 = arith.constant 0 : index
    %142 = vector.load %arg3[%c5_127, %c4_128, %c0_129] : memref<9x21x4xf32, #tpu.memory_space<vmem>>, vector<1x8x4xf32>
    %143 = vector.shape_cast %142 : vector<1x8x4xf32> to vector<8x4xf32>
    %cst_130 = arith.constant dense<0.000000e+00> : vector<8x512xf32>
    %144 = tpu.matmul %143, %141, %cst_130 {dimension_numbers = #tpu.dot_dimension_numbers<[1], [0], [0], [1], [0, 0, 1, 1], [], []>} : vector<8x4xf32>, vector<4x512xf32>, vector<8x512xf32> -> vector<8x512xf32>
    %145 = arith.addf %136, %144 : vector<8x512xf32>
    %c0_131 = arith.constant 0 : index
    %c143_132 = arith.constant 143 : index
    %146 = vector.load %arg6[%c0_131, %c143_132] : memref<4x768xf32, #tpu.memory_space<vmem>>, vector<4x512xf32>
    %c0_133 = arith.constant 0 : index
    %c6_134 = arith.constant 6 : index
    %c0_135 = arith.constant 0 : index
    %147 = vector.load %arg2[%c0_133, %c6_134, %c0_135] : memref<1x9x512xf32, #tpu.memory_space<vmem>>, vector<1x1x512xf32>
    %148 = vector.shape_cast %147 : vector<1x1x512xf32> to vector<1x512xf32>
    %149 = vector.broadcast %148 : vector<1x512xf32> to vector<4x512xf32>
    %150 = arith.mulf %146, %149 : vector<4x512xf32>
    %c6_136 = arith.constant 6 : index
    %c4_137 = arith.constant 4 : index
    %c0_138 = arith.constant 0 : index
    %151 = vector.load %arg3[%c6_136, %c4_137, %c0_138] : memref<9x21x4xf32, #tpu.memory_space<vmem>>, vector<1x8x4xf32>
    %152 = vector.shape_cast %151 : vector<1x8x4xf32> to vector<8x4xf32>
    %cst_139 = arith.constant dense<0.000000e+00> : vector<8x512xf32>
    %153 = tpu.matmul %152, %150, %cst_139 {dimension_numbers = #tpu.dot_dimension_numbers<[1], [0], [0], [1], [0, 0, 1, 1], [], []>} : vector<8x4xf32>, vector<4x512xf32>, vector<8x512xf32> -> vector<8x512xf32>
    %154 = arith.addf %145, %153 : vector<8x512xf32>
    %c0_140 = arith.constant 0 : index
    %c144_141 = arith.constant 144 : index
    %155 = vector.load %arg6[%c0_140, %c144_141] : memref<4x768xf32, #tpu.memory_space<vmem>>, vector<4x512xf32>
    %c0_142 = arith.constant 0 : index
    %c7_143 = arith.constant 7 : index
    %c0_144 = arith.constant 0 : index
    %156 = vector.load %arg2[%c0_142, %c7_143, %c0_144] : memref<1x9x512xf32, #tpu.memory_space<vmem>>, vector<1x1x512xf32>
    %157 = vector.shape_cast %156 : vector<1x1x512xf32> to vector<1x512xf32>
    %158 = vector.broadcast %157 : vector<1x512xf32> to vector<4x512xf32>
    %159 = arith.mulf %155, %158 : vector<4x512xf32>
    %c7_145 = arith.constant 7 : index
    %c4_146 = arith.constant 4 : index
    %c0_147 = arith.constant 0 : index
    %160 = vector.load %arg3[%c7_145, %c4_146, %c0_147] : memref<9x21x4xf32, #tpu.memory_space<vmem>>, vector<1x8x4xf32>
    %161 = vector.shape_cast %160 : vector<1x8x4xf32> to vector<8x4xf32>
    %cst_148 = arith.constant dense<0.000000e+00> : vector<8x512xf32>
    %162 = tpu.matmul %161, %159, %cst_148 {dimension_numbers = #tpu.dot_dimension_numbers<[1], [0], [0], [1], [0, 0, 1, 1], [], []>} : vector<8x4xf32>, vector<4x512xf32>, vector<8x512xf32> -> vector<8x512xf32>
    %163 = arith.addf %154, %162 : vector<8x512xf32>
    %c0_149 = arith.constant 0 : index
    %c145_150 = arith.constant 145 : index
    %164 = vector.load %arg6[%c0_149, %c145_150] : memref<4x768xf32, #tpu.memory_space<vmem>>, vector<4x512xf32>
    %c0_151 = arith.constant 0 : index
    %c8_152 = arith.constant 8 : index
    %c0_153 = arith.constant 0 : index
    %165 = vector.load %arg2[%c0_151, %c8_152, %c0_153] : memref<1x9x512xf32, #tpu.memory_space<vmem>>, vector<1x1x512xf32>
    %166 = vector.shape_cast %165 : vector<1x1x512xf32> to vector<1x512xf32>
    %167 = vector.broadcast %166 : vector<1x512xf32> to vector<4x512xf32>
    %168 = arith.mulf %164, %167 : vector<4x512xf32>
    %c8_154 = arith.constant 8 : index
    %c4_155 = arith.constant 4 : index
    %c0_156 = arith.constant 0 : index
    %169 = vector.load %arg3[%c8_154, %c4_155, %c0_156] : memref<9x21x4xf32, #tpu.memory_space<vmem>>, vector<1x8x4xf32>
    %170 = vector.shape_cast %169 : vector<1x8x4xf32> to vector<8x4xf32>
    %cst_157 = arith.constant dense<0.000000e+00> : vector<8x512xf32>
    %171 = tpu.matmul %170, %168, %cst_157 {dimension_numbers = #tpu.dot_dimension_numbers<[1], [0], [0], [1], [0, 0, 1, 1], [], []>} : vector<8x4xf32>, vector<4x512xf32>, vector<8x512xf32> -> vector<8x512xf32>
    %172 = arith.addf %163, %171 : vector<8x512xf32>
    %c4_158 = arith.constant 4 : index
    %c0_159 = arith.constant 0 : index
    %173 = vector.load %arg4[%c4_158, %c0_159] : memref<21x1xf32, #tpu.memory_space<vmem>>, vector<8x1xf32>
    %174 = vector.broadcast %173 : vector<8x1xf32> to vector<8x512xf32>
    %175 = arith.addf %172, %174 : vector<8x512xf32>
    %cst_160 = arith.constant 0.000000e+00 : f32
    %176 = vector.broadcast %cst_160 : f32 to vector<8x512xf32>
    %177 = arith.maximumf %175, %176 : vector<8x512xf32>
    %178 = vector.extract_strided_slice %177 {offsets = [0, 0], sizes = [4, 512], strides = [1, 1]} : vector<8x512xf32> to vector<4x512xf32>
    %179 = vector.extract_strided_slice %177 {offsets = [4, 0], sizes = [4, 512], strides = [1, 1]} : vector<8x512xf32> to vector<4x512xf32>
    %c0_161 = arith.constant 0 : index
    %c128_162 = arith.constant 128 : index
    %180 = vector.load %arg6[%c0_161, %c128_162] : memref<4x768xf32, #tpu.memory_space<vmem>>, vector<4x512xf32>
    tpu.vector_store %arg6[%c0_161, %c128_162], %178 {strides = array<i32>} : memref<4x768xf32, #tpu.memory_space<vmem>>, vector<4x512xf32>,
    %c0_163 = arith.constant 0 : index
    %c111_164 = arith.constant 111 : index
    %181 = vector.load %arg6[%c0_163, %c111_164] : memref<4x768xf32, #tpu.memory_space<vmem>>, vector<4x512xf32>
    %c0_165 = arith.constant 0 : index
    %c0_166 = arith.constant 0 : index
    %c0_167 = arith.constant 0 : index
    %182 = vector.load %arg2[%c0_165, %c0_166, %c0_167] : memref<1x9x512xf32, #tpu.memory_space<vmem>>, vector<1x1x512xf32>
    %183 = vector.shape_cast %182 : vector<1x1x512xf32> to vector<1x512xf32>
    %184 = vector.broadcast %183 : vector<1x512xf32> to vector<4x512xf32>
    %185 = arith.mulf %181, %184 : vector<4x512xf32>
    %c0_168 = arith.constant 0 : index
    %c12 = arith.constant 12 : index
    %c0_169 = arith.constant 0 : index
    %186 = vector.load %arg3[%c0_168, %c12, %c0_169] : memref<9x21x4xf32, #tpu.memory_space<vmem>>, vector<1x4x4xf32>
    %187 = vector.shape_cast %186 : vector<1x4x4xf32> to vector<4x4xf32>
    %cst_170 = arith.constant dense<0.000000e+00> : vector<4x512xf32>
    %188 = tpu.matmul %187, %185, %cst_170 {dimension_numbers = #tpu.dot_dimension_numbers<[1], [0], [0], [1], [0, 0, 1, 1], [], []>} : vector<4x4xf32>, vector<4x512xf32>, vector<4x512xf32> -> vector<4x512xf32>
    %c0_171 = arith.constant 0 : index
    %c112_172 = arith.constant 112 : index
    %189 = vector.load %arg6[%c0_171, %c112_172] : memref<4x768xf32, #tpu.memory_space<vmem>>, vector<4x512xf32>
    %c0_173 = arith.constant 0 : index
    %c1_174 = arith.constant 1 : index
    %c0_175 = arith.constant 0 : index
    %190 = vector.load %arg2[%c0_173, %c1_174, %c0_175] : memref<1x9x512xf32, #tpu.memory_space<vmem>>, vector<1x1x512xf32>
    %191 = vector.shape_cast %190 : vector<1x1x512xf32> to vector<1x512xf32>
    %192 = vector.broadcast %191 : vector<1x512xf32> to vector<4x512xf32>
    %193 = arith.mulf %189, %192 : vector<4x512xf32>
    %c1_176 = arith.constant 1 : index
    %c12_177 = arith.constant 12 : index
    %c0_178 = arith.constant 0 : index
    %194 = vector.load %arg3[%c1_176, %c12_177, %c0_178] : memref<9x21x4xf32, #tpu.memory_space<vmem>>, vector<1x4x4xf32>
    %195 = vector.shape_cast %194 : vector<1x4x4xf32> to vector<4x4xf32>
    %cst_179 = arith.constant dense<0.000000e+00> : vector<4x512xf32>
    %196 = tpu.matmul %195, %193, %cst_179 {dimension_numbers = #tpu.dot_dimension_numbers<[1], [0], [0], [1], [0, 0, 1, 1], [], []>} : vector<4x4xf32>, vector<4x512xf32>, vector<4x512xf32> -> vector<4x512xf32>
    %197 = arith.addf %188, %196 : vector<4x512xf32>
    %c0_180 = arith.constant 0 : index
    %c113_181 = arith.constant 113 : index
    %198 = vector.load %arg6[%c0_180, %c113_181] : memref<4x768xf32, #tpu.memory_space<vmem>>, vector<4x512xf32>
    %c0_182 = arith.constant 0 : index
    %c2_183 = arith.constant 2 : index
    %c0_184 = arith.constant 0 : index
    %199 = vector.load %arg2[%c0_182, %c2_183, %c0_184] : memref<1x9x512xf32, #tpu.memory_space<vmem>>, vector<1x1x512xf32>
    %200 = vector.shape_cast %199 : vector<1x1x512xf32> to vector<1x512xf32>
    %201 = vector.broadcast %200 : vector<1x512xf32> to vector<4x512xf32>
    %202 = arith.mulf %198, %201 : vector<4x512xf32>
    %c2_185 = arith.constant 2 : index
    %c12_186 = arith.constant 12 : index
    %c0_187 = arith.constant 0 : index
    %203 = vector.load %arg3[%c2_185, %c12_186, %c0_187] : memref<9x21x4xf32, #tpu.memory_space<vmem>>, vector<1x4x4xf32>
    %204 = vector.shape_cast %203 : vector<1x4x4xf32> to vector<4x4xf32>
    %cst_188 = arith.constant dense<0.000000e+00> : vector<4x512xf32>
    %205 = tpu.matmul %204, %202, %cst_188 {dimension_numbers = #tpu.dot_dimension_numbers<[1], [0], [0], [1], [0, 0, 1, 1], [], []>} : vector<4x4xf32>, vector<4x512xf32>, vector<4x512xf32> -> vector<4x512xf32>
    %206 = arith.addf %197, %205 : vector<4x512xf32>
    %c0_189 = arith.constant 0 : index
    %c127_190 = arith.constant 127 : index
    %207 = vector.load %arg6[%c0_189, %c127_190] : memref<4x768xf32, #tpu.memory_space<vmem>>, vector<4x512xf32>
    %c0_191 = arith.constant 0 : index
    %c3_192 = arith.constant 3 : index
    %c0_193 = arith.constant 0 : index
    %208 = vector.load %arg2[%c0_191, %c3_192, %c0_193] : memref<1x9x512xf32, #tpu.memory_space<vmem>>, vector<1x1x512xf32>
    %209 = vector.shape_cast %208 : vector<1x1x512xf32> to vector<1x512xf32>
    %210 = vector.broadcast %209 : vector<1x512xf32> to vector<4x512xf32>
    %211 = arith.mulf %207, %210 : vector<4x512xf32>
    %c3_194 = arith.constant 3 : index
    %c12_195 = arith.constant 12 : index
    %c0_196 = arith.constant 0 : index
    %212 = vector.load %arg3[%c3_194, %c12_195, %c0_196] : memref<9x21x4xf32, #tpu.memory_space<vmem>>, vector<1x4x4xf32>
    %213 = vector.shape_cast %212 : vector<1x4x4xf32> to vector<4x4xf32>
    %cst_197 = arith.constant dense<0.000000e+00> : vector<4x512xf32>
    %214 = tpu.matmul %213, %211, %cst_197 {dimension_numbers = #tpu.dot_dimension_numbers<[1], [0], [0], [1], [0, 0, 1, 1], [], []>} : vector<4x4xf32>, vector<4x512xf32>, vector<4x512xf32> -> vector<4x512xf32>
    %215 = arith.addf %206, %214 : vector<4x512xf32>
    %c0_198 = arith.constant 0 : index
    %c128_199 = arith.constant 128 : index
    %216 = vector.load %arg6[%c0_198, %c128_199] : memref<4x768xf32, #tpu.memory_space<vmem>>, vector<4x512xf32>
    %c0_200 = arith.constant 0 : index
    %c4_201 = arith.constant 4 : index
    %c0_202 = arith.constant 0 : index
    %217 = vector.load %arg2[%c0_200, %c4_201, %c0_202] : memref<1x9x512xf32, #tpu.memory_space<vmem>>, vector<1x1x512xf32>
    %218 = vector.shape_cast %217 : vector<1x1x512xf32> to vector<1x512xf32>
    %219 = vector.broadcast %218 : vector<1x512xf32> to vector<4x512xf32>
    %220 = arith.mulf %216, %219 : vector<4x512xf32>
    %c4_203 = arith.constant 4 : index
    %c12_204 = arith.constant 12 : index
    %c0_205 = arith.constant 0 : index
    %221 = vector.load %arg3[%c4_203, %c12_204, %c0_205] : memref<9x21x4xf32, #tpu.memory_space<vmem>>, vector<1x4x4xf32>
    %222 = vector.shape_cast %221 : vector<1x4x4xf32> to vector<4x4xf32>
    %cst_206 = arith.constant dense<0.000000e+00> : vector<4x512xf32>
    %223 = tpu.matmul %222, %220, %cst_206 {dimension_numbers = #tpu.dot_dimension_numbers<[1], [0], [0], [1], [0, 0, 1, 1], [], []>} : vector<4x4xf32>, vector<4x512xf32>, vector<4x512xf32> -> vector<4x512xf32>
    %224 = arith.addf %215, %223 : vector<4x512xf32>
    %c0_207 = arith.constant 0 : index
    %c129_208 = arith.constant 129 : index
    %225 = vector.load %arg6[%c0_207, %c129_208] : memref<4x768xf32, #tpu.memory_space<vmem>>, vector<4x512xf32>
    %c0_209 = arith.constant 0 : index
    %c5_210 = arith.constant 5 : index
    %c0_211 = arith.constant 0 : index
    %226 = vector.load %arg2[%c0_209, %c5_210, %c0_211] : memref<1x9x512xf32, #tpu.memory_space<vmem>>, vector<1x1x512xf32>
    %227 = vector.shape_cast %226 : vector<1x1x512xf32> to vector<1x512xf32>
    %228 = vector.broadcast %227 : vector<1x512xf32> to vector<4x512xf32>
    %229 = arith.mulf %225, %228 : vector<4x512xf32>
    %c5_212 = arith.constant 5 : index
    %c12_213 = arith.constant 12 : index
    %c0_214 = arith.constant 0 : index
    %230 = vector.load %arg3[%c5_212, %c12_213, %c0_214] : memref<9x21x4xf32, #tpu.memory_space<vmem>>, vector<1x4x4xf32>
    %231 = vector.shape_cast %230 : vector<1x4x4xf32> to vector<4x4xf32>
    %cst_215 = arith.constant dense<0.000000e+00> : vector<4x512xf32>
    %232 = tpu.matmul %231, %229, %cst_215 {dimension_numbers = #tpu.dot_dimension_numbers<[1], [0], [0], [1], [0, 0, 1, 1], [], []>} : vector<4x4xf32>, vector<4x512xf32>, vector<4x512xf32> -> vector<4x512xf32>
    %233 = arith.addf %224, %232 : vector<4x512xf32>
    %c0_216 = arith.constant 0 : index
    %c143_217 = arith.constant 143 : index
    %234 = vector.load %arg6[%c0_216, %c143_217] : memref<4x768xf32, #tpu.memory_space<vmem>>, vector<4x512xf32>
    %c0_218 = arith.constant 0 : index
    %c6_219 = arith.constant 6 : index
    %c0_220 = arith.constant 0 : index
    %235 = vector.load %arg2[%c0_218, %c6_219, %c0_220] : memref<1x9x512xf32, #tpu.memory_space<vmem>>, vector<1x1x512xf32>
    %236 = vector.shape_cast %235 : vector<1x1x512xf32> to vector<1x512xf32>
    %237 = vector.broadcast %236 : vector<1x512xf32> to vector<4x512xf32>
    %238 = arith.mulf %234, %237 : vector<4x512xf32>
    %c6_221 = arith.constant 6 : index
    %c12_222 = arith.constant 12 : index
    %c0_223 = arith.constant 0 : index
    %239 = vector.load %arg3[%c6_221, %c12_222, %c0_223] : memref<9x21x4xf32, #tpu.memory_space<vmem>>, vector<1x4x4xf32>
    %240 = vector.shape_cast %239 : vector<1x4x4xf32> to vector<4x4xf32>
    %cst_224 = arith.constant dense<0.000000e+00> : vector<4x512xf32>
    %241 = tpu.matmul %240, %238, %cst_224 {dimension_numbers = #tpu.dot_dimension_numbers<[1], [0], [0], [1], [0, 0, 1, 1], [], []>} : vector<4x4xf32>, vector<4x512xf32>, vector<4x512xf32> -> vector<4x512xf32>
    %242 = arith.addf %233, %241 : vector<4x512xf32>
    %c0_225 = arith.constant 0 : index
    %c144_226 = arith.constant 144 : index
    %243 = vector.load %arg6[%c0_225, %c144_226] : memref<4x768xf32, #tpu.memory_space<vmem>>, vector<4x512xf32>
    %c0_227 = arith.constant 0 : index
    %c7_228 = arith.constant 7 : index
    %c0_229 = arith.constant 0 : index
    %244 = vector.load %arg2[%c0_227, %c7_228, %c0_229] : memref<1x9x512xf32, #tpu.memory_space<vmem>>, vector<1x1x512xf32>
    %245 = vector.shape_cast %244 : vector<1x1x512xf32> to vector<1x512xf32>
    %246 = vector.broadcast %245 : vector<1x512xf32> to vector<4x512xf32>
    %247 = arith.mulf %243, %246 : vector<4x512xf32>
    %c7_230 = arith.constant 7 : index
    %c12_231 = arith.constant 12 : index
    %c0_232 = arith.constant 0 : index
    %248 = vector.load %arg3[%c7_230, %c12_231, %c0_232] : memref<9x21x4xf32, #tpu.memory_space<vmem>>, vector<1x4x4xf32>
    %249 = vector.shape_cast %248 : vector<1x4x4xf32> to vector<4x4xf32>
    %cst_233 = arith.constant dense<0.000000e+00> : vector<4x512xf32>
    %250 = tpu.matmul %249, %247, %cst_233 {dimension_numbers = #tpu.dot_dimension_numbers<[1], [0], [0], [1], [0, 0, 1, 1], [], []>} : vector<4x4xf32>, vector<4x512xf32>, vector<4x512xf32> -> vector<4x512xf32>
    %251 = arith.addf %242, %250 : vector<4x512xf32>
    %c0_234 = arith.constant 0 : index
    %c145_235 = arith.constant 145 : index
    %252 = vector.load %arg6[%c0_234, %c145_235] : memref<4x768xf32, #tpu.memory_space<vmem>>, vector<4x512xf32>
    %c0_236 = arith.constant 0 : index
    %c8_237 = arith.constant 8 : index
    %c0_238 = arith.constant 0 : index
    %253 = vector.load %arg2[%c0_236, %c8_237, %c0_238] : memref<1x9x512xf32, #tpu.memory_space<vmem>>, vector<1x1x512xf32>
    %254 = vector.shape_cast %253 : vector<1x1x512xf32> to vector<1x512xf32>
    %255 = vector.broadcast %254 : vector<1x512xf32> to vector<4x512xf32>
    %256 = arith.mulf %252, %255 : vector<4x512xf32>
    %c8_239 = arith.constant 8 : index
    %c12_240 = arith.constant 12 : index
    %c0_241 = arith.constant 0 : index
    %257 = vector.load %arg3[%c8_239, %c12_240, %c0_241] : memref<9x21x4xf32, #tpu.memory_space<vmem>>, vector<1x4x4xf32>
    %258 = vector.shape_cast %257 : vector<1x4x4xf32> to vector<4x4xf32>
    %cst_242 = arith.constant dense<0.000000e+00> : vector<4x512xf32>
    %259 = tpu.matmul %258, %256, %cst_242 {dimension_numbers = #tpu.dot_dimension_numbers<[1], [0], [0], [1], [0, 0, 1, 1], [], []>} : vector<4x4xf32>, vector<4x512xf32>, vector<4x512xf32> -> vector<4x512xf32>
    %260 = arith.addf %251, %259 : vector<4x512xf32>
    %c12_243 = arith.constant 12 : index
    %c0_244 = arith.constant 0 : index
    %261 = vector.load %arg4[%c12_243, %c0_244] : memref<21x1xf32, #tpu.memory_space<vmem>>, vector<4x1xf32>
    %262 = vector.broadcast %261 : vector<4x1xf32> to vector<4x512xf32>
    %263 = arith.addf %260, %262 : vector<4x512xf32>
    %c0_245 = arith.constant 0 : index
    %c128_246 = arith.constant 128 : index
    %264 = vector.load %arg6[%c0_245, %c128_246] : memref<4x768xf32, #tpu.memory_space<vmem>>, vector<4x512xf32>
    tpu.vector_store %arg6[%c0_245, %c128_246], %179 {strides = array<i32>} : memref<4x768xf32, #tpu.memory_space<vmem>>, vector<4x512xf32>,
    %c0_247 = arith.constant 0 : index
    %c111_248 = arith.constant 111 : index
    %265 = vector.load %arg6[%c0_247, %c111_248] : memref<4x768xf32, #tpu.memory_space<vmem>>, vector<4x512xf32>
    %c0_249 = arith.constant 0 : index
    %c0_250 = arith.constant 0 : index
    %c0_251 = arith.constant 0 : index
    %266 = vector.load %arg2[%c0_249, %c0_250, %c0_251] : memref<1x9x512xf32, #tpu.memory_space<vmem>>, vector<1x1x512xf32>
    %267 = vector.shape_cast %266 : vector<1x1x512xf32> to vector<1x512xf32>
    %268 = vector.broadcast %267 : vector<1x512xf32> to vector<4x512xf32>
    %269 = arith.mulf %265, %268 : vector<4x512xf32>
    %c0_252 = arith.constant 0 : index
    %c16 = arith.constant 16 : index
    %c0_253 = arith.constant 0 : index
    %270 = vector.load %arg3[%c0_252, %c16, %c0_253] : memref<9x21x4xf32, #tpu.memory_space<vmem>>, vector<1x5x4xf32>
    %271 = vector.shape_cast %270 : vector<1x5x4xf32> to vector<5x4xf32>
    %cst_254 = arith.constant dense<0.000000e+00> : vector<5x512xf32>
    %272 = tpu.matmul %271, %269, %cst_254 {dimension_numbers = #tpu.dot_dimension_numbers<[1], [0], [0], [1], [0, 0, 1, 1], [], []>} : vector<5x4xf32>, vector<4x512xf32>, vector<5x512xf32> -> vector<5x512xf32>
    %c0_255 = arith.constant 0 : index
    %c112_256 = arith.constant 112 : index
    %273 = vector.load %arg6[%c0_255, %c112_256] : memref<4x768xf32, #tpu.memory_space<vmem>>, vector<4x512xf32>
    %c0_257 = arith.constant 0 : index
    %c1_258 = arith.constant 1 : index
    %c0_259 = arith.constant 0 : index
    %274 = vector.load %arg2[%c0_257, %c1_258, %c0_259] : memref<1x9x512xf32, #tpu.memory_space<vmem>>, vector<1x1x512xf32>
    %275 = vector.shape_cast %274 : vector<1x1x512xf32> to vector<1x512xf32>
    %276 = vector.broadcast %275 : vector<1x512xf32> to vector<4x512xf32>
    %277 = arith.mulf %273, %276 : vector<4x512xf32>
    %c1_260 = arith.constant 1 : index
    %c16_261 = arith.constant 16 : index
    %c0_262 = arith.constant 0 : index
    %278 = vector.load %arg3[%c1_260, %c16_261, %c0_262] : memref<9x21x4xf32, #tpu.memory_space<vmem>>, vector<1x5x4xf32>
    %279 = vector.shape_cast %278 : vector<1x5x4xf32> to vector<5x4xf32>
    %cst_263 = arith.constant dense<0.000000e+00> : vector<5x512xf32>
    %280 = tpu.matmul %279, %277, %cst_263 {dimension_numbers = #tpu.dot_dimension_numbers<[1], [0], [0], [1], [0, 0, 1, 1], [], []>} : vector<5x4xf32>, vector<4x512xf32>, vector<5x512xf32> -> vector<5x512xf32>
    %281 = arith.addf %272, %280 : vector<5x512xf32>
    %c0_264 = arith.constant 0 : index
    %c113_265 = arith.constant 113 : index
    %282 = vector.load %arg6[%c0_264, %c113_265] : memref<4x768xf32, #tpu.memory_space<vmem>>, vector<4x512xf32>
    %c0_266 = arith.constant 0 : index
    %c2_267 = arith.constant 2 : index
    %c0_268 = arith.constant 0 : index
    %283 = vector.load %arg2[%c0_266, %c2_267, %c0_268] : memref<1x9x512xf32, #tpu.memory_space<vmem>>, vector<1x1x512xf32>
    %284 = vector.shape_cast %283 : vector<1x1x512xf32> to vector<1x512xf32>
    %285 = vector.broadcast %284 : vector<1x512xf32> to vector<4x512xf32>
    %286 = arith.mulf %282, %285 : vector<4x512xf32>
    %c2_269 = arith.constant 2 : index
    %c16_270 = arith.constant 16 : index
    %c0_271 = arith.constant 0 : index
    %287 = vector.load %arg3[%c2_269, %c16_270, %c0_271] : memref<9x21x4xf32, #tpu.memory_space<vmem>>, vector<1x5x4xf32>
    %288 = vector.shape_cast %287 : vector<1x5x4xf32> to vector<5x4xf32>
    %cst_272 = arith.constant dense<0.000000e+00> : vector<5x512xf32>
    %289 = tpu.matmul %288, %286, %cst_272 {dimension_numbers = #tpu.dot_dimension_numbers<[1], [0], [0], [1], [0, 0, 1, 1], [], []>} : vector<5x4xf32>, vector<4x512xf32>, vector<5x512xf32> -> vector<5x512xf32>
    %290 = arith.addf %281, %289 : vector<5x512xf32>
    %c0_273 = arith.constant 0 : index
    %c127_274 = arith.constant 127 : index
    %291 = vector.load %arg6[%c0_273, %c127_274] : memref<4x768xf32, #tpu.memory_space<vmem>>, vector<4x512xf32>
    %c0_275 = arith.constant 0 : index
    %c3_276 = arith.constant 3 : index
    %c0_277 = arith.constant 0 : index
    %292 = vector.load %arg2[%c0_275, %c3_276, %c0_277] : memref<1x9x512xf32, #tpu.memory_space<vmem>>, vector<1x1x512xf32>
    %293 = vector.shape_cast %292 : vector<1x1x512xf32> to vector<1x512xf32>
    %294 = vector.broadcast %293 : vector<1x512xf32> to vector<4x512xf32>
    %295 = arith.mulf %291, %294 : vector<4x512xf32>
    %c3_278 = arith.constant 3 : index
    %c16_279 = arith.constant 16 : index
    %c0_280 = arith.constant 0 : index
    %296 = vector.load %arg3[%c3_278, %c16_279, %c0_280] : memref<9x21x4xf32, #tpu.memory_space<vmem>>, vector<1x5x4xf32>
    %297 = vector.shape_cast %296 : vector<1x5x4xf32> to vector<5x4xf32>
    %cst_281 = arith.constant dense<0.000000e+00> : vector<5x512xf32>
    %298 = tpu.matmul %297, %295, %cst_281 {dimension_numbers = #tpu.dot_dimension_numbers<[1], [0], [0], [1], [0, 0, 1, 1], [], []>} : vector<5x4xf32>, vector<4x512xf32>, vector<5x512xf32> -> vector<5x512xf32>
    %299 = arith.addf %290, %298 : vector<5x512xf32>
    %c0_282 = arith.constant 0 : index
    %c128_283 = arith.constant 128 : index
    %300 = vector.load %arg6[%c0_282, %c128_283] : memref<4x768xf32, #tpu.memory_space<vmem>>, vector<4x512xf32>
    %c0_284 = arith.constant 0 : index
    %c4_285 = arith.constant 4 : index
    %c0_286 = arith.constant 0 : index
    %301 = vector.load %arg2[%c0_284, %c4_285, %c0_286] : memref<1x9x512xf32, #tpu.memory_space<vmem>>, vector<1x1x512xf32>
    %302 = vector.shape_cast %301 : vector<1x1x512xf32> to vector<1x512xf32>
    %303 = vector.broadcast %302 : vector<1x512xf32> to vector<4x512xf32>
    %304 = arith.mulf %300, %303 : vector<4x512xf32>
    %c4_287 = arith.constant 4 : index
    %c16_288 = arith.constant 16 : index
    %c0_289 = arith.constant 0 : index
    %305 = vector.load %arg3[%c4_287, %c16_288, %c0_289] : memref<9x21x4xf32, #tpu.memory_space<vmem>>, vector<1x5x4xf32>
    %306 = vector.shape_cast %305 : vector<1x5x4xf32> to vector<5x4xf32>
    %cst_290 = arith.constant dense<0.000000e+00> : vector<5x512xf32>
    %307 = tpu.matmul %306, %304, %cst_290 {dimension_numbers = #tpu.dot_dimension_numbers<[1], [0], [0], [1], [0, 0, 1, 1], [], []>} : vector<5x4xf32>, vector<4x512xf32>, vector<5x512xf32> -> vector<5x512xf32>
    %308 = arith.addf %299, %307 : vector<5x512xf32>
    %c0_291 = arith.constant 0 : index
    %c129_292 = arith.constant 129 : index
    %309 = vector.load %arg6[%c0_291, %c129_292] : memref<4x768xf32, #tpu.memory_space<vmem>>, vector<4x512xf32>
    %c0_293 = arith.constant 0 : index
    %c5_294 = arith.constant 5 : index
    %c0_295 = arith.constant 0 : index
    %310 = vector.load %arg2[%c0_293, %c5_294, %c0_295] : memref<1x9x512xf32, #tpu.memory_space<vmem>>, vector<1x1x512xf32>
    %311 = vector.shape_cast %310 : vector<1x1x512xf32> to vector<1x512xf32>
    %312 = vector.broadcast %311 : vector<1x512xf32> to vector<4x512xf32>
    %313 = arith.mulf %309, %312 : vector<4x512xf32>
    %c5_296 = arith.constant 5 : index
    %c16_297 = arith.constant 16 : index
    %c0_298 = arith.constant 0 : index
    %314 = vector.load %arg3[%c5_296, %c16_297, %c0_298] : memref<9x21x4xf32, #tpu.memory_space<vmem>>, vector<1x5x4xf32>
    %315 = vector.shape_cast %314 : vector<1x5x4xf32> to vector<5x4xf32>
    %cst_299 = arith.constant dense<0.000000e+00> : vector<5x512xf32>
    %316 = tpu.matmul %315, %313, %cst_299 {dimension_numbers = #tpu.dot_dimension_numbers<[1], [0], [0], [1], [0, 0, 1, 1], [], []>} : vector<5x4xf32>, vector<4x512xf32>, vector<5x512xf32> -> vector<5x512xf32>
    %317 = arith.addf %308, %316 : vector<5x512xf32>
    %c0_300 = arith.constant 0 : index
    %c143_301 = arith.constant 143 : index
    %318 = vector.load %arg6[%c0_300, %c143_301] : memref<4x768xf32, #tpu.memory_space<vmem>>, vector<4x512xf32>
    %c0_302 = arith.constant 0 : index
    %c6_303 = arith.constant 6 : index
    %c0_304 = arith.constant 0 : index
    %319 = vector.load %arg2[%c0_302, %c6_303, %c0_304] : memref<1x9x512xf32, #tpu.memory_space<vmem>>, vector<1x1x512xf32>
    %320 = vector.shape_cast %319 : vector<1x1x512xf32> to vector<1x512xf32>
    %321 = vector.broadcast %320 : vector<1x512xf32> to vector<4x512xf32>
    %322 = arith.mulf %318, %321 : vector<4x512xf32>
    %c6_305 = arith.constant 6 : index
    %c16_306 = arith.constant 16 : index
    %c0_307 = arith.constant 0 : index
    %323 = vector.load %arg3[%c6_305, %c16_306, %c0_307] : memref<9x21x4xf32, #tpu.memory_space<vmem>>, vector<1x5x4xf32>
    %324 = vector.shape_cast %323 : vector<1x5x4xf32> to vector<5x4xf32>
    %cst_308 = arith.constant dense<0.000000e+00> : vector<5x512xf32>
    %325 = tpu.matmul %324, %322, %cst_308 {dimension_numbers = #tpu.dot_dimension_numbers<[1], [0], [0], [1], [0, 0, 1, 1], [], []>} : vector<5x4xf32>, vector<4x512xf32>, vector<5x512xf32> -> vector<5x512xf32>
    %326 = arith.addf %317, %325 : vector<5x512xf32>
    %c0_309 = arith.constant 0 : index
    %c144_310 = arith.constant 144 : index
    %327 = vector.load %arg6[%c0_309, %c144_310] : memref<4x768xf32, #tpu.memory_space<vmem>>, vector<4x512xf32>
    %c0_311 = arith.constant 0 : index
    %c7_312 = arith.constant 7 : index
    %c0_313 = arith.constant 0 : index
    %328 = vector.load %arg2[%c0_311, %c7_312, %c0_313] : memref<1x9x512xf32, #tpu.memory_space<vmem>>, vector<1x1x512xf32>
    %329 = vector.shape_cast %328 : vector<1x1x512xf32> to vector<1x512xf32>
    %330 = vector.broadcast %329 : vector<1x512xf32> to vector<4x512xf32>
    %331 = arith.mulf %327, %330 : vector<4x512xf32>
    %c7_314 = arith.constant 7 : index
    %c16_315 = arith.constant 16 : index
    %c0_316 = arith.constant 0 : index
    %332 = vector.load %arg3[%c7_314, %c16_315, %c0_316] : memref<9x21x4xf32, #tpu.memory_space<vmem>>, vector<1x5x4xf32>
    %333 = vector.shape_cast %332 : vector<1x5x4xf32> to vector<5x4xf32>
    %cst_317 = arith.constant dense<0.000000e+00> : vector<5x512xf32>
    %334 = tpu.matmul %333, %331, %cst_317 {dimension_numbers = #tpu.dot_dimension_numbers<[1], [0], [0], [1], [0, 0, 1, 1], [], []>} : vector<5x4xf32>, vector<4x512xf32>, vector<5x512xf32> -> vector<5x512xf32>
    %335 = arith.addf %326, %334 : vector<5x512xf32>
    %c0_318 = arith.constant 0 : index
    %c145_319 = arith.constant 145 : index
    %336 = vector.load %arg6[%c0_318, %c145_319] : memref<4x768xf32, #tpu.memory_space<vmem>>, vector<4x512xf32>
    %c0_320 = arith.constant 0 : index
    %c8_321 = arith.constant 8 : index
    %c0_322 = arith.constant 0 : index
    %337 = vector.load %arg2[%c0_320, %c8_321, %c0_322] : memref<1x9x512xf32, #tpu.memory_space<vmem>>, vector<1x1x512xf32>
    %338 = vector.shape_cast %337 : vector<1x1x512xf32> to vector<1x512xf32>
    %339 = vector.broadcast %338 : vector<1x512xf32> to vector<4x512xf32>
    %340 = arith.mulf %336, %339 : vector<4x512xf32>
    %c8_323 = arith.constant 8 : index
    %c16_324 = arith.constant 16 : index
    %c0_325 = arith.constant 0 : index
    %341 = vector.load %arg3[%c8_323, %c16_324, %c0_325] : memref<9x21x4xf32, #tpu.memory_space<vmem>>, vector<1x5x4xf32>
    %342 = vector.shape_cast %341 : vector<1x5x4xf32> to vector<5x4xf32>
    %cst_326 = arith.constant dense<0.000000e+00> : vector<5x512xf32>
    %343 = tpu.matmul %342, %340, %cst_326 {dimension_numbers = #tpu.dot_dimension_numbers<[1], [0], [0], [1], [0, 0, 1, 1], [], []>} : vector<5x4xf32>, vector<4x512xf32>, vector<5x512xf32> -> vector<5x512xf32>
    %344 = arith.addf %335, %343 : vector<5x512xf32>
    %c16_327 = arith.constant 16 : index
    %c0_328 = arith.constant 0 : index
    %345 = vector.load %arg4[%c16_327, %c0_328] : memref<21x1xf32, #tpu.memory_space<vmem>>, vector<5x1xf32>
    %346 = vector.broadcast %345 : vector<5x1xf32> to vector<5x512xf32>
    %347 = arith.addf %344, %346 : vector<5x512xf32>
    %348 = vector.extract_strided_slice %347 {offsets = [0, 0], sizes = [4, 512], strides = [1, 1]} : vector<5x512xf32> to vector<4x512xf32>
    %349 = vector.extract_strided_slice %347 {offsets = [4, 0], sizes = [1, 512], strides = [1, 1]} : vector<5x512xf32> to vector<1x512xf32>
    %350 = math.exp %348 : vector<4x512xf32>
    %c0_329 = arith.constant 0 : index
    %c0_330 = arith.constant 0 : index
    %c0_331 = arith.constant 0 : index
    %351 = vector.load %arg5[%c0_329, %c0_330, %c0_331] : memref<1x9x512xf32, #tpu.memory_space<vmem>>, vector<1x4x512xf32>
    %352 = vector.shape_cast %351 : vector<1x4x512xf32> to vector<4x512xf32>
    %353 = vector.shape_cast %263 : vector<4x512xf32> to vector<1x4x512xf32>
    tpu.vector_store %arg5[%c0_329, %c0_330, %c0_331], %353 {strides = array<i32>} : memref<1x9x512xf32, #tpu.memory_space<vmem>>, vector<1x4x512xf32>,
    %c0_332 = arith.constant 0 : index
    %c4_333 = arith.constant 4 : index
    %c0_334 = arith.constant 0 : index
    %354 = vector.load %arg5[%c0_332, %c4_333, %c0_334] : memref<1x9x512xf32, #tpu.memory_space<vmem>>, vector<1x4x512xf32>
    %355 = vector.shape_cast %354 : vector<1x4x512xf32> to vector<4x512xf32>
    %356 = vector.shape_cast %350 : vector<4x512xf32> to vector<1x4x512xf32>
    tpu.vector_store %arg5[%c0_332, %c4_333, %c0_334], %356 {strides = array<i32>} : memref<1x9x512xf32, #tpu.memory_space<vmem>>, vector<1x4x512xf32>,
    %c0_335 = arith.constant 0 : index
    %c8_336 = arith.constant 8 : index
    %c0_337 = arith.constant 0 : index
    %357 = vector.load %arg5[%c0_335, %c8_336, %c0_337] : memref<1x9x512xf32, #tpu.memory_space<vmem>>, vector<1x1x512xf32>
    %358 = vector.shape_cast %357 : vector<1x1x512xf32> to vector<1x512xf32>
    %359 = vector.shape_cast %349 : vector<1x512xf32> to vector<1x1x512xf32>
    tpu.vector_store %arg5[%c0_335, %c8_336, %c0_337], %359 {strides = array<i32>} : memref<1x9x512xf32, #tpu.memory_space<vmem>>, vector<1x1x512xf32>,
    return
  }
  func.func @transform_0(%arg0: i32) -> (i32, i32, i32) {
    %c0_i32 = arith.constant 0 : i32
    %c0_i32_0 = arith.constant 0 : i32
    %c0_i32_1 = arith.constant 0 : i32
    return %arg0, %c0_i32, %c0_i32_0 : i32, i32, i32
  }
  func.func @transform_1(%arg0: i32) -> (i32, i32, i32) {
    %c0_i32 = arith.constant 0 : i32
    %c0_i32_0 = arith.constant 0 : i32
    %c0_i32_1 = arith.constant 0 : i32
    return %arg0, %c0_i32, %c0_i32_0 : i32, i32, i32
  }
  func.func @transform_2(%arg0: i32) -> (i32, i32, i32) {
    %c0_i32 = arith.constant 0 : i32
    %c0_i32_0 = arith.constant 0 : i32
    %c0_i32_1 = arith.constant 0 : i32
    %c0_i32_2 = arith.constant 0 : i32
    return %c0_i32, %c0_i32_0, %c0_i32_1 : i32, i32, i32
  }
  func.func @transform_3(%arg0: i32) -> (i32, i32) {
    %c0_i32 = arith.constant 0 : i32
    %c0_i32_0 = arith.constant 0 : i32
    %c0_i32_1 = arith.constant 0 : i32
    return %c0_i32, %c0_i32_0 : i32, i32
  }
  func.func @transform_4(%arg0: i32) -> (i32, i32, i32) {
    %c0_i32 = arith.constant 0 : i32
    %c0_i32_0 = arith.constant 0 : i32
    %c0_i32_1 = arith.constant 0 : i32
    return %arg0, %c0_i32, %c0_i32_0 : i32, i32, i32
  }
}

</mosaic_0001>

<bundles_post_ra>
// kernel: squeeze.3
= control target key start
LH: loop header
LB: loop body
LE: loop exit
PB: predicated region body
PF: predicated region fallthrough
CT: control target
= control target key end

     0   :  { %s43_s6 = smov 3  ;;  %s263_s11 = smov 112   ;;  %vm3_vm0 = vcmask 130048   ;;  %s492_s0 = inlined_call_operand.vmem [shape: f32[1,9,256], index: 0, kind: input, shape index: {}]   ;;  %s493_s1 = inlined_call_operand.vmem [shape: f32[9,2,8,16], index: 1, kind: output, shape index: {}]  }
   0x1   :  { %v25_v0 = vld.sshfl [vmem:[%s492_s0] sm:$0xff pattern:$0xb3a29180]   ;;  %v209_v2 = vld.sshfl [vmem:[%s492_s0 + $0x4] sm:$0xff pattern:$0xb3a29180]  }
   0x2   :  { %v212_v1 = vld [vmem:[%s492_s0 + $0x10] ss:$8 sm:%s43_s6]   ;;  %26 = vrot.lane.b32.xlu0 %v25_v0, %s263_s11  ;;  %s68_s14 = smov 3  ;;  %s264_s15 = smov 96  }
   0x3   :  { %45 = vrot.lane.b32.xlu1 %v212_v1, %s263_s11  ;;  %v219_v3 = vld [vmem:[%s492_s0 + $0x10] ss:$8 sm:%s68_s14]   ;;  %s93_s18 = smov 3  ;;  %s265_s19 = smov 80  }
   0x4   :  { %v226_v4 = vld [vmem:[%s492_s0 + $0x10] ss:$8 sm:%s93_s18]   ;;  %s118_s22 = smov 3  ;;  %s266_s23 = smov 64  }
   0x5   :  { %v233_v5 = vld [vmem:[%s492_s0 + $0x10] ss:$8 sm:%s118_s22]   ;;  %s143_s26 = smov 3  ;;  %s267_s27 = smov 48  }
   0x6   :  { %35 = vrot.lane.b32.xlu0 %v209_v2, %s263_s11  ;;  %v240_v6 = vld [vmem:[%s492_s0 + $0x10] ss:$8 sm:%s143_s26]   ;;  %s20_s30 = smov 3  ;;  %s168_s2 = smov 3 }
   0x7   :  { %51 = vrot.lane.b32.xlu1 %v25_v0, %s264_s15  ;;  %v2_v7 = vld [vmem:[%s492_s0] sm:$0xff]   ;;  %v200_v8 = vld [vmem:[%s492_s0 + $0x8] sm:$0xff]  }
   0x8   :  { %v205_v9 = vld [vmem:[%s492_s0 + $0x10] ss:$8 sm:%s20_s30]   ;;  %4 = vst.msk [vmem:[%s493_s1] ss:$16 sm:$0x3] %vm3_vm0, %v2_v7   ;;  %s193_s30 = smov 3 }
   0x9   :  { %5 = vst.msk [vmem:[%s493_s1] ss:$16 sm:$0xc] %vm3_vm0, %v2_v7   ;;  %6 = vst.msk [vmem:[%s493_s1] ss:$16 sm:$0x30] %vm3_vm0, %v2_v7  }
   0xa   :  { %60 = vrot.lane.b32.xlu0 %v209_v2, %s264_s15  ;;  %7 = vst.msk [vmem:[%s493_s1] ss:$16 sm:$0xc0] %vm3_vm0, %v2_v7   ;;  %201 = vst.msk [vmem:[%s493_s1 + $0x8] ss:$16 sm:$0x3] %vm3_vm0, %v200_v8  }
   0xb   :  { %70 = vrot.lane.b32.xlu1 %v219_v3, %s264_s15  ;;  %202 = vst.msk [vmem:[%s493_s1 + $0x8] ss:$16 sm:$0xc] %vm3_vm0, %v200_v8   ;;  %203 = vst.msk [vmem:[%s493_s1 + $0x8] ss:$16 sm:$0x30] %vm3_vm0, %v200_v8  }
   0xc   :  { %204 = vst.msk [vmem:[%s493_s1 + $0x8] ss:$16 sm:$0xc0] %vm3_vm0, %v200_v8   ;;  %206 = vst.msk [vmem:[%s493_s1 + $0x80] ss:$8 sm:$0x3] %vm3_vm0, %v205_v9  }
   0xd   :  { %v247_v10 = vld [vmem:[%s492_s0 + $0x10] ss:$8 sm:%s168_s2]   ;;  %s269_s2 = smov 16  }
   0xe   :  { %76 = vrot.lane.b32.xlu0 %v25_v0, %s265_s19  ;;  %v254_v11 = vld [vmem:[%s492_s0 + $0x10] ss:$8 sm:%s193_s30]  }
   0xf   :  { %85 = vrot.lane.b32.xlu1 %v209_v2, %s265_s19 }
  0x12   :  { %95 = vrot.lane.b32.xlu0 %v226_v4, %s265_s19 }
  0x13   :  { %101 = vrot.lane.b32.xlu1 %v25_v0, %s266_s23 }
  0x16   :  { %110 = vrot.lane.b32.xlu0 %v209_v2, %s266_s23 }
  0x17   :  { %120 = vrot.lane.b32.xlu1 %v233_v5, %s266_s23 }
  0x1a   :  { %126 = vrot.lane.b32.xlu0 %v25_v0, %s267_s27 }
  0x1b   :  { %135 = vrot.lane.b32.xlu1 %v209_v2, %s267_s27 }
  0x1e   :  { %145 = vrot.lane.b32.xlu0 %v240_v6, %s267_s27  ;;  %s268_s27 = smov 32  }
  0x1f   :  { %151 = vrot.lane.b32.xlu1 %v25_v0, %s268_s27 }
  0x22   :  { %160 = vrot.lane.b32.xlu0 %v209_v2, %s268_s27 }
  0x23   :  { %170 = vrot.lane.b32.xlu1 %v247_v10, %s268_s27 }
  0x26   :  { %176 = vrot.lane.b32.xlu0 %v25_v0, %s269_s2 }
  0x27   :  { %185 = vrot.lane.b32.xlu1 %v209_v2, %s269_s2 }
  0x2a   :  { %195 = vrot.lane.b32.xlu0 %v254_v11, %s269_s2 }
  0x74   :  { %v27_v12 = vpop.permute.xlu0 %26  }
  0x75   :  { %v46_v13 = vpop.permute.xlu1 %45   ;;  %207 = vst.msk [vmem:[%s493_s1 + $0x1] ss:$8 sm:$0xf] %vm3_vm0, %v27_v12   ;;  %208 = vst.msk [vmem:[%s493_s1 + $0x1] ss:$8 sm:$0xf0] %vm3_vm0, %v27_v12  }
  0x76   :  { %213 = vst.msk [vmem:[%s493_s1 + $0x81] ss:$8 sm:$0x3] %vm3_vm0, %v46_v13  }
  0x78   :  { %v36_v14 = vpop.permute.xlu0 %35  }
  0x79   :  { %v52_v15 = vpop.permute.xlu1 %51   ;;  %210 = vst.msk [vmem:[%s493_s1 + $0x41] ss:$8 sm:$0xf] %vm3_vm0, %v36_v14   ;;  %211 = vst.msk [vmem:[%s493_s1 + $0x41] ss:$8 sm:$0xf0] %vm3_vm0, %v36_v14  }
  0x7a   :  { %214 = vst.msk [vmem:[%s493_s1 + $0x2] ss:$8 sm:$0xf] %vm3_vm0, %v52_v15   ;;  %215 = vst.msk [vmem:[%s493_s1 + $0x2] ss:$8 sm:$0xf0] %vm3_vm0, %v52_v15  }
  0x7c   :  { %v61_v16 = vpop.permute.xlu0 %60  }
  0x7d   :  { %v71_v17 = vpop.permute.xlu1 %70   ;;  %217 = vst.msk [vmem:[%s493_s1 + $0x42] ss:$8 sm:$0xf] %vm3_vm0, %v61_v16   ;;  %218 = vst.msk [vmem:[%s493_s1 + $0x42] ss:$8 sm:$0xf0] %vm3_vm0, %v61_v16  }
  0x7e   :  { %220 = vst.msk [vmem:[%s493_s1 + $0x82] ss:$8 sm:$0x3] %vm3_vm0, %v71_v17  }
  0x80   :  { %v77_v18 = vpop.permute.xlu0 %76  }
  0x81   :  { %v86_v19 = vpop.permute.xlu1 %85   ;;  %221 = vst.msk [vmem:[%s493_s1 + $0x3] ss:$8 sm:$0xf] %vm3_vm0, %v77_v18   ;;  %222 = vst.msk [vmem:[%s493_s1 + $0x3] ss:$8 sm:$0xf0] %vm3_vm0, %v77_v18  }
  0x82   :  { %224 = vst.msk [vmem:[%s493_s1 + $0x43] ss:$8 sm:$0xf] %vm3_vm0, %v86_v19   ;;  %225 = vst.msk [vmem:[%s493_s1 + $0x43] ss:$8 sm:$0xf0] %vm3_vm0, %v86_v19  }
  0x84   :  { %v96_v20 = vpop.permute.xlu0 %95  }
  0x85   :  { %v102_v21 = vpop.permute.xlu1 %101   ;;  %227 = vst.msk [vmem:[%s493_s1 + $0x83] ss:$8 sm:$0x3] %vm3_vm0, %v96_v20  }
  0x86   :  { %228 = vst.msk [vmem:[%s493_s1 + $0x4] ss:$8 sm:$0xf] %vm3_vm0, %v102_v21   ;;  %229 = vst.msk [vmem:[%s493_s1 + $0x4] ss:$8 sm:$0xf0] %vm3_vm0, %v102_v21  }
  0x88   :  { %v111_v22 = vpop.permute.xlu0 %110  }
  0x89   :  { %v121_v23 = vpop.permute.xlu1 %120   ;;  %231 = vst.msk [vmem:[%s493_s1 + $0x44] ss:$8 sm:$0xf] %vm3_vm0, %v111_v22   ;;  %232 = vst.msk [vmem:[%s493_s1 + $0x44] ss:$8 sm:$0xf0] %vm3_vm0, %v111_v22  }
  0x8a   :  { %234 = vst.msk [vmem:[%s493_s1 + $0x84] ss:$8 sm:$0x3] %vm3_vm0, %v121_v23  }
  0x8c   :  { %v127_v24 = vpop.permute.xlu0 %126  }
  0x8d   :  { %v136_v25 = vpop.permute.xlu1 %135   ;;  %235 = vst.msk [vmem:[%s493_s1 + $0x5] ss:$8 sm:$0xf] %vm3_vm0, %v127_v24   ;;  %236 = vst.msk [vmem:[%s493_s1 + $0x5] ss:$8 sm:$0xf0] %vm3_vm0, %v127_v24  }
  0x8e   :  { %238 = vst.msk [vmem:[%s493_s1 + $0x45] ss:$8 sm:$0xf] %vm3_vm0, %v136_v25   ;;  %239 = vst.msk [vmem:[%s493_s1 + $0x45] ss:$8 sm:$0xf0] %vm3_vm0, %v136_v25  }
  0x90   :  { %v146_v26 = vpop.permute.xlu0 %145  }
  0x91   :  { %v152_v27 = vpop.permute.xlu1 %151   ;;  %241 = vst.msk [vmem:[%s493_s1 + $0x85] ss:$8 sm:$0x3] %vm3_vm0, %v146_v26  }
  0x92   :  { %242 = vst.msk [vmem:[%s493_s1 + $0x6] ss:$8 sm:$0xf] %vm3_vm0, %v152_v27   ;;  %243 = vst.msk [vmem:[%s493_s1 + $0x6] ss:$8 sm:$0xf0] %vm3_vm0, %v152_v27  }
  0x94   :  { %v161_v28 = vpop.permute.xlu0 %160  }
  0x95   :  { %v171_v29 = vpop.permute.xlu1 %170   ;;  %245 = vst.msk [vmem:[%s493_s1 + $0x46] ss:$8 sm:$0xf] %vm3_vm0, %v161_v28   ;;  %246 = vst.msk [vmem:[%s493_s1 + $0x46] ss:$8 sm:$0xf0] %vm3_vm0, %v161_v28  }
  0x96   :  { %248 = vst.msk [vmem:[%s493_s1 + $0x86] ss:$8 sm:$0x3] %vm3_vm0, %v171_v29  }
  0x98   :  { %v177_v30 = vpop.permute.xlu0 %176  }
  0x99   :  { %v186_v31 = vpop.permute.xlu1 %185   ;;  %249 = vst.msk [vmem:[%s493_s1 + $0x7] ss:$8 sm:$0xf] %vm3_vm0, %v177_v30   ;;  %250 = vst.msk [vmem:[%s493_s1 + $0x7] ss:$8 sm:$0xf0] %vm3_vm0, %v177_v30  }
  0x9a   :  { %252 = vst.msk [vmem:[%s493_s1 + $0x47] ss:$8 sm:$0xf] %vm3_vm0, %v186_v31   ;;  %253 = vst.msk [vmem:[%s493_s1 + $0x47] ss:$8 sm:$0xf0] %vm3_vm0, %v186_v31  }
  0x9c   :  { %v196_v32 = vpop.permute.xlu0 %195  }
  0x9d   :  { %255 = vst.msk [vmem:[%s493_s1 + $0x87] ss:$8 sm:$0x3] %vm3_vm0, %v196_v32  }

// kernel: squeeze.2
= control target key start
LH: loop header
LB: loop body
LE: loop exit
PB: predicated region body
PF: predicated region fallthrough
CT: control target
= control target key end

     0   :  { %vm84_vm0 = vcmask 1047556   ;;  %s649_s14 = smov 112   ;;  %s650_s8 = smov 96   ;;  %vm3_vm1 = vcmask 130048   ;;  %s1293_s0 = inlined_call_operand.vmem [shape: f32[1,9,512], index: 0, kind: input, shape index: {}]   ;;  %s1294_s1 = inlined_call_operand.vmem [shape: f32[9,2,16,16], index: 1, kind: output, shape index: {}]  }
   0x1   :  { %v81_v0 = vld [vmem:[%s1293_s0] ss:$8 sm:$0xf]   ;;  %v523_v1 = vld [vmem:[%s1293_s0 - $0x1f] ss:$8 sm:$0xf0]  }
   0x2   :  { %v85_v2 = vsel %vm84_vm0, %v523_v1, %v81_v0  ;;  %v530_v3 = vld [vmem:[%s1293_s0 + $0x4] ss:$8 sm:$0xf]   ;;  %v531_v4 = vld [vmem:[%s1293_s0 - $0x1b] ss:$8 sm:$0xf0]  }
   0x3   :  { %86 = vrot.lane.b32.xlu0 %v85_v2, %s649_s14  ;;  %v111_v5 = vsel %vm84_vm0, %v531_v4, %v530_v3  ;;  %v526_v6 = vld [vmem:[%s1293_s0 + $0x2] ss:$8 sm:$0xf]   ;;  %v527_v7 = vld [vmem:[%s1293_s0 - $0x1d] ss:$8 sm:$0xf0]  }
   0x4   :  { %112 = vrot.lane.b32.xlu1 %v111_v5, %s649_s14  ;;  %v98_v8 = vsel %vm84_vm0, %v527_v7, %v526_v6  ;;  %v534_v9 = vld [vmem:[%s1293_s0 + $0x6] ss:$8 sm:$0xf]   ;;  %v535_v10 = vld [vmem:[%s1293_s0 - $0x19] ss:$8 sm:$0xf0]  }
   0x5   :  { %v124_v11 = vsel %vm84_vm0, %v535_v10, %v534_v9  ;;  %v139_v12 = vld [vmem:[%s1293_s0] ss:$8 sm:$0xf]   ;;  %v540_v13 = vld [vmem:[%s1293_s0 - $0x1f] ss:$8 sm:$0xf0]  }
   0x6   :  { %v538_v14 = vld [vmem:[%s1293_s0 + $0x20] ss:$8 sm:$0xf]   ;;  %v143_v15 = vsel %vm84_vm0, %v540_v13, %v139_v12  ;;  %v543_v16 = vld [vmem:[%s1293_s0 + $0x2] ss:$8 sm:$0xf]  }
   0x7   :  { %99 = vrot.lane.b32.xlu0 %v98_v8, %s649_s14  ;;  %v544_v17 = vld [vmem:[%s1293_s0 - $0x1d] ss:$8 sm:$0xf0]   ;;  %v547_v18 = vld [vmem:[%s1293_s0 + $0x4] ss:$8 sm:$0xf]  }
   0x8   :  { %125 = vrot.lane.b32.xlu1 %v124_v11, %s649_s14  ;;  %v548_v19 = vld [vmem:[%s1293_s0 - $0x1b] ss:$8 sm:$0xf0]   ;;  %v156_v20 = vsel %vm84_vm0, %v544_v17, %v543_v16  ;;  %v551_v22 = vld [vmem:[%s1293_s0 + $0x6] ss:$8 sm:$0xf]  }
   0x9   :  { %v169_v21 = vsel %vm84_vm0, %v548_v19, %v547_v18  ;;  %v552_v23 = vld [vmem:[%s1293_s0 - $0x19] ss:$8 sm:$0xf0]   ;;  %v555_v25 = vld [vmem:[%s1293_s0 + $0x20] ss:$8 sm:$0xf]  }
   0xa   :  { %v182_v24 = vsel %vm84_vm0, %v552_v23, %v551_v22  ;;  %v197_v26 = vld [vmem:[%s1293_s0] ss:$8 sm:$0xf]   ;;  %v557_v27 = vld [vmem:[%s1293_s0 - $0x1f] ss:$8 sm:$0xf0]  }
   0xb   :  { %134 = vrot.lane.b32.xlu0 %v538_v14, %s649_s14  ;;  %v560_v28 = vld [vmem:[%s1293_s0 + $0x2] ss:$8 sm:$0xf]   ;;  %v561_v29 = vld [vmem:[%s1293_s0 - $0x1d] ss:$8 sm:$0xf0]   ;;  %v201_v30 = vsel %vm84_vm0, %v557_v27, %v197_v26 }
   0xc   :  { %144 = vrot.lane.b32.xlu1 %v143_v15, %s650_s8  ;;  %v214_v31 = vsel %vm84_vm0, %v561_v29, %v560_v28  ;;  %v564_v32 = vld [vmem:[%s1293_s0 + $0x4] ss:$8 sm:$0xf]   ;;  %v565_v33 = vld [vmem:[%s1293_s0 - $0x1b] ss:$8 sm:$0xf0]  }
   0xd   :  { %v568_v34 = vld [vmem:[%s1293_s0 + $0x6] ss:$8 sm:$0xf]   ;;  %v569_v35 = vld [vmem:[%s1293_s0 - $0x19] ss:$8 sm:$0xf0]   ;;  %v227_v36 = vsel %vm84_vm0, %v565_v33, %v564_v32 }
   0xe   :  { %s651_s2 = smov 80   ;;  %v240_v37 = vsel %vm84_vm0, %v569_v35, %v568_v34  ;;  %v255_v38 = vld [vmem:[%s1293_s0] ss:$8 sm:$0xf]   ;;  %s652_s21 = smov 64  }
   0xf   :  { %157 = vrot.lane.b32.xlu0 %v156_v20, %s650_s8  ;;  %v574_v39 = vld [vmem:[%s1293_s0 - $0x1f] ss:$8 sm:$0xf0]   ;;  %v572_v40 = vld [vmem:[%s1293_s0 + $0x20] ss:$8 sm:$0xf]  }
  0x10   :  { %170 = vrot.lane.b32.xlu1 %v169_v21, %s650_s8  ;;  %v259_v41 = vsel %vm84_vm0, %v574_v39, %v255_v38  ;;  %v577_v42 = vld [vmem:[%s1293_s0 + $0x2] ss:$8 sm:$0xf]   ;;  %v578_v43 = vld [vmem:[%s1293_s0 - $0x1d] ss:$8 sm:$0xf0]  }
  0x11   :  { %v581_v44 = vld [vmem:[%s1293_s0 + $0x4] ss:$8 sm:$0xf]   ;;  %v582_v45 = vld [vmem:[%s1293_s0 - $0x1b] ss:$8 sm:$0xf0]   ;;  %v272_v48 = vsel %vm84_vm0, %v578_v43, %v577_v42 }
  0x12   :  { %v585_v46 = vld [vmem:[%s1293_s0 + $0x6] ss:$8 sm:$0xf]   ;;  %v632_v47 = vld [vmem:[%s1293_s0 + $0x4] ss:$8 sm:$0xf]   ;;  %v285_v51 = vsel %vm84_vm0, %v582_v45, %v581_v44 }
  0x13   :  { %183 = vrot.lane.b32.xlu0 %v182_v24, %s650_s8  ;;  %v633_v49 = vld [vmem:[%s1293_s0 - $0x1b] ss:$8 sm:$0xf0]   ;;  %v636_v50 = vld [vmem:[%s1293_s0 + $0x6] ss:$8 sm:$0xf]  }
  0x14   :  { %192 = vrot.lane.b32.xlu1 %v555_v25, %s650_s8  ;;  %v586_v52 = vld [vmem:[%s1293_s0 - $0x19] ss:$8 sm:$0xf0]   ;;  %v796_v53 = vsel %vm84_vm0, %v633_v49, %v632_v47  ;;  %v589_v57 = vld [vmem:[%s1293_s0 + $0x20] ss:$8 sm:$0xf]  }
  0x15   :  { %v637_v54 = vld [vmem:[%s1293_s0 - $0x19] ss:$8 sm:$0xf0]   ;;  %v298_v56 = vsel %vm84_vm0, %v586_v52, %v585_v46  ;;  %v313_v58 = vld [vmem:[%s1293_s0] ss:$8 sm:$0xf]  }
  0x16   :  { %v802_v55 = vsel %vm84_vm0, %v637_v54, %v636_v50  ;;  %v591_v59 = vld [vmem:[%s1293_s0 - $0x1f] ss:$8 sm:$0xf0]   ;;  %v594_v60 = vld [vmem:[%s1293_s0 + $0x2] ss:$8 sm:$0xf]  }
  0x17   :  { %202 = vrot.lane.b32.xlu0 %v201_v30, %s651_s2  ;;  %v595_v61 = vld [vmem:[%s1293_s0 - $0x1d] ss:$8 sm:$0xf0]   ;;  %v317_v62 = vsel %vm84_vm0, %v591_v59, %v313_v58  ;;  %v598_v0 = vld [vmem:[%s1293_s0 + $0x4] ss:$8 sm:$0xf]  }
  0x18   :  { %215 = vrot.lane.b32.xlu1 %v214_v31, %s651_s2  ;;  %v330_v63 = vsel %vm84_vm0, %v595_v61, %v594_v60  ;;  %v599_v1 = vld [vmem:[%s1293_s0 - $0x1b] ss:$8 sm:$0xf0]   ;;  %v602_v2 = vld [vmem:[%s1293_s0 + $0x6] ss:$8 sm:$0xf]  }
  0x19   :  { %v603_v3 = vld [vmem:[%s1293_s0 - $0x19] ss:$8 sm:$0xf0]   ;;  %s653_s19 = smov 48   ;;  %v343_v4 = vsel %vm84_vm0, %v599_v1, %v598_v0  ;;  %s654_s5 = smov 32  }
  0x1a   :  { %v356_v5 = vsel %vm84_vm0, %v603_v3, %v602_v2  ;;  %v371_v6 = vld [vmem:[%s1293_s0] ss:$8 sm:$0xf]   ;;  %v608_v7 = vld [vmem:[%s1293_s0 - $0x1f] ss:$8 sm:$0xf0]  }
  0x1b   :  { %228 = vrot.lane.b32.xlu0 %v227_v36, %s651_s2  ;;  %v606_v8 = vld [vmem:[%s1293_s0 + $0x20] ss:$8 sm:$0xf]   ;;  %v375_v9 = vsel %vm84_vm0, %v608_v7, %v371_v6  ;;  %v611_v10 = vld [vmem:[%s1293_s0 + $0x2] ss:$8 sm:$0xf]  }
  0x1c   :  { %241 = vrot.lane.b32.xlu1 %v240_v37, %s651_s2  ;;  %v612_v11 = vld [vmem:[%s1293_s0 - $0x1d] ss:$8 sm:$0xf0]   ;;  %v615_v12 = vld [vmem:[%s1293_s0 + $0x4] ss:$8 sm:$0xf]  }
  0x1d   :  { %v616_v13 = vld [vmem:[%s1293_s0 - $0x1b] ss:$8 sm:$0xf0]   ;;  %v388_v14 = vsel %vm84_vm0, %v612_v11, %v611_v10  ;;  %v619_v16 = vld [vmem:[%s1293_s0 + $0x6] ss:$8 sm:$0xf]  }
  0x1e   :  { %v401_v15 = vsel %vm84_vm0, %v616_v13, %v615_v12  ;;  %v620_v17 = vld [vmem:[%s1293_s0 - $0x19] ss:$8 sm:$0xf0]   ;;  %v623_v18 = vld [vmem:[%s1293_s0 + $0x20] ss:$8 sm:$0xf]  }
  0x1f   :  { %250 = vrot.lane.b32.xlu0 %v572_v40, %s651_s2  ;;  %v429_v19 = vld [vmem:[%s1293_s0] ss:$8 sm:$0xf]   ;;  %v625_v20 = vld [vmem:[%s1293_s0 - $0x1f] ss:$8 sm:$0xf0]   ;;  %v414_v21 = vsel %vm84_vm0, %v620_v17, %v619_v16 }
  0x20   :  { %260 = vrot.lane.b32.xlu1 %v259_v41, %s652_s21  ;;  %v628_v22 = vld [vmem:[%s1293_s0 + $0x2] ss:$8 sm:$0xf]   ;;  %v629_v23 = vld [vmem:[%s1293_s0 - $0x1d] ss:$8 sm:$0xf0]   ;;  %v433_v29 = vsel %vm84_vm0, %v625_v20, %v429_v19 }
  0x21   :  { %v2_v24 = vld [vmem:[%s1293_s0] sm:$0xff]   ;;  %v494_v25 = vld [vmem:[%s1293_s0 + $0x8] sm:$0xff]   ;;  %v503_v26 = vld [vmem:[%s1293_s0 + $0x10] sm:$0xff]   ;;  %v446_v30 = vsel %vm84_vm0, %v629_v23, %v628_v22 }
  0x22   :  { %4 = vst.msk [vmem:[%s1294_s1] sm:$0x1] %vm3_vm1, %v2_v24   ;;  %487 = vst.msk [vmem:[%s1294_s1 + $0x1f] sm:$0x2] %vm3_vm1, %v2_v24   ;;  %v512_v27 = vld [vmem:[%s1293_s0 + $0x18] sm:$0xff]  }
  0x23   :  { %273 = vrot.lane.b32.xlu0 %v272_v48, %s652_s21  ;;  %488 = vst.msk [vmem:[%s1294_s1 + $0x3e] sm:$0x4] %vm3_vm1, %v2_v24   ;;  %489 = vst.msk [vmem:[%s1294_s1 + $0x5d] sm:$0x8] %vm3_vm1, %v2_v24  }
  0x24   :  { %286 = vrot.lane.b32.xlu1 %v285_v51, %s652_s21  ;;  %490 = vst.msk [vmem:[%s1294_s1 + $0x7c] sm:$0x10] %vm3_vm1, %v2_v24   ;;  %491 = vst.msk [vmem:[%s1294_s1 + $0x9b] sm:$0x20] %vm3_vm1, %v2_v24  }
  0x25   :  { %492 = vst.msk [vmem:[%s1294_s1 + $0xba] sm:$0x40] %vm3_vm1, %v2_v24   ;;  %493 = vst.msk [vmem:[%s1294_s1 + $0xd9] sm:$0x80] %vm3_vm1, %v2_v24  }
  0x26   :  { %495 = vst.msk [vmem:[%s1294_s1 + $0x8] sm:$0x1] %vm3_vm1, %v494_v25   ;;  %496 = vst.msk [vmem:[%s1294_s1 + $0x27] sm:$0x2] %vm3_vm1, %v494_v25  }
  0x27   :  { %299 = vrot.lane.b32.xlu0 %v298_v56, %s652_s21  ;;  %497 = vst.msk [vmem:[%s1294_s1 + $0x46] sm:$0x4] %vm3_vm1, %v494_v25   ;;  %498 = vst.msk [vmem:[%s1294_s1 + $0x65] sm:$0x8] %vm3_vm1, %v494_v25  }
  0x28   :  { %308 = vrot.lane.b32.xlu1 %v589_v57, %s652_s21  ;;  %499 = vst.msk [vmem:[%s1294_s1 + $0x84] sm:$0x10] %vm3_vm1, %v494_v25   ;;  %500 = vst.msk [vmem:[%s1294_s1 + $0xa3] sm:$0x20] %vm3_vm1, %v494_v25  }
  0x29   :  { %501 = vst.msk [vmem:[%s1294_s1 + $0xc2] sm:$0x40] %vm3_vm1, %v494_v25   ;;  %502 = vst.msk [vmem:[%s1294_s1 + $0xe1] sm:$0x80] %vm3_vm1, %v494_v25  }
  0x2a   :  { %504 = vst.msk [vmem:[%s1294_s1 + $0x10] sm:$0x1] %vm3_vm1, %v503_v26   ;;  %505 = vst.msk [vmem:[%s1294_s1 + $0x2f] sm:$0x2] %vm3_vm1, %v503_v26  }
  0x2b   :  { %318 = vrot.lane.b32.xlu0 %v317_v62, %s653_s19  ;;  %506 = vst.msk [vmem:[%s1294_s1 + $0x4e] sm:$0x4] %vm3_vm1, %v503_v26   ;;  %507 = vst.msk [vmem:[%s1294_s1 + $0x6d] sm:$0x8] %vm3_vm1, %v503_v26  }
  0x2c   :  { %331 = vrot.lane.b32.xlu1 %v330_v63, %s653_s19  ;;  %508 = vst.msk [vmem:[%s1294_s1 + $0x8c] sm:$0x10] %vm3_vm1, %v503_v26   ;;  %509 = vst.msk [vmem:[%s1294_s1 + $0xab] sm:$0x20] %vm3_vm1, %v503_v26  }
  0x2d   :  { %510 = vst.msk [vmem:[%s1294_s1 + $0xca] sm:$0x40] %vm3_vm1, %v503_v26   ;;  %511 = vst.msk [vmem:[%s1294_s1 + $0xe9] sm:$0x80] %vm3_vm1, %v503_v26  }
  0x2e   :  { %v521_v28 = vld [vmem:[%s1293_s0 + $0x20] ss:$8 sm:$0xf]   ;;  %513 = vst.msk [vmem:[%s1294_s1 + $0x18] sm:$0x1] %vm3_vm1, %v512_v27  }
  0x2f   :  { %344 = vrot.lane.b32.xlu0 %v343_v4, %s653_s19  ;;  %514 = vst.msk [vmem:[%s1294_s1 + $0x37] sm:$0x2] %vm3_vm1, %v512_v27   ;;  %515 = vst.msk [vmem:[%s1294_s1 + $0x56] sm:$0x4] %vm3_vm1, %v512_v27  }
  0x30   :  { %357 = vrot.lane.b32.xlu1 %v356_v5, %s653_s19  ;;  %516 = vst.msk [vmem:[%s1294_s1 + $0x75] sm:$0x8] %vm3_vm1, %v512_v27   ;;  %517 = vst.msk [vmem:[%s1294_s1 + $0x94] sm:$0x10] %vm3_vm1, %v512_v27  }
  0x31   :  { %518 = vst.msk [vmem:[%s1294_s1 + $0xb3] sm:$0x20] %vm3_vm1, %v512_v27   ;;  %519 = vst.msk [vmem:[%s1294_s1 + $0xd2] sm:$0x40] %vm3_vm1, %v512_v27  }
  0x32   :  { %520 = vst.msk [vmem:[%s1294_s1 + $0xf1] sm:$0x80] %vm3_vm1, %v512_v27   ;;  %522 = vst.msk [vmem:[%s1294_s1 + $0x100] ss:$8 sm:$0xf] %vm3_vm1, %v521_v28  }
  0x33   :  { %366 = vrot.lane.b32.xlu0 %v606_v8, %s653_s19  ;;  %v640_v31 = vld [vmem:[%s1293_s0 + $0x20] ss:$8 sm:$0xf]  }
  0x34   :  { %376 = vrot.lane.b32.xlu1 %v375_v9, %s654_s5 }
  0x37   :  { %389 = vrot.lane.b32.xlu0 %v388_v14, %s654_s5 }
  0x38   :  { %402 = vrot.lane.b32.xlu1 %v401_v15, %s654_s5 }
  0x3b   :  { %415 = vrot.lane.b32.xlu0 %v414_v21, %s654_s5 }
  0x3c   :  { %424 = vrot.lane.b32.xlu1 %v623_v18, %s654_s5  ;;  %s655_s5 = smov 16  }
  0x3f   :  { %434 = vrot.lane.b32.xlu0 %v433_v29, %s655_s5 }
  0x40   :  { %447 = vrot.lane.b32.xlu1 %v446_v30, %s655_s5 }
  0x43   :  { %460 = vrot.lane.b32.xlu0 %v796_v53, %s655_s5 }
  0x44   :  { %473 = vrot.lane.b32.xlu1 %v802_v55, %s655_s5 }
  0x47   :  { %482 = vrot.lane.b32.xlu0 %v640_v31, %s655_s5 }
  0x75   :  { %v87_v32 = vpop.permute.xlu0 %86  }
  0x76   :  { %524 = vst.msk [vmem:[%s1294_s1 + $0x1] ss:$8 sm:$0xf] %vm3_vm1, %v87_v32   ;;  %525 = vst.msk [vmem:[%s1294_s1 + $0x1] ss:$8 sm:$0xf0] %vm3_vm1, %v87_v32   ;;  %v113_v33 = vpop.permute.xlu1 %112  }
  0x77   :  { %532 = vst.msk [vmem:[%s1294_s1 + $0x81] ss:$8 sm:$0xf] %vm3_vm1, %v113_v33   ;;  %533 = vst.msk [vmem:[%s1294_s1 + $0x81] ss:$8 sm:$0xf0] %vm3_vm1, %v113_v33  }
  0x79   :  { %v100_v34 = vpop.permute.xlu0 %99  }
  0x7a   :  { %528 = vst.msk [vmem:[%s1294_s1 + $0x41] ss:$8 sm:$0xf] %vm3_vm1, %v100_v34   ;;  %529 = vst.msk [vmem:[%s1294_s1 + $0x41] ss:$8 sm:$0xf0] %vm3_vm1, %v100_v34   ;;  %v126_v35 = vpop.permute.xlu1 %125  }
  0x7b   :  { %536 = vst.msk [vmem:[%s1294_s1 + $0xc1] ss:$8 sm:$0xf] %vm3_vm1, %v126_v35   ;;  %537 = vst.msk [vmem:[%s1294_s1 + $0xc1] ss:$8 sm:$0xf0] %vm3_vm1, %v126_v35  }
  0x7d   :  { %v135_v36 = vpop.permute.xlu0 %134  }
  0x7e   :  { %539 = vst.msk [vmem:[%s1294_s1 + $0x101] ss:$8 sm:$0xf] %vm3_vm1, %v135_v36   ;;  %v145_v37 = vpop.permute.xlu1 %144  }
  0x7f   :  { %541 = vst.msk [vmem:[%s1294_s1 + $0x2] ss:$8 sm:$0xf] %vm3_vm1, %v145_v37   ;;  %542 = vst.msk [vmem:[%s1294_s1 + $0x2] ss:$8 sm:$0xf0] %vm3_vm1, %v145_v37  }
  0x81   :  { %v158_v38 = vpop.permute.xlu0 %157  }
  0x82   :  { %545 = vst.msk [vmem:[%s1294_s1 + $0x42] ss:$8 sm:$0xf] %vm3_vm1, %v158_v38   ;;  %546 = vst.msk [vmem:[%s1294_s1 + $0x42] ss:$8 sm:$0xf0] %vm3_vm1, %v158_v38   ;;  %v171_v39 = vpop.permute.xlu1 %170  }
  0x83   :  { %549 = vst.msk [vmem:[%s1294_s1 + $0x82] ss:$8 sm:$0xf] %vm3_vm1, %v171_v39   ;;  %550 = vst.msk [vmem:[%s1294_s1 + $0x82] ss:$8 sm:$0xf0] %vm3_vm1, %v171_v39  }
  0x85   :  { %v184_v40 = vpop.permute.xlu0 %183  }
  0x86   :  { %553 = vst.msk [vmem:[%s1294_s1 + $0xc2] ss:$8 sm:$0xf] %vm3_vm1, %v184_v40   ;;  %554 = vst.msk [vmem:[%s1294_s1 + $0xc2] ss:$8 sm:$0xf0] %vm3_vm1, %v184_v40   ;;  %v193_v41 = vpop.permute.xlu1 %192  }
  0x87   :  { %556 = vst.msk [vmem:[%s1294_s1 + $0x102] ss:$8 sm:$0xf] %vm3_vm1, %v193_v41  }
  0x89   :  { %v203_v42 = vpop.permute.xlu0 %202  }
  0x8a   :  { %558 = vst.msk [vmem:[%s1294_s1 + $0x3] ss:$8 sm:$0xf] %vm3_vm1, %v203_v42   ;;  %559 = vst.msk [vmem:[%s1294_s1 + $0x3] ss:$8 sm:$0xf0] %vm3_vm1, %v203_v42   ;;  %v216_v43 = vpop.permute.xlu1 %215  }
  0x8b   :  { %562 = vst.msk [vmem:[%s1294_s1 + $0x43] ss:$8 sm:$0xf] %vm3_vm1, %v216_v43   ;;  %563 = vst.msk [vmem:[%s1294_s1 + $0x43] ss:$8 sm:$0xf0] %vm3_vm1, %v216_v43  }
  0x8d   :  { %v229_v44 = vpop.permute.xlu0 %228  }
  0x8e   :  { %566 = vst.msk [vmem:[%s1294_s1 + $0x83] ss:$8 sm:$0xf] %vm3_vm1, %v229_v44   ;;  %567 = vst.msk [vmem:[%s1294_s1 + $0x83] ss:$8 sm:$0xf0] %vm3_vm1, %v229_v44   ;;  %v242_v45 = vpop.permute.xlu1 %241  }
  0x8f   :  { %570 = vst.msk [vmem:[%s1294_s1 + $0xc3] ss:$8 sm:$0xf] %vm3_vm1, %v242_v45   ;;  %571 = vst.msk [vmem:[%s1294_s1 + $0xc3] ss:$8 sm:$0xf0] %vm3_vm1, %v242_v45  }
  0x91   :  { %v251_v46 = vpop.permute.xlu0 %250  }
  0x92   :  { %573 = vst.msk [vmem:[%s1294_s1 + $0x103] ss:$8 sm:$0xf] %vm3_vm1, %v251_v46   ;;  %v261_v47 = vpop.permute.xlu1 %260  }
  0x93   :  { %575 = vst.msk [vmem:[%s1294_s1 + $0x4] ss:$8 sm:$0xf] %vm3_vm1, %v261_v47   ;;  %576 = vst.msk [vmem:[%s1294_s1 + $0x4] ss:$8 sm:$0xf0] %vm3_vm1, %v261_v47  }
  0x95   :  { %v274_v48 = vpop.permute.xlu0 %273  }
  0x96   :  { %579 = vst.msk [vmem:[%s1294_s1 + $0x44] ss:$8 sm:$0xf] %vm3_vm1, %v274_v48   ;;  %580 = vst.msk [vmem:[%s1294_s1 + $0x44] ss:$8 sm:$0xf0] %vm3_vm1, %v274_v48   ;;  %v287_v49 = vpop.permute.xlu1 %286  }
  0x97   :  { %583 = vst.msk [vmem:[%s1294_s1 + $0x84] ss:$8 sm:$0xf] %vm3_vm1, %v287_v49   ;;  %584 = vst.msk [vmem:[%s1294_s1 + $0x84] ss:$8 sm:$0xf0] %vm3_vm1, %v287_v49  }
  0x99   :  { %v300_v50 = vpop.permute.xlu0 %299  }
  0x9a   :  { %587 = vst.msk [vmem:[%s1294_s1 + $0xc4] ss:$8 sm:$0xf] %vm3_vm1, %v300_v50   ;;  %588 = vst.msk [vmem:[%s1294_s1 + $0xc4] ss:$8 sm:$0xf0] %vm3_vm1, %v300_v50   ;;  %v309_v51 = vpop.permute.xlu1 %308  }
  0x9b   :  { %590 = vst.msk [vmem:[%s1294_s1 + $0x104] ss:$8 sm:$0xf] %vm3_vm1, %v309_v51  }
  0x9d   :  { %v319_v52 = vpop.permute.xlu0 %318  }
  0x9e   :  { %592 = vst.msk [vmem:[%s1294_s1 + $0x5] ss:$8 sm:$0xf] %vm3_vm1, %v319_v52   ;;  %593 = vst.msk [vmem:[%s1294_s1 + $0x5] ss:$8 sm:$0xf0] %vm3_vm1, %v319_v52   ;;  %v332_v53 = vpop.permute.xlu1 %331  }
  0x9f   :  { %596 = vst.msk [vmem:[%s1294_s1 + $0x45] ss:$8 sm:$0xf] %vm3_vm1, %v332_v53   ;;  %597 = vst.msk [vmem:[%s1294_s1 + $0x45] ss:$8 sm:$0xf0] %vm3_vm1, %v332_v53  }
  0xa1   :  { %v345_v54 = vpop.permute.xlu0 %344  }
  0xa2   :  { %600 = vst.msk [vmem:[%s1294_s1 + $0x85] ss:$8 sm:$0xf] %vm3_vm1, %v345_v54   ;;  %601 = vst.msk [vmem:[%s1294_s1 + $0x85] ss:$8 sm:$0xf0] %vm3_vm1, %v345_v54   ;;  %v358_v55 = vpop.permute.xlu1 %357  }
  0xa3   :  { %604 = vst.msk [vmem:[%s1294_s1 + $0xc5] ss:$8 sm:$0xf] %vm3_vm1, %v358_v55   ;;  %605 = vst.msk [vmem:[%s1294_s1 + $0xc5] ss:$8 sm:$0xf0] %vm3_vm1, %v358_v55  }
  0xa5   :  { %v367_v56 = vpop.permute.xlu0 %366  }
  0xa6   :  { %607 = vst.msk [vmem:[%s1294_s1 + $0x105] ss:$8 sm:$0xf] %vm3_vm1, %v367_v56   ;;  %v377_v57 = vpop.permute.xlu1 %376  }
  0xa7   :  { %609 = vst.msk [vmem:[%s1294_s1 + $0x6] ss:$8 sm:$0xf] %vm3_vm1, %v377_v57   ;;  %610 = vst.msk [vmem:[%s1294_s1 + $0x6] ss:$8 sm:$0xf0] %vm3_vm1, %v377_v57  }
  0xa9   :  { %v390_v58 = vpop.permute.xlu0 %389  }
  0xaa   :  { %613 = vst.msk [vmem:[%s1294_s1 + $0x46] ss:$8 sm:$0xf] %vm3_vm1, %v390_v58   ;;  %614 = vst.msk [vmem:[%s1294_s1 + $0x46] ss:$8 sm:$0xf0] %vm3_vm1, %v390_v58   ;;  %v403_v59 = vpop.permute.xlu1 %402  }
  0xab   :  { %617 = vst.msk [vmem:[%s1294_s1 + $0x86] ss:$8 sm:$0xf] %vm3_vm1, %v403_v59   ;;  %618 = vst.msk [vmem:[%s1294_s1 + $0x86] ss:$8 sm:$0xf0] %vm3_vm1, %v403_v59  }
  0xad   :  { %v416_v60 = vpop.permute.xlu0 %415  }
  0xae   :  { %621 = vst.msk [vmem:[%s1294_s1 + $0xc6] ss:$8 sm:$0xf] %vm3_vm1, %v416_v60   ;;  %622 = vst.msk [vmem:[%s1294_s1 + $0xc6] ss:$8 sm:$0xf0] %vm3_vm1, %v416_v60   ;;  %v425_v61 = vpop.permute.xlu1 %424  }
  0xaf   :  { %624 = vst.msk [vmem:[%s1294_s1 + $0x106] ss:$8 sm:$0xf] %vm3_vm1, %v425_v61  }
  0xb1   :  { %v435_v62 = vpop.permute.xlu0 %434  }
  0xb2   :  { %626 = vst.msk [vmem:[%s1294_s1 + $0x7] ss:$8 sm:$0xf] %vm3_vm1, %v435_v62   ;;  %627 = vst.msk [vmem:[%s1294_s1 + $0x7] ss:$8 sm:$0xf0] %vm3_vm1, %v435_v62   ;;  %v448_v63 = vpop.permute.xlu1 %447  }
  0xb3   :  { %630 = vst.msk [vmem:[%s1294_s1 + $0x47] ss:$8 sm:$0xf] %vm3_vm1, %v448_v63   ;;  %631 = vst.msk [vmem:[%s1294_s1 + $0x47] ss:$8 sm:$0xf0] %vm3_vm1, %v448_v63  }
  0xb5   :  { %v461_v0 = vpop.permute.xlu0 %460  }
  0xb6   :  { %634 = vst.msk [vmem:[%s1294_s1 + $0x87] ss:$8 sm:$0xf] %vm3_vm1, %v461_v0   ;;  %635 = vst.msk [vmem:[%s1294_s1 + $0x87] ss:$8 sm:$0xf0] %vm3_vm1, %v461_v0   ;;  %v474_v1 = vpop.permute.xlu1 %473  }
  0xb7   :  { %638 = vst.msk [vmem:[%s1294_s1 + $0xc7] ss:$8 sm:$0xf] %vm3_vm1, %v474_v1   ;;  %639 = vst.msk [vmem:[%s1294_s1 + $0xc7] ss:$8 sm:$0xf0] %vm3_vm1, %v474_v1  }
  0xb9   :  { %v483_v2 = vpop.permute.xlu0 %482  }
  0xba   :  { %641 = vst.msk [vmem:[%s1294_s1 + $0x107] ss:$8 sm:$0xf] %vm3_vm1, %v483_v2  }

// kernel: fcos_head_forward.1
= control target key start
LH: loop header
LB: loop body
LE: loop exit
PB: predicated region body
PF: predicated region fallthrough
CT: control target
= control target key end

     0   :  { %s8542_s15 = smov 0   ;;  %s9825_s0 = inlined_call_operand.vmem [shape: f32[2,4,512], index: 0, kind: input, shape index: {}]   ;;  %s9826_s1 = inlined_call_operand.vmem [shape: f32[2,9,512], index: 1, kind: input, shape index: {}]   ;;  %s9827_s2 = inlined_call_operand.vmem [shape: f32[9,21,4], index: 2, kind: input, shape index: {}]   ;;  %s9828_s3 = inlined_call_operand.vmem [shape: f32[21,1], index: 3, kind: input, shape index: {}]   ;;  %s9829_s4 = inlined_call_operand.vmem [shape: f32[2,9,512], index: 4, kind: output, shape index: {}]  }
   0x1 LB: > { %s8043_s16 = sadd.s32 4294967295, %s8504_s15   ;;  %p8047_p0 = scmp.ge.s32.totalorder %s8504_s15, 1  ;;  %s8504_s15 = sphi %s8542_s15, %s14_s15  }
   0x2   : > { %p172_p1 = scmp.lt.s32.totalorder %s8504_s15, 3 }
   0x4   : > { %p173_p2 = pnand %p8047_p0, %p172_p1 }
   0x5   : > { %p203_p3 = scmp.lt.s32.totalorder (!%p173_p2), %s8043_s16, 1  ;;  %v229_v0 = vlaneseq (!%p173_p2)  ;;  %v8506_v1 = vmov (!%p173_p2), 0.0   ;;  %s8507_s25 = smov (!%p173_p2), 112   ;;  %vm292_vm0 = vcmask (!%p173_p2), 916480   ;;  %vm255_vm1 = vcmask (!%p173_p2), 1043456  }
   0x6   : > { %176 = sbr.rel (%p173_p2) target bundleno = 1554 (0x612), region = 36  ;;  %218 = vst [vmem:[#allocation2] sm:$0xf] (!%p173_p2), %v8506_v1  ;;  %219 = vst [vmem:[#allocation2 + $0x14] sm:$0xf] (!%p173_p2), %v8506_v1  ;;  %400 = vmatprep.mubr.f32.mxu0 (!%p173_p2), %v8506_v1  ;;  %471 = vmatprep.mubr.f32.mxu1 (!%p173_p2), %v8506_v1  ;;  %s8508_s26 = smov (!%p173_p2), 111  }
   0x7   : > { %v8557_v2 = vshrl.u32 (!%p173_p2), %v229_v0, 7  ;;  %s8509_s27 = smov (!%p173_p2), 113   ;;  %s8510_s28 = smov (!%p173_p2), 127   ;;  %vm253_vm2 = vcmask (!%p173_p2), 908288   ;;  %vm681_vm3 = vcmask (!%p173_p2), 924672   ;;  %vm900_vm4 = vcmask (!%p173_p2), 1039360  }
   0x8   : > { %s8511_s29 = smov (!%p173_p2), 1   ;;  %s8512_s30 = smov (!%p173_p2), 15   ;;  %vm927_vm5 = vcmask (!%p173_p2), 7168   ;;  %vm708_vm6 = vcmask (!%p173_p2), 121856   ;;  %vm319_vm7 = vcmask (!%p173_p2), 130048   ;;  %vm493_vm8 = vcmask (!%p173_p2), 138240  }
   0x9   : > { %v8561_v3 = vsub.s32 (!%p173_p2), 0, %v8557_v2  ;;  %v8564_v4 = vsub.s32 (!%p173_p2), 1, %v8557_v2  ;;  %v8567_v5 = vsub.s32 (!%p173_p2), 2, %v8557_v2  ;;  %v8570_v6 = vsub.s32 (!%p173_p2), 3, %v8557_v2  ;;  %s8513_s5 = smov (!%p173_p2), 16   ;;  %s8514_s6 = smov (!%p173_p2), 17  }
   0xa   : > { %vm324_vm9 = vcmask (!%p173_p2), 31744   ;;  %vm7971_vm10 = vcmp.lt.s32.totalorder (!%p173_p2), %v229_v0, 512 }
   0xd   : > { %s9831_s16 = smov (!%p203_p3, %s8043_s16), 1 }
   0xe   : > { %s8338_s17 = sshll.u32 %s9831_s16, 6  ;;  %s8337_s21 = sshll.u32 %s9831_s16, 4 }
   0xf   : > { %s8577_s20 = scalar_lea.vmem %s9826_s1, %s8338_s17  ;;  %s207_s24 = scalar_lea.vmem %s9825_s0, %s8337_s21 }
  0x10   : > { %v8054_v7 = vld [vmem:[%s8577_s20 + $0x1] ss:$8 sm:$0xf]  ;;  %v227_v8 = vld [vmem:[%s8577_s20] ss:$8 sm:$0xf]  ;;  %s9809_s21 = scalar_lea.vmem %s9829_s4, %s8338_s17 }
  0x11   : > { %v271_v9 = vrot.slane %v8054_v7, %v8561_v3  ;;  %v275_v10 = vrot.slane %v8054_v7, %v8564_v4  ;;  %v232_v11 = vrot.slane %v227_v8, %v8561_v3  ;;  %v236_v12 = vrot.slane %v227_v8, %v8564_v4  ;;  %v8068_v13 = vld [vmem:[%s8577_s20 + $0x2] ss:$8 sm:$0xf]  ;;  %v8076_v23 = vld [vmem:[%s8577_s20 + $0x3] ss:$8 sm:$0xf] }
  0x12   : > { %v279_v14 = vrot.slane %v8054_v7, %v8567_v5  ;;  %v283_v15 = vrot.slane %v8054_v7, %v8570_v6  ;;  %v240_v16 = vrot.slane %v227_v8, %v8567_v5  ;;  %v244_v17 = vrot.slane %v227_v8, %v8570_v6  ;;  %v8601_v27 = vld [vmem:[%s207_s24] sm:$0xff]  ;;  %v8603_v28 = vld [vmem:[%s207_s24 + $0x8] sm:$0xff] }
  0x13   : > { %v284_v18 = vcombine.low %v271_v9, %v275_v10  ;;  %v245_v19 = vcombine.low %v232_v11, %v236_v12  ;;  %v660_v21 = vrot.slane %v8068_v13, %v8561_v3  ;;  %v664_v22 = vrot.slane %v8068_v13, %v8564_v4  ;;  %222 = vst [vmem:[#allocation2 + $0x4] sm:$0xff] %v8601_v27  ;;  %v8092_v35 = vld [vmem:[%s8577_s20 + $0x5] ss:$8 sm:$0xf] }
  0x14   : > { %v285_v20 = vcombine.low %v279_v14, %v283_v15  ;;  %v246_v24 = vcombine.low %v240_v16, %v244_v17  ;;  %v668_v25 = vrot.slane %v8068_v13, %v8567_v5  ;;  %v672_v26 = vrot.slane %v8068_v13, %v8570_v6  ;;  %223 = vst [vmem:[#allocation2 + $0xc] sm:$0xff] %v8603_v28  ;;  %v8100_v42 = vld [vmem:[%s8577_s20 + $0x6] ss:$8 sm:$0xf] }
  0x15   : > { %286 = vrot.lane.b32.xlu0 %v284_v18, %s8507_s25  ;;  %247 = vrot.lane.b32.xlu1 %v245_v19, %s8508_s26  ;;  %v673_v29 = vcombine.low %v660_v21, %v664_v22  ;;  %v879_v30 = vrot.slane %v8076_v23, %v8561_v3  ;;  %v883_v31 = vrot.slane %v8076_v23, %v8564_v4  ;;  %v8108_v49 = vld [vmem:[%s8577_s20 + $0x7] ss:$8 sm:$0xf]  ;;  %v8116_v56 = vld [vmem:[%s8577_s20 + $0x20] ss:$8 sm:$0xf] }
  0x16   : > { %v674_v32 = vcombine.low %v668_v25, %v672_v26  ;;  %v887_v33 = vrot.slane %v8076_v23, %v8567_v5  ;;  %v891_v34 = vrot.slane %v8076_v23, %v8570_v6  ;;  %v1288_v37 = vrot.slane %v8092_v35, %v8561_v3 }
  0x17   : > { %v892_v36 = vcombine.low %v879_v30, %v883_v31  ;;  %v1292_v38 = vrot.slane %v8092_v35, %v8564_v4  ;;  %v1296_v40 = vrot.slane %v8092_v35, %v8567_v5  ;;  %v1300_v41 = vrot.slane %v8092_v35, %v8570_v6 }
  0x18   : > { %v893_v39 = vcombine.low %v887_v33, %v891_v34  ;;  %v1505_v43 = vrot.slane %v8100_v42, %v8561_v3  ;;  %v1509_v44 = vrot.slane %v8100_v42, %v8564_v4  ;;  %v1513_v45 = vrot.slane %v8100_v42, %v8567_v5 }
  0x19   : > { %288 = vrot.lane.b32.xlu0 %v285_v20, %s8507_s25  ;;  %249 = vrot.lane.b32.xlu1 %v246_v24, %s8508_s26  ;;  %v1301_v46 = vcombine.low %v1288_v37, %v1292_v38  ;;  %v1302_v47 = vcombine.low %v1296_v40, %v1300_v41  ;;  %v1517_v48 = vrot.slane %v8100_v42, %v8570_v6 }
  0x1a   : > { %v1518_v50 = vcombine.low %v1505_v43, %v1509_v44  ;;  %v1722_v51 = vrot.slane %v8108_v49, %v8561_v3  ;;  %v1726_v52 = vrot.slane %v8108_v49, %v8564_v4  ;;  %v1730_v54 = vrot.slane %v8108_v49, %v8567_v5  ;;  %v224_v11 = vld [vmem:[#allocation2] sm:$0xff] }
  0x1b   : > { %v1519_v53 = vcombine.low %v1513_v45, %v1517_v48  ;;  %v1734_v55 = vrot.slane %v8108_v49, %v8570_v6  ;;  %v1939_v58 = vrot.slane %v8116_v56, %v8561_v3  ;;  %v1943_v59 = vrot.slane %v8116_v56, %v8564_v4  ;;  %v226_v17 = vld [vmem:[#allocation2 + $0x10] sm:$0xf]  ;;  %v225_v20 = vld [vmem:[#allocation2 + $0x8] sm:$0xff] }
  0x1c   : > { %v1735_v57 = vcombine.low %v1722_v51, %v1726_v52  ;;  %v1947_v61 = vrot.slane %v8116_v56, %v8567_v5  ;;  %v1951_v62 = vrot.slane %v8116_v56, %v8570_v6  ;;  %v653_v52 = vld [vmem:[#allocation2 + $0x10] sm:$0xf] }
  0x1d   : > { %675 = vrot.lane.b32.xlu0 %v673_v29, %s8509_s27  ;;  %677 = vrot.lane.b32.xlu1 %v674_v32, %s8509_s27  ;;  %v1736_v60 = vcombine.low %v1730_v54, %v1734_v55  ;;  %v1952_v63 = vcombine.low %v1939_v58, %v1943_v59 }
  0x1e   : > { %v1953_v7 = vcombine.low %v1947_v61, %v1951_v62 }
  0x21   : > { %894 = vrot.lane.b32.xlu0 %v892_v36, %s8510_s28  ;;  %896 = vrot.lane.b32.xlu1 %v893_v39, %s8510_s28 }
  0x25   : > { %1303 = vrot.lane.b32.xlu0 %v1301_v46, %s8511_s29  ;;  %1305 = vrot.lane.b32.xlu1 %v1302_v47, %s8511_s29 }
  0x29   : > { %1520 = vrot.lane.b32.xlu0 %v1518_v50, %s8512_s30  ;;  %1522 = vrot.lane.b32.xlu1 %v1519_v53, %s8512_s30 }
  0x2d   : > { %1737 = vrot.lane.b32.xlu0 %v1735_v57, %s8513_s5  ;;  %1739 = vrot.lane.b32.xlu1 %v1736_v60, %s8513_s5 }
  0x31   : > { %1954 = vrot.lane.b32.xlu0 %v1952_v63, %s8514_s6  ;;  %1956 = vrot.lane.b32.xlu1 %v1953_v7, %s8514_s6 }
  0x87   : > { %v287_v8 = vpop.permute.xlu0 %286  ;;  %v248_v9 = vpop.permute.xlu1 %247 }
  0x88   : > { %v290_v10 = vrot.slane %v287_v8, 4  ;;  %v251_v13 = vrot.slane %v248_v9, 4 }
  0x8a   : > { %v293_v12 = vsel %vm292_vm0, %v290_v10, %v287_v8  ;;  %v254_v24 = vsel %vm253_vm2, %v251_v13, %v248_v9  ;;  %v872_v8 = vld [vmem:[#allocation2 + $0x10] sm:$0xf] }
  0x8b   : > { %v289_v14 = vpop.permute.xlu0 %288  ;;  %v250_v15 = vpop.permute.xlu1 %249  ;;  %v299_v16 = vmul.f32 %v293_v12, %v224_v11  ;;  %v261_v31 = vmul.f32 %v254_v24, %v224_v11 }
  0x8c   : > { %v291_v18 = vrot.slane %v289_v14, 4  ;;  %v252_v19 = vrot.slane %v250_v15, 4 }
  0x8d   : > { %309 = vrot.lane.b32.xlu0 %v299_v16, %s8513_s5  ;;  %v307_v34 = vcombine.high %v299_v16, %v299_v16  ;;  %v481_v36 = vcombine.high %v261_v31, %v261_v31 }
  0x8e   : > { %v294_v21 = vsel %vm255_vm1, %v290_v10, %v291_v18  ;;  %v256_v22 = vsel %vm255_vm1, %v251_v13, %v252_v19  ;;  %v301_v23 = vmul.f32 %v291_v18, %v226_v17  ;;  %v263_v42 = vmul.f32 %v252_v19, %v226_v17 }
  0x8f   : > { %v295_v25 = vsel %vm292_vm0, %v294_v21, %v289_v14  ;;  %v257_v26 = vsel %vm253_vm2, %v256_v22, %v250_v15  ;;  %v676_v30 = vpop.permute.xlu0 %675  ;;  %v678_v35 = vpop.permute.xlu1 %677  ;;  %v1281_v22 = vld [vmem:[#allocation2 + $0x14] sm:$0xf] }
  0x90   : > { %317 = vrot.lane.b32.xlu1 %v301_v23, %s8513_s5  ;;  %v262_v29 = vmul.f32 %v257_v26, %v225_v20  ;;  %v300_v32 = vmul.f32 %v295_v25, %v225_v20  ;;  %v679_v33 = vrot.slane %v676_v30, 4  ;;  %v680_v38 = vrot.slane %v678_v35, 4 }
  0x92   : > { %487 = vrot.lane.b32.xlu0 %v262_v29, %s8514_s6  ;;  %v682_v37 = vsel %vm681_vm3, %v679_v33, %v676_v30  ;;  %v308_v39 = vcombine.high %v300_v32, %v300_v32  ;;  %v683_v41 = vsel %vm255_vm1, %v679_v33, %v680_v38  ;;  %v482_v45 = vcombine.high %v262_v29, %v262_v29 }
  0x93   : > { %v688_v40 = vmul.f32 %v682_v37, %v224_v11  ;;  %v895_v43 = vpop.permute.xlu0 %894  ;;  %v897_v44 = vpop.permute.xlu1 %896  ;;  %v684_v47 = vsel %vm681_vm3, %v683_v41, %v678_v35  ;;  %v690_v56 = vmul.f32 %v680_v38, %v653_v52 }
  0x94   : > { %313 = vrot.lane.b32.xlu1 %v300_v32, %s8513_s5  ;;  %v898_v48 = vrot.slane %v895_v43, 4  ;;  %v899_v49 = vrot.slane %v897_v44, 4  ;;  %v689_v50 = vmul.f32 %v684_v47, %v225_v20 }
  0x95   : > { %v696_v46 = vcombine.high %v688_v40, %v688_v40 }
  0x96   : > { %311 = vrot.lane.b32.xlu0 %v307_v34, %s8513_s5  ;;  %v901_v51 = vsel %vm900_vm4, %v898_v48, %v895_v43  ;;  %v902_v53 = vsel %vm255_vm1, %v898_v48, %v899_v49  ;;  %v697_v59 = vcombine.high %v689_v50, %v689_v50  ;;  %v909_v14 = vmul.f32 %v899_v49, %v872_v8  ;;  %v1715_v49 = vld [vmem:[#allocation2 + $0x14] sm:$0xf] }
  0x97   : > { %v1304_v54 = vpop.permute.xlu0 %1303  ;;  %v907_v55 = vmul.f32 %v901_v51, %v224_v11  ;;  %v903_v57 = vsel %vm900_vm4, %v902_v53, %v897_v44  ;;  %v1306_v60 = vpop.permute.xlu1 %1305 }
  0x98   : > { %485 = vrot.lane.b32.xlu1 %v481_v36, %s8514_s6  ;;  %v1307_v58 = vrot.slane %v1304_v54, 4  ;;  %v908_v62 = vmul.f32 %v903_v57, %v225_v20  ;;  %v1308_v7 = vrot.slane %v1306_v60, 4  ;;  %v1498_v36 = vld [vmem:[#allocation2 + $0x14] sm:$0xf]  ;;  %v8515_v57 = vmov 0  }
  0x99   : > { %v915_v61 = vcombine.high %v907_v55, %v907_v55  ;;  %8487 = vset.pattern.permute.xlu0 %v8515_v57  ;;  %8488 = vset.pattern.permute.xlu1 %v8515_v57 }
  0x9a   : > { %315 = vrot.lane.b32.xlu0 %v308_v39, %s8513_s5  ;;  %v1309_v63 = vsel %vm927_vm5, %v1307_v58, %v1304_v54  ;;  %v916_v10 = vcombine.high %v908_v62, %v908_v62  ;;  %v1310_v13 = vsel %vm255_vm1, %v1307_v58, %v1308_v7  ;;  %v1317_v26 = vmul.f32 %v1308_v7, %v1281_v22  ;;  %v1932_v58 = vld [vmem:[#allocation2 + $0x14] sm:$0xf] }
  0x9b   : > { %v1315_v9 = vmul.f32 %v1309_v63, %v8601_v27  ;;  %v1521_v11 = vpop.permute.xlu0 %1520  ;;  %v1523_v12 = vpop.permute.xlu1 %1522  ;;  %v1311_v18 = vsel %vm927_vm5, %v1310_v13, %v1306_v60 }
  0x9c   : > { %483 = vrot.lane.b32.xlu1 %v261_v31, %s8514_s6  ;;  %v1524_v15 = vrot.slane %v1521_v11, 4  ;;  %v1525_v16 = vrot.slane %v1523_v12, 4  ;;  %v1316_v20 = vmul.f32 %v1311_v18, %v8603_v28  ;;  %v8146_v18 = vld [vmem:[%s8577_s20 + $0x3] ss:$8 sm:$0xf] }
  0x9d   : > { %v1323_v17 = vcombine.high %v1315_v9, %v1315_v9 }
  0x9e   : > { %491 = vrot.lane.b32.xlu0 %v263_v42, %s8514_s6  ;;  %v1527_v19 = vsel %vm255_vm1, %v1524_v15, %v1525_v16  ;;  %v1526_v21 = vsel %vm708_vm6, %v1524_v15, %v1521_v11  ;;  %v1324_v35 = vcombine.high %v1316_v20, %v1316_v20  ;;  %v1534_v39 = vmul.f32 %v1525_v16, %v1498_v36  ;;  %v8138_v11 = vld [vmem:[%s8577_s20 + $0x2] ss:$8 sm:$0xf] }
  0x9f   : > { %v1738_v23 = vpop.permute.xlu0 %1737  ;;  %v1528_v24 = vsel %vm708_vm6, %v1527_v19, %v1523_v12  ;;  %v1532_v25 = vmul.f32 %v1526_v21, %v8601_v27  ;;  %v1740_v31 = vpop.permute.xlu1 %1739  ;;  %v2598_v16 = vrot.slane %v8138_v11, %v8561_v3  ;;  %v2821_v36 = vrot.slane %v8146_v18, %v8567_v5 }
  0xa0   : > { %489 = vrot.lane.b32.xlu1 %v482_v45, %s8514_s6  ;;  %v1741_v29 = vrot.slane %v1738_v23, 4  ;;  %v1533_v30 = vmul.f32 %v1528_v24, %v8603_v28  ;;  %v1742_v34 = vrot.slane %v1740_v31, 4  ;;  %v2817_v24 = vrot.slane %v8146_v18, %v8564_v4 }
  0xa1   : > { %v1540_v32 = vcombine.high %v1532_v25, %v1532_v25 }
  0xa2   : > { %700 = vrot.lane.b32.xlu0 %v696_v46, %s8512_s30  ;;  %v1743_v33 = vsel %vm319_vm7, %v1741_v29, %v1738_v23  ;;  %v1744_v38 = vsel %vm255_vm1, %v1741_v29, %v1742_v34  ;;  %v1541_v42 = vcombine.high %v1533_v30, %v1533_v30  ;;  %v1751_v52 = vmul.f32 %v1742_v34, %v1715_v49  ;;  %v8170_v34 = vld [vmem:[%s8577_s20 + $0x6] ss:$8 sm:$0xf] }
  0xa3   : > { %v1749_v37 = vmul.f32 %v1743_v33, %v8601_v27  ;;  %v1957_v41 = vpop.permute.xlu1 %1956  ;;  %v1745_v44 = vsel %vm319_vm7, %v1744_v38, %v1740_v31  ;;  %v2813_v23 = vrot.slane %v8146_v18, %v8561_v3  ;;  %v2606_v29 = vrot.slane %v8138_v11, %v8567_v5 }
  0xa4   : > { %702 = vrot.lane.b32.xlu1 %v689_v50, %s8512_s30  ;;  %v1959_v46 = vrot.slane %v1957_v41, 4  ;;  %v1750_v47 = vmul.f32 %v1745_v44, %v8603_v28 }
  0xa5   : > { %v1757_v43 = vcombine.high %v1749_v37, %v1749_v37  ;;  %v2826_v31 = vcombine.low %v2813_v23, %v2817_v24 }
  0xa6   : > { %698 = vrot.lane.b32.xlu0 %v688_v40, %s8512_s30  ;;  %v1955_v40 = vpop.permute.xlu0 %1954  ;;  %v1758_v54 = vcombine.high %v1750_v47, %v1750_v47 }
  0xa7   : > { %v1958_v45 = vrot.slane %v1955_v40, 4 }
  0xa8   : > { %706 = vrot.lane.b32.xlu1 %v690_v56, %s8512_s30 }
  0xa9   : > { %v1960_v48 = vsel %vm493_vm8, %v1958_v45, %v1955_v40  ;;  %v1961_v50 = vsel %vm255_vm1, %v1958_v45, %v1959_v46  ;;  %v3435_v40 = vrot.slane %v8170_v34, %v8564_v4 }
  0xaa   : > { %704 = vrot.lane.b32.xlu0 %v697_v59, %s8512_s30  ;;  %v1966_v51 = vmul.f32 %v1960_v48, %v8601_v27  ;;  %v1962_v53 = vsel %vm493_vm8, %v1961_v50, %v1957_v41  ;;  %v8124_v59 = vld [vmem:[%s8577_s20 + $0x1] ss:$8 sm:$0xf]  ;;  %v8178_v41 = vld [vmem:[%s8577_s20 + $0x7] ss:$8 sm:$0xf]  ;;  %v3439_v50 = vrot.slane %v8170_v34, %v8567_v5 }
  0xab   : > { %v1967_v56 = vmul.f32 %v1962_v53, %v8603_v28  ;;  %v2215_v63 = vrot.slane %v8124_v59, %v8561_v3  ;;  %v2219_v7 = vrot.slane %v8124_v59, %v8564_v4  ;;  %v2223_v13 = vrot.slane %v8124_v59, %v8567_v5  ;;  %v8186_v48 = vld [vmem:[%s8577_s20 + $0x20] ss:$8 sm:$0xf] }
  0xac   : > { %919 = vrot.lane.b32.xlu1 %v915_v61, %s8511_s29  ;;  %v2174_v61 = vld [vmem:[%s8577_s20] ss:$8 sm:$0xf]  ;;  %v3861_v53 = vrot.slane %v8186_v48, %v8561_v3  ;;  %v3658_v57 = vrot.slane %v8178_v41, %v8570_v6 }
  0xad   : > { %v1975_v60 = vcombine.high %v1967_v56, %v1967_v56  ;;  %v2179_v8 = vrot.slane %v2174_v61, %v8561_v3  ;;  %v2228_v12 = vcombine.low %v2215_v63, %v2219_v7  ;;  %v2191_v21 = vrot.slane %v2174_v61, %v8570_v6 }
  0xae   : > { %921 = vrot.lane.b32.xlu0 %v908_v62, %s8511_s29  ;;  %v1968_v62 = vmul.f32 %v1959_v46, %v1932_v58  ;;  %v3646_v46 = vrot.slane %v8178_v41, %v8561_v3 }
  0xb0   : > { %923 = vrot.lane.b32.xlu1 %v916_v10, %s8511_s29  ;;  %v2147_v10 = vld [vmem:[%s9828_s3] sm:$0xf] }
  0xb2   : > { %925 = vrot.lane.b32.xlu0 %v909_v14, %s8511_s29  ;;  %v2227_v14 = vrot.slane %v8124_v59, %v8570_v6 }
  0xb4   : > { %917 = vrot.lane.b32.xlu1 %v907_v55, %s8511_s29  ;;  %v1974_v55 = vcombine.high %v1966_v51, %v1966_v51  ;;  %v2229_v19 = vcombine.low %v2223_v13, %v2227_v14  ;;  %v8055_v13 = vld [vmem:[%s9827_s2 + $0x18] sm:$0xf] }
  0xb6   : > { %1327 = vrot.lane.b32.xlu0 %v1323_v17, %s8510_s28  ;;  %v2602_v17 = vrot.slane %v8138_v11, %v8564_v4 }
  0xb8   : > { %1329 = vrot.lane.b32.xlu1 %v1316_v20, %s8510_s28  ;;  %v2187_v20 = vrot.slane %v2174_v61, %v8567_v5  ;;  %v2611_v22 = vcombine.low %v2598_v16, %v2602_v17 }
  0xba   : > { %1325 = vrot.lane.b32.xlu0 %v1315_v9, %s8510_s28  ;;  %v2183_v9 = vrot.slane %v2174_v61, %v8564_v4  ;;  %v3873_v61 = vrot.slane %v8186_v48, %v8570_v6 }
  0xbc   : > { %1333 = vrot.lane.b32.xlu1 %v1317_v26, %s8510_s28  ;;  %v2192_v15 = vcombine.low %v2179_v8, %v2183_v9  ;;  %v2193_v26 = vcombine.low %v2187_v20, %v2191_v21 }
  0xbe   : > { %1546 = vrot.lane.b32.xlu0 %v1533_v30, %s8509_s27  ;;  %v2610_v30 = vrot.slane %v8138_v11, %v8570_v6 }
  0xc0   : > { %1544 = vrot.lane.b32.xlu1 %v1540_v32, %s8509_s27 }
  0xc2   : > { %1331 = vrot.lane.b32.xlu0 %v1324_v35, %s8510_s28  ;;  %v2612_v35 = vcombine.low %v2606_v29, %v2610_v30  ;;  %v8084_v30 = vld [vmem:[%s8577_s20 + $0x4] ss:$8 sm:$0xf] }
  0xc4   : > { %1542 = vrot.lane.b32.xlu1 %v1532_v25, %s8509_s27  ;;  %v8162_v25 = vld [vmem:[%s8577_s20 + $0x5] ss:$8 sm:$0xf] }
  0xc5   : > { %v3216_v32 = vrot.slane %v8162_v25, %v8561_v3  ;;  %v3220_v33 = vrot.slane %v8162_v25, %v8564_v4  ;;  %v3228_v44 = vrot.slane %v8162_v25, %v8570_v6 }
  0xc6   : > { %1550 = vrot.lane.b32.xlu0 %v1534_v39, %s8509_s27  ;;  %v3431_v39 = vrot.slane %v8170_v34, %v8561_v3 }
  0xc7   : > { %v3229_v38 = vcombine.low %v3216_v32, %v3220_v33 }
  0xc8   : > { %1548 = vrot.lane.b32.xlu1 %v1541_v42, %s8509_s27  ;;  %v3444_v45 = vcombine.low %v3431_v39, %v3435_v40  ;;  %v1109_v39 = vrot.slane %v8084_v30, %v8570_v6 }
  0xca   : > { %1761 = vrot.lane.b32.xlu0 %v1757_v43, %s8507_s25  ;;  %v3224_v43 = vrot.slane %v8162_v25, %v8567_v5 }
  0xcc   : > { %1763 = vrot.lane.b32.xlu1 %v1750_v47, %s8507_s25  ;;  %v3650_v47 = vrot.slane %v8178_v41, %v8564_v4  ;;  %v3230_v49 = vcombine.low %v3224_v43, %v3228_v44 }
  0xce   : > { %1759 = vrot.lane.b32.xlu0 %v1749_v37, %s8507_s25  ;;  %v2825_v37 = vrot.slane %v8146_v18, %v8570_v6 }
  0xd0   : > { %1767 = vrot.lane.b32.xlu1 %v1751_v52, %s8507_s25  ;;  %v2827_v42 = vcombine.low %v2821_v36, %v2825_v37  ;;  %v3659_v52 = vcombine.low %v3646_v46, %v3650_v47  ;;  %v1101_v36 = vrot.slane %v8084_v30, %v8564_v4 }
  0xd2   : > { %1765 = vrot.lane.b32.xlu0 %v1758_v54, %s8507_s25  ;;  %v3865_v54 = vrot.slane %v8186_v48, %v8564_v4 }
  0xd4   : > { %1978 = vrot.lane.b32.xlu1 %v1974_v55, %s8508_s26  ;;  %v3874_v58 = vcombine.low %v3861_v53, %v3865_v54  ;;  %v8077_v53 = vld [vmem:[%s9827_s2 + $0x48] sm:$0xf] }
  0xd6   : > { %1980 = vrot.lane.b32.xlu0 %v1967_v56, %s8508_s26  ;;  %v3654_v56 = vrot.slane %v8178_v41, %v8567_v5 }
  0xd8   : > { %1982 = vrot.lane.b32.xlu1 %v1975_v60, %s8508_s26  ;;  %v3660_v59 = vcombine.low %v3654_v56, %v3658_v57  ;;  %v3869_v60 = vrot.slane %v8186_v48, %v8567_v5 }
  0xda   : > { %1984 = vrot.lane.b32.xlu0 %v1968_v62, %s8508_s26  ;;  %v3875_v62 = vcombine.low %v3869_v60, %v3873_v61  ;;  %v8085_v61 = vld [vmem:[%s9827_s2 + $0x60] sm:$0xf] }
  0xdc   : > { %1976 = vrot.lane.b32.xlu1 %v1966_v51, %s8508_s26  ;;  %v3443_v51 = vrot.slane %v8170_v34, %v8570_v6  ;;  %v8069_v34 = vld [vmem:[%s9827_s2 + $0x30] sm:$0xf] }
  0xde   : > { %2150 = vperm.xlu0 %8487, %v2147_v10   ;;  %v3445_v55 = vcombine.low %v3439_v50, %v3443_v51 }
  0xe0   : > { %2230 = vrot.lane.b32.xlu1 %v2228_v12, %s8507_s25 }
  0xe2   : > { %2194 = vrot.lane.b32.xlu0 %v2192_v15, %s8508_s26 }
  0xe4   : > { %2232 = vrot.lane.b32.xlu1 %v2229_v19, %s8507_s25 }
  0xe6   : > { %2613 = vrot.lane.b32.xlu0 %v2611_v22, %s8509_s27  ;;  %v264_v22 = vld [vmem:[%s9827_s2] sm:$0xf] }
  0xe8   : > { %2196 = vrot.lane.b32.xlu1 %v2193_v26, %s8508_s26 }
  0xea   : > { %2828 = vrot.lane.b32.xlu0 %v2826_v31, %s8510_s28 }
  0xec   : > { %2615 = vrot.lane.b32.xlu1 %v2612_v35, %s8509_s27  ;;  %v1097_v35 = vrot.slane %v8084_v30, %v8561_v3 }
  0xee   : > { %3231 = vrot.lane.b32.xlu0 %v3229_v38, %s8511_s29  ;;  %v1105_v38 = vrot.slane %v8084_v30, %v8567_v5  ;;  %v1110_v43 = vcombine.low %v1097_v35, %v1101_v36 }
  0xf0   : > { %2830 = vrot.lane.b32.xlu1 %v2827_v42, %s8510_s28  ;;  %v1114_v48 = vmul.f32 %v1110_v43, %v8601_v27 }
  0xf2   : > { %3446 = vrot.lane.b32.xlu0 %v3444_v45, %s8512_s30  ;;  %v1111_v45 = vcombine.low %v1105_v38, %v1109_v39  ;;  %v1120_v54 = vcombine.high %v1114_v48, %v1114_v48  ;;  %v8117_v39 = vld [vmem:[%s9827_s2 + $0xc0] sm:$0xf] }
  0xf4   : > { %3233 = vrot.lane.b32.xlu1 %v3230_v49, %s8511_s29  ;;  %v1115_v50 = vmul.f32 %v1111_v45, %v8603_v28 }
  0xf6   : > { %3661 = vrot.lane.b32.xlu0 %v3659_v52, %s8513_s5  ;;  %v1121_v57 = vcombine.high %v1115_v50, %v1115_v50 }
  0xf8   : > { %3448 = vrot.lane.b32.xlu1 %v3445_v55, %s8512_s30 }
  0xfa   : > { %3876 = vrot.lane.b32.xlu0 %v3874_v58, %s8514_s6 }
  0xfc   : > { %3663 = vrot.lane.b32.xlu1 %v3660_v59, %s8513_s5 }
  0xff   : > { %v310_v63 = vpop.permute.xlu0 %309 }
 0x100   : > { %3878 = vrot.lane.b32.xlu1 %v3875_v62, %s8514_s6 }
 0x102   : > { %v318_v7 = vpop.permute.xlu1 %317 }
 0x104   : > { %v488_v8 = vpop.permute.xlu0 %487 }
 0x106   : > { %v314_v9 = vpop.permute.xlu1 %313 }
 0x108   : > { %v312_v10 = vpop.permute.xlu0 %311 }
 0x109   : > { %v321_v11 = vsel %vm319_vm7, %v312_v10, %v314_v9  ;;  %v320_v12 = vsel %vm319_vm7, %v310_v63, %v312_v10 }
 0x10a   : > { %8056 = vmatprep.subr.msk.mxu0 %vm255_vm1, %v321_v11  ;;  %v486_v14 = vpop.permute.xlu1 %485 }
 0x10b   : > { %8057 = vmatpush1.msk.msra.mxu0 %vm255_vm1, %v320_v12  ;;  %v495_v15 = vsel %vm493_vm8, %v486_v14, %v488_v8 }
 0x10c   : > { %v316_v16 = vpop.permute.xlu0 %315  ;;  %8062 = vmatprep.subr.msk.mxu0 %vm255_vm1, %v495_v15  ;;  %8058 = vmatmul.mubr.msk.f32.vlgmr.msra.gmra.mrb[0].mxu0 %vm324_vm9, %v8055_v13 }
 0x10d   : > { %v323_v17 = vsel %vm319_vm7, %v316_v16, %v318_v7  ;;  %v322_v18 = vsel %vm319_vm7, %v314_v9, %v316_v16  ;;  %573 = vmatprep.mubr.f32.mxu0 %v8506_v1 }
 0x10e   : > { %8059 = vmatprep.subr.msk.mxu1 %vm255_vm1, %v323_v17  ;;  %v484_v19 = vpop.permute.xlu1 %483 }
 0x10f   : > { %v494_v20 = vsel %vm493_vm8, %v484_v19, %v486_v14  ;;  %8060 = vmatpush1.msk.msra.mxu1 %vm255_vm1, %v322_v18 }
 0x110   : > { %8061 = vmatmul.mubr.msk.f32.vlgmr.msra.gmra.mrb[0].mxu1 %vm324_vm9, %v8055_v13  ;;  %v492_v21 = vpop.permute.xlu0 %491  ;;  %8063 = vmatpush1.msk.msra.mxu0 %vm255_vm1, %v494_v20  ;;  %v8093_v13 = vld [vmem:[%s9827_s2 + $0x78] sm:$0xf] }
 0x111   : > { %644 = vmatprep.mubr.f32.mxu1 %v8506_v1 }
 0x112   : > { %v490_v23 = vpop.permute.xlu1 %489 }
 0x113   : > { %v496_v24 = vsel %vm493_vm8, %v488_v8, %v490_v23  ;;  %v497_v25 = vsel %vm493_vm8, %v490_v23, %v492_v21  ;;  %v8101_v21 = vld [vmem:[%s9827_s2 + $0x90] sm:$0xf] }
 0x114   : > { %v701_v26 = vpop.permute.xlu0 %700  ;;  %8065 = vmatprep.subr.msk.mxu1 %vm255_vm1, %v497_v25  ;;  %8064 = vmatmul.mubr.msk.f32.vlgmr.msra.gmra.mrb[0].mxu0 %vm324_vm9, %v264_v22 }
 0x115   : > { %8066 = vmatpush1.msk.msra.mxu1 %vm255_vm1, %v496_v24  ;;  %788 = vmatprep.mubr.f32.mxu0 %v8506_v1 }
 0x116   : > { %v703_v29 = vpop.permute.xlu1 %702 }
 0x117   : > { %v710_v31 = vsel %vm708_vm6, %v701_v26, %v703_v29 }
 0x118   : > { %v699_v32 = vpop.permute.xlu0 %698  ;;  %8067 = vmatmul.mubr.msk.f32.vlgmr.msra.gmra.mrb[0].mxu1 %vm324_vm9, %v264_v22  ;;  %8070 = vmatprep.subr.msk.mxu0 %vm255_vm1, %v710_v31 }
 0x119   : > { %v709_v33 = vsel %vm708_vm6, %v699_v32, %v701_v26  ;;  %859 = vmatprep.mubr.f32.mxu1 %v8506_v1  ;;  %v8109_v32 = vld [vmem:[%s9827_s2 + $0xa8] sm:$0xf] }
 0x11a   : > { %8071 = vmatpush1.msk.msra.mxu0 %vm255_vm1, %v709_v33  ;;  %v707_v37 = vpop.permute.xlu1 %706 }
 0x11c   : > { %v705_v40 = vpop.permute.xlu0 %704  ;;  %8072 = vmatmul.mubr.msk.f32.vlgmr.msra.gmra.mrb[0].mxu0 %vm324_vm9, %v8069_v34 }
 0x11d   : > { %v711_v41 = vsel %vm708_vm6, %v703_v29, %v705_v40  ;;  %v712_v42 = vsel %vm708_vm6, %v705_v40, %v707_v37  ;;  %1007 = vmatprep.mubr.f32.mxu0 %v8506_v1 }
 0x11e   : > { %8073 = vmatprep.subr.msk.mxu1 %vm255_vm1, %v712_v42  ;;  %v920_v44 = vpop.permute.xlu1 %919 }
 0x11f   : > { %8074 = vmatpush1.msk.msra.mxu1 %vm255_vm1, %v711_v41 }
 0x120   : > { %v922_v46 = vpop.permute.xlu0 %921  ;;  %8075 = vmatmul.mubr.msk.f32.vlgmr.msra.gmra.mrb[0].mxu1 %vm324_vm9, %v8069_v34 }
 0x121   : > { %v929_v47 = vsel %vm927_vm5, %v920_v44, %v922_v46  ;;  %1078 = vmatprep.mubr.f32.mxu1 %v8506_v1 }
 0x122   : > { %8078 = vmatprep.subr.msk.mxu0 %vm255_vm1, %v929_v47  ;;  %v924_v49 = vpop.permute.xlu1 %923 }
 0x123   : > { %v930_v55 = vsel %vm927_vm5, %v922_v46, %v924_v49 }
 0x124   : > { %v926_v51 = vpop.permute.xlu0 %925 }
 0x125   : > { %v931_v52 = vsel %vm927_vm5, %v924_v49, %v926_v51 }
 0x126   : > { %8081 = vmatprep.subr.msk.mxu1 %vm255_vm1, %v931_v52  ;;  %v918_v56 = vpop.permute.xlu1 %917 }
 0x127   : > { %v928_v27 = vsel %vm927_vm5, %v918_v56, %v920_v44  ;;  %8082 = vmatpush1.msk.msra.mxu1 %vm255_vm1, %v930_v55 }
 0x128   : > { %v1328_v58 = vpop.permute.xlu0 %1327  ;;  %8079 = vmatpush1.msk.msra.mxu0 %vm255_vm1, %v928_v27  ;;  %8083 = vmatmul.mubr.msk.f32.vlgmr.msra.gmra.mrb[0].mxu1 %vm324_vm9, %v8077_v53 }
 0x129   : > { %8080 = vmatmul.mubr.msk.f32.vlgmr.msra.gmra.mrb[0].mxu0 %vm324_vm9, %v8077_v53  ;;  %8086 = vmatprep.subr.msk.mxu0 %vm255_vm1, %v1120_v54 }
 0x12a   : > { %v1330_v28 = vpop.permute.xlu1 %1329  ;;  %8087 = vmatpush1.msk.msra.mxu0 %vm255_vm1, %v1114_v48  ;;  %8089 = vmatprep.subr.msk.mxu1 %vm255_vm1, %v1121_v57 }
 0x12b   : > { %v1336_v59 = vsel %vm900_vm4, %v1328_v58, %v1330_v28  ;;  %8090 = vmatpush1.msk.msra.mxu1 %vm255_vm1, %v1115_v50  ;;  %1268 = vmatprep.mubr.f32.mxu1 %v8506_v1 }
 0x12c   : > { %v1326_v60 = vpop.permute.xlu0 %1325  ;;  %8094 = vmatprep.subr.msk.mxu0 %vm255_vm1, %v1336_v59  ;;  %1197 = vmatprep.mubr.f32.mxu0 %v8506_v1 }
 0x12d   : > { %v1335_v7 = vsel %vm900_vm4, %v1326_v60, %v1328_v58 }
 0x12e   : > { %v1334_v62 = vpop.permute.xlu1 %1333 }
 0x130   : > { %v1547_v63 = vpop.permute.xlu0 %1546  ;;  %8091 = vmatmul.mubr.msk.f32.vlgmr.msra.gmra.mrb[0].mxu1 %vm324_vm9, %v8085_v61 }
 0x131   : > { %8088 = vmatmul.mubr.msk.f32.vlgmr.msra.gmra.mrb[0].mxu0 %vm324_vm9, %v8085_v61  ;;  %1485 = vmatprep.mubr.f32.mxu1 %v8506_v1 }
 0x132   : > { %8095 = vmatpush1.msk.msra.mxu0 %vm255_vm1, %v1335_v7  ;;  %v1545_v8 = vpop.permute.xlu1 %1544  ;;  %1414 = vmatprep.mubr.f32.mxu0 %v8506_v1 }
 0x133   : > { %v1553_v9 = vsel %vm681_vm3, %v1545_v8, %v1547_v63 }
 0x134   : > { %v1332_v10 = vpop.permute.xlu0 %1331  ;;  %8102 = vmatprep.subr.msk.mxu0 %vm255_vm1, %v1553_v9 }
 0x135   : > { %v1337_v11 = vsel %vm900_vm4, %v1330_v28, %v1332_v10  ;;  %v1338_v12 = vsel %vm900_vm4, %v1332_v10, %v1334_v62 }
 0x136   : > { %8097 = vmatprep.subr.msk.mxu1 %vm255_vm1, %v1338_v12  ;;  %v1543_v14 = vpop.permute.xlu1 %1542 }
 0x137   : > { %v1552_v15 = vsel %vm681_vm3, %v1543_v14, %v1545_v8  ;;  %8098 = vmatpush1.msk.msra.mxu1 %vm255_vm1, %v1337_v11 }
 0x138   : > { %v1551_v16 = vpop.permute.xlu0 %1550  ;;  %8099 = vmatmul.mubr.msk.f32.vlgmr.msra.gmra.mrb[0].mxu1 %vm324_vm9, %v8093_v13 }
 0x139   : > { %8096 = vmatmul.mubr.msk.f32.vlgmr.msra.gmra.mrb[0].mxu0 %vm324_vm9, %v8093_v13  ;;  %1702 = vmatprep.mubr.f32.mxu1 %v8506_v1 }
 0x13a   : > { %8103 = vmatpush1.msk.msra.mxu0 %vm255_vm1, %v1552_v15  ;;  %v1549_v17 = vpop.permute.xlu1 %1548  ;;  %1631 = vmatprep.mubr.f32.mxu0 %v8506_v1 }
 0x13b   : > { %v1554_v18 = vsel %vm681_vm3, %v1547_v63, %v1549_v17  ;;  %v1555_v19 = vsel %vm681_vm3, %v1549_v17, %v1551_v16 }
 0x13c   : > { %v1762_v20 = vpop.permute.xlu0 %1761  ;;  %8105 = vmatprep.subr.msk.mxu1 %vm255_vm1, %v1555_v19 }
 0x13d   : > { %8106 = vmatpush1.msk.msra.mxu1 %vm255_vm1, %v1554_v18 }
 0x13e   : > { %v1764_v22 = vpop.permute.xlu1 %1763 }
 0x13f   : > { %v1770_v23 = vsel %vm292_vm0, %v1762_v20, %v1764_v22 }
 0x140   : > { %v1760_v24 = vpop.permute.xlu0 %1759  ;;  %8107 = vmatmul.mubr.msk.f32.vlgmr.msra.gmra.mrb[0].mxu1 %vm324_vm9, %v8101_v21  ;;  %8110 = vmatprep.subr.msk.mxu0 %vm255_vm1, %v1770_v23 }
 0x141   : > { %v1769_v25 = vsel %vm292_vm0, %v1760_v24, %v1762_v20  ;;  %8104 = vmatmul.mubr.msk.f32.vlgmr.msra.gmra.mrb[0].mxu0 %vm324_vm9, %v8101_v21  ;;  %1919 = vmatprep.mubr.f32.mxu1 %v8506_v1 }
 0x142   : > { %8111 = vmatpush1.msk.msra.mxu0 %vm255_vm1, %v1769_v25  ;;  %v1768_v26 = vpop.permute.xlu1 %1767  ;;  %1848 = vmatprep.mubr.f32.mxu0 %v8506_v1 }
 0x144   : > { %v1766_v29 = vpop.permute.xlu0 %1765 }
 0x145   : > { %v1771_v30 = vsel %vm292_vm0, %v1764_v22, %v1766_v29  ;;  %v1772_v31 = vsel %vm292_vm0, %v1766_v29, %v1768_v26 }
 0x146   : > { %8113 = vmatprep.subr.msk.mxu1 %vm255_vm1, %v1772_v31  ;;  %v1979_v33 = vpop.permute.xlu1 %1978 }
 0x147   : > { %8114 = vmatpush1.msk.msra.mxu1 %vm255_vm1, %v1771_v30 }
 0x148   : > { %v1981_v34 = vpop.permute.xlu0 %1980  ;;  %8115 = vmatmul.mubr.msk.f32.vlgmr.msra.gmra.mrb[0].mxu1 %vm324_vm9, %v8109_v32 }
 0x149   : > { %8112 = vmatmul.mubr.msk.f32.vlgmr.msra.gmra.mrb[0].mxu0 %vm324_vm9, %v8109_v32  ;;  %v1987_v35 = vsel %vm253_vm2, %v1979_v33, %v1981_v34  ;;  %2136 = vmatprep.mubr.f32.mxu1 %v8506_v1 }
 0x14a   : > { %8118 = vmatprep.subr.msk.mxu0 %vm255_vm1, %v1987_v35  ;;  %v1983_v36 = vpop.permute.xlu1 %1982  ;;  %2065 = vmatprep.mubr.f32.mxu0 %v8506_v1 }
 0x14b   : > { %v1988_v40 = vsel %vm253_vm2, %v1981_v34, %v1983_v36 }
 0x14c   : > { %v1985_v37 = vpop.permute.xlu0 %1984 }
 0x14d   : > { %v1989_v38 = vsel %vm253_vm2, %v1983_v36, %v1985_v37 }
 0x14e   : > { %8121 = vmatprep.subr.msk.mxu1 %vm255_vm1, %v1989_v38  ;;  %v1977_v41 = vpop.permute.xlu1 %1976 }
 0x14f   : > { %v1986_v42 = vsel %vm253_vm2, %v1977_v41, %v1979_v33  ;;  %8122 = vmatpush1.msk.msra.mxu1 %vm255_vm1, %v1988_v40 }
 0x150   : > { %8119 = vmatpush1.msk.msra.mxu0 %vm255_vm1, %v1986_v42  ;;  %8123 = vmatmul.mubr.msk.f32.vlgmr.msra.gmra.mrb[0].mxu1 %vm324_vm9, %v8117_v39 }
 0x151   : > { %8120 = vmatmul.mubr.msk.f32.vlgmr.msra.gmra.mrb[0].mxu0 %vm324_vm9, %v8117_v39  ;;  %2411 = vmatprep.mubr.f32.mxu1 %v8506_v1 }
 0x152   : > { %2340 = vmatprep.mubr.f32.mxu0 %v8506_v1  ;;  %v2231_v43 = vpop.permute.xlu1 %2230 }
 0x153   : > { %v2234_v61 = vrot.slane %v2231_v43, 4 }
 0x155   : > { %v2236_v9 = vsel %vm292_vm0, %v2234_v61, %v2231_v43 }
 0x156   : > { %v2233_v54 = vpop.permute.xlu1 %2232 }
 0x157   : > { %v2235_v28 = vrot.slane %v2233_v54, 4 }
 0x159   : > { %v2237_v7 = vsel %vm255_vm1, %v2234_v61, %v2235_v28 }
 0x15a   : > { %v2197_v60 = vpop.permute.xlu1 %2196  ;;  %v2238_v10 = vsel %vm292_vm0, %v2237_v7, %v2233_v54 }
 0x15b   : > { %v2199_v63 = vrot.slane %v2197_v60, 4 }
 0x15d   : > { %v2151_v44 = vpop.permute.xlu0 %2150 }
 0x15e   : > { %v2616_v25 = vpop.permute.xlu1 %2615 }
 0x15f   : > { %v2618_v26 = vrot.slane %v2616_v25, 4 }
 0x161   : > { %v2195_v59 = vpop.permute.xlu0 %2194 }
 0x162   : > { %v2198_v62 = vrot.slane %v2195_v59, 4  ;;  %v2831_v38 = vpop.permute.xlu1 %2830 }
 0x163   : > { %v2833_v39 = vrot.slane %v2831_v38, 4 }
 0x164   : > { %v2201_v8 = vsel %vm255_vm1, %v2198_v62, %v2199_v63  ;;  %v2200_v15 = vsel %vm253_vm2, %v2198_v62, %v2195_v59 }
 0x165   : > { %v2202_v16 = vsel %vm253_vm2, %v2201_v8, %v2197_v60  ;;  %v2614_v21 = vpop.permute.xlu0 %2613 }
 0x166   : > { %v2617_v24 = vrot.slane %v2614_v21, 4 }
 0x168   : > { %v2619_v30 = vsel %vm681_vm3, %v2617_v24, %v2614_v21  ;;  %v2620_v31 = vsel %vm255_vm1, %v2617_v24, %v2618_v26  ;;  %v3425_v24 = vld [vmem:[#allocation2 + $0x14] sm:$0xf] }
 0x169   : > { %v2829_v32 = vpop.permute.xlu0 %2828  ;;  %v2621_v36 = vsel %vm681_vm3, %v2620_v31, %v2616_v25 }
 0x16a   : > { %v2832_v37 = vrot.slane %v2829_v32, 4 }
 0x16c   : > { %v2834_v42 = vsel %vm900_vm4, %v2832_v37, %v2829_v32 }
 0x223   : > { %v2138_v45 = vpop.f32.mrb[0].mxu1 }
 0x224   : > { %v2155_v46 = vadd.f32 %v2151_v44, %v2138_v45  ;;  %v2067_v47 = vpop.f32.mrb[0].mxu0  ;;  %v2140_v48 = vpop.f32.mrb[1].mxu1 }
 0x225   : > { %v2153_v49 = vadd.f32 %v2151_v44, %v2067_v47  ;;  %v2156_v50 = vadd.f32 %v2151_v44, %v2140_v48  ;;  %v2069_v51 = vpop.f32.mrb[1].mxu0 }
 0x226   : > { %v2159_v52 = vmax.f32 %v2155_v46, 0.0  ;;  %v2154_v53 = vadd.f32 %v2151_v44, %v2069_v51  ;;  %v2835_v44 = vsel %vm255_vm1, %v2832_v37, %v2833_v39  ;;  %v3232_v51 = vpop.permute.xlu0 %3231 }
 0x227   : > { %v2157_v55 = vmax.f32 %v2153_v49, 0.0  ;;  %v2160_v56 = vmax.f32 %v2156_v50, 0.0  ;;  %v2836_v47 = vsel %vm900_vm4, %v2835_v44, %v2831_v38 }
 0x228   : > { %v2158_v57 = vmax.f32 %v2154_v53, 0.0  ;;  %v3235_v53 = vrot.slane %v3232_v51, 4 }
 0x229   : > { %v8914_v27 = vcombine.low %v2159_v52, %v2160_v56  ;;  %v3234_v52 = vpop.permute.xlu1 %3233 }
 0x22a   : > { %v8916_v58 = vcombine.low %v2157_v55, %v2158_v57  ;;  %v3236_v54 = vrot.slane %v3234_v52, 4  ;;  %v3237_v56 = vsel %vm927_vm5, %v3235_v53, %v3232_v51  ;;  %v3447_v62 = vpop.permute.xlu0 %3446 }
 0x22b   : > { %2170 = vst [vmem:[#allocation2 + $0xc] sm:$0xff] %v8914_v27  ;;  %v3450_v7 = vrot.slane %v3447_v62, 4 }
 0x22c   : > { %2169 = vst [vmem:[#allocation2 + $0x4] sm:$0xff] %v8916_v58  ;;  %v3243_v60 = vmul.f32 %v3237_v56, %v8916_v58 }
 0x232   : > { %v2173_v17 = vld [vmem:[#allocation2 + $0x10] sm:$0xf] }
 0x233   : > { %v2171_v11 = vld [vmem:[#allocation2] sm:$0xff]  ;;  %v2172_v12 = vld [vmem:[#allocation2 + $0x8] sm:$0xff]  ;;  %v2244_v18 = vmul.f32 %v2235_v28, %v2173_v17  ;;  %v2208_v33 = vmul.f32 %v2199_v63, %v2173_v17  ;;  %v2592_v43 = vld [vmem:[#allocation2 + $0x10] sm:$0xf]  ;;  %v3238_v28 = vsel %vm255_vm1, %v3235_v53, %v3236_v54  ;;  %v3449_v63 = vpop.permute.xlu1 %3448 }
 0x234   : > { %v2242_v13 = vmul.f32 %v2236_v9, %v2171_v11  ;;  %v2243_v14 = vmul.f32 %v2238_v10, %v2172_v12  ;;  %v2207_v19 = vmul.f32 %v2202_v16, %v2172_v12  ;;  %v2206_v20 = vmul.f32 %v2200_v15, %v2171_v11  ;;  %v2807_v57 = vld [vmem:[#allocation2 + $0x10] sm:$0xf] }
 0x235   : > { %v2625_v35 = vmul.f32 %v2619_v30, %v2171_v11  ;;  %v2626_v41 = vmul.f32 %v2621_v36, %v2172_v12  ;;  %v2627_v45 = vmul.f32 %v2618_v26, %v2592_v43  ;;  %v2840_v46 = vmul.f32 %v2834_v42, %v2171_v11 }
 0x236   : > { %2251 = vrot.lane.b32.xlu0 %v2242_v13, %s8513_s5  ;;  %2255 = vrot.lane.b32.xlu1 %v2243_v14, %s8513_s5  ;;  %v2421_v22 = vcombine.high %v2206_v20, %v2206_v20  ;;  %v2249_v23 = vcombine.high %v2242_v13, %v2242_v13  ;;  %v2250_v29 = vcombine.high %v2243_v14, %v2243_v14  ;;  %v3451_v8 = vrot.slane %v3449_v63, 4 }
 0x237   : > { %v2422_v34 = vcombine.high %v2207_v19, %v2207_v19  ;;  %v2632_v40 = vcombine.high %v2625_v35, %v2625_v35  ;;  %v2847_v48 = vcombine.high %v2840_v46, %v2840_v46  ;;  %v2633_v49 = vcombine.high %v2626_v41, %v2626_v41 }
 0x238   : > { %v2841_v50 = vmul.f32 %v2836_v47, %v2172_v12  ;;  %v2842_v59 = vmul.f32 %v2833_v39, %v2807_v57  ;;  %v3239_v61 = vsel %vm927_vm5, %v3238_v28, %v3234_v52  ;;  %v3250_v9 = vcombine.high %v3243_v60, %v3243_v60  ;;  %v3210_v12 = vld [vmem:[#allocation2 + $0x14] sm:$0xf] }
 0x239   : > { %v3244_v10 = vmul.f32 %v3239_v61, %v8914_v27  ;;  %v3452_v11 = vsel %vm708_vm6, %v3450_v7, %v3447_v62  ;;  %v3453_v13 = vsel %vm255_vm1, %v3450_v7, %v3451_v8  ;;  %v3245_v15 = vmul.f32 %v3236_v54, %v3210_v12  ;;  %v3640_v39 = vld [vmem:[#allocation2 + $0x14] sm:$0xf]  ;;  %v4068_v54 = vld [vmem:[%s9828_s3 + $0x4] sm:$0xff] }
 0x23a   : > { %2259 = vrot.lane.b32.xlu1 %v2244_v18, %s8513_s5  ;;  %2427 = vrot.lane.b32.xlu0 %v2207_v19, %s8514_s6  ;;  %v2848_v55 = vcombine.high %v2841_v50, %v2841_v50  ;;  %v3458_v14 = vmul.f32 %v3452_v11, %v8916_v58  ;;  %v3454_v16 = vsel %vm708_vm6, %v3453_v13, %v3449_v63  ;;  %v3662_v19 = vpop.permute.xlu0 %3661  ;;  %v8208_v63 = vld [vmem:[%s8577_s20 + $0x2] ss:$8 sm:$0xf] }
 0x23b   : > { %v3459_v18 = vmul.f32 %v3454_v16, %v8914_v27  ;;  %v3665_v21 = vrot.slane %v3662_v19, 4  ;;  %v3460_v31 = vmul.f32 %v3451_v8, %v3425_v24  ;;  %v4527_v12 = vrot.slane %v8208_v63, %v8567_v5 }
 0x23c   : > { %v3465_v17 = vcombine.high %v3458_v14, %v3458_v14  ;;  %v4531_v13 = vrot.slane %v8208_v63, %v8570_v6 }
 0x23d   : > { %v3667_v25 = vsel %vm319_vm7, %v3665_v21, %v3662_v19 }
 0x23e   : > { %2425 = vrot.lane.b32.xlu1 %v2421_v22, %s8514_s6  ;;  %2253 = vrot.lane.b32.xlu0 %v2249_v23, %s8513_s5  ;;  %v3251_v23 = vcombine.high %v3244_v10, %v3244_v10  ;;  %v3673_v32 = vmul.f32 %v3667_v25, %v8916_v58 }
 0x240   : > { %v3680_v37 = vcombine.high %v3673_v32, %v3673_v32 }
 0x242   : > { %2423 = vrot.lane.b32.xlu1 %v2206_v20, %s8514_s6  ;;  %2257 = vrot.lane.b32.xlu0 %v2250_v29, %s8513_s5  ;;  %v3664_v20 = vpop.permute.xlu1 %3663  ;;  %v3877_v29 = vpop.permute.xlu0 %3876 }
 0x243   : > { %v3666_v22 = vrot.slane %v3664_v20, 4 }
 0x245   : > { %v3668_v26 = vsel %vm255_vm1, %v3665_v21, %v3666_v22  ;;  %v3675_v42 = vmul.f32 %v3666_v22, %v3640_v39  ;;  %v8232_v21 = vld [vmem:[%s8577_s20 + $0x5] ss:$8 sm:$0xf] }
 0x246   : > { %2431 = vrot.lane.b32.xlu0 %v2208_v33, %s8514_s6  ;;  %2429 = vrot.lane.b32.xlu1 %v2422_v34, %s8514_s6  ;;  %v3879_v30 = vpop.permute.xlu1 %3878  ;;  %v3466_v33 = vcombine.high %v3459_v18, %v3459_v18  ;;  %v3669_v34 = vsel %vm319_vm7, %v3668_v26, %v3664_v20  ;;  %v5141_v24 = vrot.slane %v8232_v21, %v8564_v4 }
 0x247   : > { %v3881_v36 = vrot.slane %v3879_v30, 4  ;;  %v3674_v38 = vmul.f32 %v3669_v34, %v8914_v27  ;;  %v5145_v26 = vrot.slane %v8232_v21, %v8567_v5 }
 0x24a   : > { %2636 = vrot.lane.b32.xlu0 %v2632_v40, %s8512_s30  ;;  %2638 = vrot.lane.b32.xlu1 %v2626_v41, %s8512_s30 }
 0x24e   : > { %2634 = vrot.lane.b32.xlu0 %v2625_v35, %s8512_s30  ;;  %2642 = vrot.lane.b32.xlu1 %v2627_v45, %s8512_s30  ;;  %v3880_v35 = vrot.slane %v3877_v29, 4  ;;  %v3681_v45 = vcombine.high %v3674_v38, %v3674_v38 }
 0x250   : > { %v3882_v40 = vsel %vm493_vm8, %v3880_v35, %v3877_v29  ;;  %v3883_v41 = vsel %vm255_vm1, %v3880_v35, %v3881_v36  ;;  %v5149_v29 = vrot.slane %v8232_v21, %v8570_v6 }
 0x251   : > { %v3888_v43 = vmul.f32 %v3882_v40, %v8916_v58  ;;  %v3884_v44 = vsel %vm493_vm8, %v3883_v41, %v3879_v30  ;;  %v8240_v30 = vld [vmem:[%s8577_s20 + $0x6] ss:$8 sm:$0xf] }
 0x252   : > { %2851 = vrot.lane.b32.xlu1 %v2847_v48, %s8511_s29  ;;  %2640 = vrot.lane.b32.xlu0 %v2633_v49, %s8512_s30  ;;  %v3889_v47 = vmul.f32 %v3884_v44, %v8914_v27  ;;  %v3855_v49 = vld [vmem:[#allocation2 + $0x14] sm:$0xf]  ;;  %v5151_v34 = vcombine.low %v5145_v26, %v5149_v29  ;;  %v5360_v35 = vrot.slane %v8240_v30, %v8567_v5  ;;  %v8256_v44 = vld [vmem:[%s8577_s20 + $0x20] ss:$8 sm:$0xf] }
 0x253   : > { %v3890_v51 = vmul.f32 %v3881_v36, %v3855_v49  ;;  %v5364_v36 = vrot.slane %v8240_v30, %v8570_v6  ;;  %v5790_v49 = vrot.slane %v8256_v44, %v8567_v5 }
 0x254   : > { %v3896_v48 = vcombine.high %v3889_v47, %v3889_v47 }
 0x255   : > { %v5366_v41 = vcombine.low %v5360_v35, %v5364_v36 }
 0x256   : > { %2853 = vrot.lane.b32.xlu0 %v2841_v50, %s8511_s29  ;;  %2855 = vrot.lane.b32.xlu1 %v2848_v55, %s8511_s29  ;;  %v8194_v50 = vld [vmem:[%s8577_s20 + $0x1] ss:$8 sm:$0xf]  ;;  %v4095_v55 = vld [vmem:[%s8577_s20] ss:$8 sm:$0xf] }
 0x257   : > { %v4144_v52 = vrot.slane %v8194_v50, %v8567_v5  ;;  %v4148_v53 = vrot.slane %v8194_v50, %v8570_v6  ;;  %v4136_v56 = vrot.slane %v8194_v50, %v8561_v3  ;;  %v4140_v57 = vrot.slane %v8194_v50, %v8564_v4 }
 0x258   : > { %v4100_v28 = vrot.slane %v4095_v55, %v8561_v3  ;;  %v4108_v61 = vrot.slane %v4095_v55, %v8567_v5  ;;  %v4112_v62 = vrot.slane %v4095_v55, %v8570_v6  ;;  %v5794_v50 = vrot.slane %v8256_v44, %v8570_v6 }
 0x259   : > { %v4149_v7 = vcombine.low %v4136_v56, %v4140_v57 }
 0x25a   : > { %2857 = vrot.lane.b32.xlu0 %v2842_v59, %s8511_s29  ;;  %2849 = vrot.lane.b32.xlu1 %v2840_v46, %s8511_s29  ;;  %v3895_v46 = vcombine.high %v3888_v43, %v3888_v43  ;;  %v4104_v59 = vrot.slane %v4095_v55, %v8564_v4  ;;  %v4114_v11 = vcombine.low %v4108_v61, %v4112_v62 }
 0x25b   : > { %v5796_v55 = vcombine.low %v5790_v49, %v5794_v50  ;;  %v8154_v49 = vld [vmem:[%s8577_s20 + $0x4] ss:$8 sm:$0xf] }
 0x25c   : > { %v4113_v8 = vcombine.low %v4100_v28, %v4104_v59  ;;  %v6008_v28 = vld [vmem:[%s8577_s20] ss:$8 sm:$0xf] }
 0x25d   : > { %v6017_v61 = vrot.slane %v6008_v28, %v8564_v4 }
 0x25e   : > { %3254 = vrot.lane.b32.xlu0 %v3250_v9, %s8510_s28  ;;  %3256 = vrot.lane.b32.xlu1 %v3244_v10, %s8510_s28  ;;  %v4519_v9 = vrot.slane %v8208_v63, %v8561_v3  ;;  %v4523_v10 = vrot.slane %v8208_v63, %v8564_v4  ;;  %v6021_v63 = vrot.slane %v6008_v28, %v8567_v5 }
 0x262   : > { %3252 = vrot.lane.b32.xlu0 %v3243_v60, %s8510_s28  ;;  %3260 = vrot.lane.b32.xlu1 %v3245_v15, %s8510_s28  ;;  %v4150_v60 = vcombine.low %v4144_v52, %v4148_v53  ;;  %v4532_v15 = vcombine.low %v4519_v9, %v4523_v10 }
 0x266   : > { %3469 = vrot.lane.b32.xlu1 %v3465_v17, %s8509_s27  ;;  %3471 = vrot.lane.b32.xlu0 %v3459_v18, %s8509_s27  ;;  %v4533_v18 = vcombine.low %v4527_v12, %v4531_v13 }
 0x26a   : > { %3467 = vrot.lane.b32.xlu1 %v3458_v14, %s8509_s27  ;;  %3258 = vrot.lane.b32.xlu0 %v3251_v23, %s8510_s28  ;;  %v8216_v14 = vld [vmem:[%s8577_s20 + $0x3] ss:$8 sm:$0xf]  ;;  %v5137_v23 = vrot.slane %v8232_v21, %v8561_v3 }
 0x26b   : > { %v4734_v16 = vrot.slane %v8216_v14, %v8561_v3  ;;  %v4738_v17 = vrot.slane %v8216_v14, %v8564_v4  ;;  %v4742_v19 = vrot.slane %v8216_v14, %v8567_v5  ;;  %v4746_v20 = vrot.slane %v8216_v14, %v8570_v6 }
 0x26d   : > { %v4747_v22 = vcombine.low %v4734_v16, %v4738_v17  ;;  %v4748_v25 = vcombine.low %v4742_v19, %v4746_v20  ;;  %v8286_v19 = vld [vmem:[%s8577_s20 + $0x3] ss:$8 sm:$0xf] }
 0x26e   : > { %3475 = vrot.lane.b32.xlu0 %v3460_v31, %s8509_s27  ;;  %3473 = vrot.lane.b32.xlu1 %v3466_v33, %s8509_s27  ;;  %v5150_v31 = vcombine.low %v5137_v23, %v5141_v24  ;;  %v5356_v33 = vrot.slane %v8240_v30, %v8564_v4  ;;  %v6647_v21 = vrot.slane %v8286_v19, %v8561_v3 }
 0x26f   : > { %v6655_v24 = vrot.slane %v8286_v19, %v8567_v5 }
 0x272   : > { %3684 = vrot.lane.b32.xlu0 %v3680_v37, %s8507_s25  ;;  %3686 = vrot.lane.b32.xlu1 %v3674_v38, %s8507_s25  ;;  %v8248_v37 = vld [vmem:[%s8577_s20 + $0x7] ss:$8 sm:$0xf] }
 0x273   : > { %v5567_v39 = vrot.slane %v8248_v37, %v8561_v3  ;;  %v5571_v40 = vrot.slane %v8248_v37, %v8564_v4 }
 0x276   : > { %3682 = vrot.lane.b32.xlu0 %v3673_v32, %s8507_s25  ;;  %3690 = vrot.lane.b32.xlu1 %v3675_v42, %s8507_s25  ;;  %v5352_v32 = vrot.slane %v8240_v30, %v8561_v3  ;;  %v5575_v42 = vrot.slane %v8248_v37, %v8567_v5 }
 0x278   : > { %v5365_v38 = vcombine.low %v5352_v32, %v5356_v33  ;;  %v8125_v32 = vld [vmem:[%s9827_s2 + $0x1c] sm:$0xff] }
 0x27a   : > { %3899 = vrot.lane.b32.xlu1 %v3895_v46, %s8508_s26  ;;  %3688 = vrot.lane.b32.xlu0 %v3681_v45, %s8507_s25  ;;  %v5580_v45 = vcombine.low %v5567_v39, %v5571_v40  ;;  %v5782_v46 = vrot.slane %v8256_v44, %v8561_v3 }
 0x27e   : > { %3901 = vrot.lane.b32.xlu0 %v3889_v47, %s8508_s26  ;;  %3903 = vrot.lane.b32.xlu1 %v3896_v48, %s8508_s26  ;;  %v5786_v47 = vrot.slane %v8256_v44, %v8564_v4 }
 0x280   : > { %v5795_v52 = vcombine.low %v5782_v46, %v5786_v47 }
 0x282   : > { %3905 = vrot.lane.b32.xlu0 %v3890_v51, %s8508_s26  ;;  %3897 = vrot.lane.b32.xlu1 %v3888_v43, %s8508_s26  ;;  %v5579_v43 = vrot.slane %v8248_v37, %v8570_v6  ;;  %v8264_v51 = vld [vmem:[%s8577_s20 + $0x1] ss:$8 sm:$0xf] }
 0x283   : > { %v6057_v53 = vrot.slane %v8264_v51, %v8567_v5  ;;  %v6049_v56 = vrot.slane %v8264_v51, %v8561_v3  ;;  %v6053_v57 = vrot.slane %v8264_v51, %v8564_v4 }
 0x284   : > { %v5581_v48 = vcombine.low %v5575_v42, %v5579_v43 }
 0x285   : > { %v6062_v62 = vcombine.low %v6049_v56, %v6053_v57  ;;  %v3035_v56 = vrot.slane %v8154_v49, %v8567_v5  ;;  %v3039_v57 = vrot.slane %v8154_v49, %v8570_v6 }
 0x286   : > { %4071 = vperm.xlu0 %8487, %v4068_v54   ;;  %4151 = vrot.lane.b32.xlu1 %v4149_v7, %s8507_s25  ;;  %v6061_v54 = vrot.slane %v8264_v51, %v8570_v6  ;;  %v6025_v7 = vrot.slane %v6008_v28, %v8570_v6 }
 0x288   : > { %v6063_v59 = vcombine.low %v6057_v53, %v6061_v54  ;;  %v6027_v14 = vcombine.low %v6021_v63, %v6025_v7  ;;  %v8139_v53 = vld [vmem:[%s9827_s2 + $0x34] sm:$0xff]  ;;  %v3027_v54 = vrot.slane %v8154_v49, %v8561_v3  ;;  %v3041_v63 = vcombine.low %v3035_v56, %v3039_v57  ;;  %v8187_v57 = vld [vmem:[%s9827_s2 + $0xc4] sm:$0xff] }
 0x28a   : > { %4153 = vrot.lane.b32.xlu0 %v4150_v60, %s8507_s25  ;;  %4115 = vrot.lane.b32.xlu1 %v4113_v8, %s8508_s26  ;;  %v6013_v60 = vrot.slane %v6008_v28, %v8561_v3  ;;  %v8278_v8 = vld [vmem:[%s8577_s20 + $0x2] ss:$8 sm:$0xf] }
 0x28b   : > { %v6440_v12 = vrot.slane %v8278_v8, %v8567_v5  ;;  %v6444_v13 = vrot.slane %v8278_v8, %v8570_v6  ;;  %v6436_v16 = vrot.slane %v8278_v8, %v8564_v4 }
 0x28d   : > { %v6446_v20 = vcombine.low %v6440_v12, %v6444_v13 }
 0x28e   : > { %4117 = vrot.lane.b32.xlu0 %v4114_v11, %s8508_s26  ;;  %4534 = vrot.lane.b32.xlu1 %v4532_v15, %s8509_s27  ;;  %v6026_v11 = vcombine.low %v6013_v60, %v6017_v61  ;;  %v6432_v15 = vrot.slane %v8278_v8, %v8561_v3 }
 0x290   : > { %v6445_v23 = vcombine.low %v6432_v15, %v6436_v16 }
 0x292   : > { %4536 = vrot.lane.b32.xlu0 %v4533_v18, %s8509_s27  ;;  %4749 = vrot.lane.b32.xlu1 %v4747_v22, %s8510_s28  ;;  %v6651_v22 = vrot.slane %v8286_v19, %v8564_v4 }
 0x294   : > { %v6660_v33 = vcombine.low %v6647_v21, %v6651_v22 }
 0x296   : > { %4751 = vrot.lane.b32.xlu0 %v4748_v25, %s8510_s28  ;;  %5152 = vrot.lane.b32.xlu1 %v5150_v31, %s8511_s29  ;;  %v6659_v25 = vrot.slane %v8286_v19, %v8570_v6 }
 0x298   : > { %v6661_v35 = vcombine.low %v6655_v24, %v6659_v25 }
 0x29a   : > { %5154 = vrot.lane.b32.xlu0 %v5151_v34, %s8511_s29  ;;  %5367 = vrot.lane.b32.xlu1 %v5365_v38, %s8512_s30 }
 0x29e   : > { %5369 = vrot.lane.b32.xlu0 %v5366_v41, %s8512_s30  ;;  %5582 = vrot.lane.b32.xlu1 %v5580_v45, %s8513_s5  ;;  %v2209_v45 = vld [vmem:[%s9827_s2 + $0x4] sm:$0xff] }
 0x2a2   : > { %5584 = vrot.lane.b32.xlu0 %v5581_v48, %s8513_s5  ;;  %5797 = vrot.lane.b32.xlu1 %v5795_v52, %s8514_s6 }
 0x2a6   : > { %5799 = vrot.lane.b32.xlu0 %v5796_v55, %s8514_s6  ;;  %6066 = vrot.lane.b32.xlu1 %v6063_v59, %s8507_s25  ;;  %v3031_v55 = vrot.slane %v8154_v49, %v8564_v4  ;;  %v8179_v49 = vld [vmem:[%s9827_s2 + $0xac] sm:$0xff] }
 0x2a8   : > { %v2252_v9 = vpop.permute.xlu0 %2251  ;;  %v2256_v10 = vpop.permute.xlu1 %2255 }
 0x2aa   : > { %6064 = vrot.lane.b32.xlu0 %v6062_v62, %s8507_s25  ;;  %6028 = vrot.lane.b32.xlu1 %v6026_v11, %s8508_s26  ;;  %v3040_v62 = vcombine.low %v3027_v54, %v3031_v55  ;;  %v3045_v11 = vmul.f32 %v3041_v63, %v8914_v27 }
 0x2ac   : > { %v2428_v17 = vpop.permute.xlu0 %2427  ;;  %v2260_v18 = vpop.permute.xlu1 %2259  ;;  %v3050_v27 = vcombine.high %v3045_v11, %v3045_v11 }
 0x2ae   : > { %6030 = vrot.lane.b32.xlu0 %v6027_v14, %s8508_s26  ;;  %6449 = vrot.lane.b32.xlu1 %v6446_v20, %s8509_s27  ;;  %v8147_v14 = vld [vmem:[%s9827_s2 + $0x4c] sm:$0xff] }
 0x2b0   : > { %v2254_v26 = vpop.permute.xlu0 %2253  ;;  %v2426_v29 = vpop.permute.xlu1 %2425 }
 0x2b1   : > { %v2261_v30 = vsel %vm319_vm7, %v2252_v9, %v2254_v26  ;;  %v2262_v31 = vsel %vm319_vm7, %v2254_v26, %v2256_v10  ;;  %v2434_v34 = vsel %vm493_vm8, %v2426_v29, %v2428_v17 }
 0x2b2   : > { %8126 = vmatprep.subr.msk.mxu0 %vm255_vm1, %v2262_v31  ;;  %6447 = vrot.lane.b32.xlu0 %v6445_v23, %s8509_s27  ;;  %v8155_v23 = vld [vmem:[%s9827_s2 + $0x64] sm:$0xff] }
 0x2b3   : > { %8127 = vmatpush1.msk.msra.mxu0 %vm255_vm1, %v2261_v30  ;;  %6662 = vrot.lane.b32.xlu1 %v6660_v33, %s8510_s28 }
 0x2b4   : > { %v2258_v36 = vpop.permute.xlu0 %2257  ;;  %8132 = vmatprep.subr.msk.mxu0 %vm255_vm1, %v2434_v34  ;;  %v2424_v37 = vpop.permute.xlu1 %2423  ;;  %8128 = vmatmul.mubr.msk.f32.vlgmr.msra.gmra.mrb[2].mxu0 %vm324_vm9, %v8125_v32 }
 0x2b5   : > { %v2263_v38 = vsel %vm319_vm7, %v2256_v10, %v2258_v36  ;;  %v2433_v39 = vsel %vm493_vm8, %v2424_v37, %v2426_v29  ;;  %v2264_v40 = vsel %vm319_vm7, %v2258_v36, %v2260_v18  ;;  %2512 = vmatprep.mubr.f32.mxu0 %v8506_v1  ;;  %v3044_v10 = vmul.f32 %v3040_v62, %v8916_v58 }
 0x2b6   : > { %8129 = vmatprep.subr.msk.mxu1 %vm255_vm1, %v2264_v40  ;;  %8133 = vmatpush1.msk.msra.mxu0 %vm255_vm1, %v2433_v39 }
 0x2b7   : > { %8130 = vmatpush1.msk.msra.mxu1 %vm255_vm1, %v2263_v38  ;;  %6664 = vrot.lane.b32.xlu0 %v6661_v35, %s8510_s28  ;;  %v3049_v18 = vcombine.high %v3044_v10, %v3044_v10 }
 0x2b8   : > { %v2432_v41 = vpop.permute.xlu0 %2431  ;;  %8131 = vmatmul.mubr.msk.f32.vlgmr.msra.gmra.mrb[2].mxu1 %vm324_vm9, %v8125_v32  ;;  %v2430_v42 = vpop.permute.xlu1 %2429  ;;  %v8163_v32 = vld [vmem:[%s9827_s2 + $0x7c] sm:$0xff] }
 0x2b9   : > { %v2435_v43 = vsel %vm493_vm8, %v2428_v17, %v2430_v42  ;;  %v2436_v44 = vsel %vm493_vm8, %v2430_v42, %v2432_v41  ;;  %2583 = vmatprep.mubr.f32.mxu1 %v8506_v1  ;;  %v8171_v42 = vld [vmem:[%s9827_s2 + $0x94] sm:$0xff] }
 0x2ba   : > { %8135 = vmatprep.subr.msk.mxu1 %vm255_vm1, %v2436_v44 }
 0x2bb   : > { %8136 = vmatpush1.msk.msra.mxu1 %vm255_vm1, %v2435_v43 }
 0x2bc   : > { %v2637_v46 = vpop.permute.xlu0 %2636  ;;  %v2639_v47 = vpop.permute.xlu1 %2638  ;;  %8134 = vmatmul.mubr.msk.f32.vlgmr.msra.gmra.mrb[2].mxu0 %vm324_vm9, %v2209_v45 }
 0x2bd   : > { %v2645_v48 = vsel %vm708_vm6, %v2637_v46, %v2639_v47  ;;  %2723 = vmatprep.mubr.f32.mxu0 %v8506_v1 }
 0x2be   : > { %8140 = vmatprep.subr.msk.mxu0 %vm255_vm1, %v2645_v48 }
 0x2c0   : > { %v2635_v50 = vpop.permute.xlu0 %2634  ;;  %8137 = vmatmul.mubr.msk.f32.vlgmr.msra.gmra.mrb[2].mxu1 %vm324_vm9, %v2209_v45  ;;  %v2643_v51 = vpop.permute.xlu1 %2642 }
 0x2c1   : > { %v2644_v52 = vsel %vm708_vm6, %v2635_v50, %v2637_v46  ;;  %2794 = vmatprep.mubr.f32.mxu1 %v8506_v1 }
 0x2c2   : > { %8141 = vmatpush1.msk.msra.mxu0 %vm255_vm1, %v2644_v52 }
 0x2c4   : > { %v2641_v28 = vpop.permute.xlu0 %2640  ;;  %v2852_v59 = vpop.permute.xlu1 %2851  ;;  %8142 = vmatmul.mubr.msk.f32.vlgmr.msra.gmra.mrb[2].mxu0 %vm324_vm9, %v8139_v53 }
 0x2c5   : > { %v2646_v60 = vsel %vm708_vm6, %v2639_v47, %v2641_v28  ;;  %v2647_v61 = vsel %vm708_vm6, %v2641_v28, %v2643_v51  ;;  %2938 = vmatprep.mubr.f32.mxu0 %v8506_v1 }
 0x2c6   : > { %8143 = vmatprep.subr.msk.mxu1 %vm255_vm1, %v2647_v61 }
 0x2c7   : > { %8144 = vmatpush1.msk.msra.mxu1 %vm255_vm1, %v2646_v60 }
 0x2c8   : > { %v2854_v7 = vpop.permute.xlu0 %2853  ;;  %8145 = vmatmul.mubr.msk.f32.vlgmr.msra.gmra.mrb[2].mxu1 %vm324_vm9, %v8139_v53  ;;  %v2856_v8 = vpop.permute.xlu1 %2855 }
 0x2c9   : > { %v2860_v9 = vsel %vm927_vm5, %v2852_v59, %v2854_v7  ;;  %3009 = vmatprep.mubr.f32.mxu1 %v8506_v1  ;;  %v2861_v17 = vsel %vm927_vm5, %v2854_v7, %v2856_v8 }
 0x2ca   : > { %8148 = vmatprep.subr.msk.mxu0 %vm255_vm1, %v2860_v9  ;;  %v9226_v9 = vld [vmem:[%s8577_s20 + $0x5] ss:$8 sm:$0xf] }
 0x2cc   : > { %v2858_v12 = vpop.permute.xlu0 %2857  ;;  %v2850_v13 = vpop.permute.xlu1 %2849 }
 0x2cd   : > { %v2862_v15 = vsel %vm927_vm5, %v2856_v8, %v2858_v12  ;;  %v2859_v16 = vsel %vm927_vm5, %v2850_v13, %v2852_v59  ;;  %v7050_v13 = vrot.slane %v9226_v9, %v8561_v3 }
 0x2ce   : > { %8149 = vmatpush1.msk.msra.mxu0 %vm255_vm1, %v2859_v16  ;;  %8151 = vmatprep.subr.msk.mxu1 %vm255_vm1, %v2862_v15 }
 0x2cf   : > { %8150 = vmatmul.mubr.msk.f32.vlgmr.msra.gmra.mrb[2].mxu0 %vm324_vm9, %v8147_v14  ;;  %8152 = vmatpush1.msk.msra.mxu1 %vm255_vm1, %v2861_v17 }
 0x2d0   : > { %8156 = vmatprep.subr.msk.mxu0 %vm255_vm1, %v3049_v18  ;;  %v3255_v58 = vpop.permute.xlu0 %3254  ;;  %8153 = vmatmul.mubr.msk.f32.vlgmr.msra.gmra.mrb[2].mxu1 %vm324_vm9, %v8147_v14  ;;  %v3257_v19 = vpop.permute.xlu1 %3256  ;;  %v7054_v14 = vrot.slane %v9226_v9, %v8564_v4 }
 0x2d1   : > { %8157 = vmatpush1.msk.msra.mxu0 %vm255_vm1, %v3044_v10  ;;  %8159 = vmatprep.subr.msk.mxu1 %vm255_vm1, %v3050_v27  ;;  %v3263_v20 = vsel %vm900_vm4, %v3255_v58, %v3257_v19  ;;  %v5131_v10 = vld [vmem:[#allocation2 + $0x14] sm:$0xf] }
 0x2d2   : > { %8160 = vmatpush1.msk.msra.mxu1 %vm255_vm1, %v3045_v11  ;;  %8164 = vmatprep.subr.msk.mxu0 %vm255_vm1, %v3263_v20  ;;  %v7063_v16 = vcombine.low %v7050_v13, %v7054_v14 }
 0x2d3   : > { %3126 = vmatprep.mubr.f32.mxu0 %v8506_v1  ;;  %3197 = vmatprep.mubr.f32.mxu1 %v8506_v1 }
 0x2d4   : > { %v3253_v21 = vpop.permute.xlu0 %3252  ;;  %v3261_v22 = vpop.permute.xlu1 %3260 }
 0x2d5   : > { %v3262_v24 = vsel %vm900_vm4, %v3253_v21, %v3255_v58 }
 0x2d7   : > { %8158 = vmatmul.mubr.msk.f32.vlgmr.msra.gmra.mrb[2].mxu0 %vm324_vm9, %v8155_v23 }
 0x2d8   : > { %8165 = vmatpush1.msk.msra.mxu0 %vm255_vm1, %v3262_v24  ;;  %v3472_v25 = vpop.permute.xlu0 %3471  ;;  %8161 = vmatmul.mubr.msk.f32.vlgmr.msra.gmra.mrb[2].mxu1 %vm324_vm9, %v8155_v23  ;;  %v3470_v26 = vpop.permute.xlu1 %3469 }
 0x2d9   : > { %v3478_v29 = vsel %vm681_vm3, %v3470_v26, %v3472_v25  ;;  %3341 = vmatprep.mubr.f32.mxu0 %v8506_v1  ;;  %3412 = vmatprep.mubr.f32.mxu1 %v8506_v1 }
 0x2da   : > { %8172 = vmatprep.subr.msk.mxu0 %vm255_vm1, %v3478_v29 }
 0x2dc   : > { %v3259_v30 = vpop.permute.xlu0 %3258  ;;  %v3468_v31 = vpop.permute.xlu1 %3467 }
 0x2dd   : > { %v3264_v33 = vsel %vm900_vm4, %v3257_v19, %v3259_v30  ;;  %v3477_v34 = vsel %vm681_vm3, %v3468_v31, %v3470_v26  ;;  %v3265_v35 = vsel %vm900_vm4, %v3259_v30, %v3261_v22 }
 0x2de   : > { %8167 = vmatprep.subr.msk.mxu1 %vm255_vm1, %v3265_v35 }
 0x2df   : > { %8166 = vmatmul.mubr.msk.f32.vlgmr.msra.gmra.mrb[2].mxu0 %vm324_vm9, %v8163_v32  ;;  %8168 = vmatpush1.msk.msra.mxu1 %vm255_vm1, %v3264_v33 }
 0x2e0   : > { %8173 = vmatpush1.msk.msra.mxu0 %vm255_vm1, %v3477_v34  ;;  %v3476_v36 = vpop.permute.xlu0 %3475  ;;  %8169 = vmatmul.mubr.msk.f32.vlgmr.msra.gmra.mrb[2].mxu1 %vm324_vm9, %v8163_v32  ;;  %v3474_v37 = vpop.permute.xlu1 %3473 }
 0x2e1   : > { %v3479_v38 = vsel %vm681_vm3, %v3472_v25, %v3474_v37  ;;  %v3480_v39 = vsel %vm681_vm3, %v3474_v37, %v3476_v36  ;;  %3556 = vmatprep.mubr.f32.mxu0 %v8506_v1  ;;  %3627 = vmatprep.mubr.f32.mxu1 %v8506_v1 }
 0x2e2   : > { %8175 = vmatprep.subr.msk.mxu1 %vm255_vm1, %v3480_v39 }
 0x2e3   : > { %8176 = vmatpush1.msk.msra.mxu1 %vm255_vm1, %v3479_v38 }
 0x2e4   : > { %v3685_v40 = vpop.permute.xlu0 %3684  ;;  %v3687_v41 = vpop.permute.xlu1 %3686 }
 0x2e5   : > { %v3693_v43 = vsel %vm292_vm0, %v3685_v40, %v3687_v41 }
 0x2e6   : > { %8180 = vmatprep.subr.msk.mxu0 %vm255_vm1, %v3693_v43 }
 0x2e7   : > { %8174 = vmatmul.mubr.msk.f32.vlgmr.msra.gmra.mrb[2].mxu0 %vm324_vm9, %v8171_v42 }
 0x2e8   : > { %v3683_v44 = vpop.permute.xlu0 %3682  ;;  %8177 = vmatmul.mubr.msk.f32.vlgmr.msra.gmra.mrb[2].mxu1 %vm324_vm9, %v8171_v42  ;;  %v3691_v45 = vpop.permute.xlu1 %3690  ;;  %3771 = vmatprep.mubr.f32.mxu0 %v8506_v1 }
 0x2e9   : > { %v3692_v46 = vsel %vm292_vm0, %v3683_v44, %v3685_v40  ;;  %3842 = vmatprep.mubr.f32.mxu1 %v8506_v1 }
 0x2ea   : > { %8181 = vmatpush1.msk.msra.mxu0 %vm255_vm1, %v3692_v46 }
 0x2ec   : > { %v3689_v47 = vpop.permute.xlu0 %3688  ;;  %v3900_v48 = vpop.permute.xlu1 %3899 }
 0x2ed   : > { %v3694_v50 = vsel %vm292_vm0, %v3687_v41, %v3689_v47  ;;  %v3695_v51 = vsel %vm292_vm0, %v3689_v47, %v3691_v45 }
 0x2ee   : > { %8183 = vmatprep.subr.msk.mxu1 %vm255_vm1, %v3695_v51 }
 0x2ef   : > { %8182 = vmatmul.mubr.msk.f32.vlgmr.msra.gmra.mrb[2].mxu0 %vm324_vm9, %v8179_v49  ;;  %8184 = vmatpush1.msk.msra.mxu1 %vm255_vm1, %v3694_v50 }
 0x2f0   : > { %v3902_v52 = vpop.permute.xlu0 %3901  ;;  %8185 = vmatmul.mubr.msk.f32.vlgmr.msra.gmra.mrb[2].mxu1 %vm324_vm9, %v8179_v49  ;;  %v3904_v53 = vpop.permute.xlu1 %3903  ;;  %3986 = vmatprep.mubr.f32.mxu0 %v8506_v1 }
 0x2f1   : > { %v3908_v54 = vsel %vm253_vm2, %v3900_v48, %v3902_v52  ;;  %4057 = vmatprep.mubr.f32.mxu1 %v8506_v1  ;;  %v3909_v60 = vsel %vm253_vm2, %v3902_v52, %v3904_v53 }
 0x2f2   : > { %8188 = vmatprep.subr.msk.mxu0 %vm255_vm1, %v3908_v54 }
 0x2f4   : > { %v3906_v55 = vpop.permute.xlu0 %3905  ;;  %v3898_v56 = vpop.permute.xlu1 %3897 }
 0x2f5   : > { %v3910_v28 = vsel %vm253_vm2, %v3904_v53, %v3906_v55  ;;  %v3907_v59 = vsel %vm253_vm2, %v3898_v56, %v3900_v48 }
 0x2f6   : > { %8189 = vmatpush1.msk.msra.mxu0 %vm255_vm1, %v3907_v59  ;;  %8191 = vmatprep.subr.msk.mxu1 %vm255_vm1, %v3910_v28 }
 0x2f7   : > { %8190 = vmatmul.mubr.msk.f32.vlgmr.msra.gmra.mrb[2].mxu0 %vm324_vm9, %v8187_v57  ;;  %8192 = vmatpush1.msk.msra.mxu1 %vm255_vm1, %v3909_v60 }
 0x2f8   : > { %8193 = vmatmul.mubr.msk.f32.vlgmr.msra.gmra.mrb[2].mxu1 %vm324_vm9, %v8187_v57  ;;  %4261 = vmatprep.mubr.f32.mxu0 %v8506_v1  ;;  %v4152_v17 = vpop.permute.xlu1 %4151 }
 0x2f9   : > { %4332 = vmatprep.mubr.f32.mxu1 %v8506_v1  ;;  %v4155_v42 = vrot.slane %v4152_v17, 4 }
 0x2fb   : > { %v4157_v44 = vsel %vm292_vm0, %v4155_v42, %v4152_v17 }
 0x2fc   : > { %v4116_v18 = vpop.permute.xlu1 %4115 }
 0x2fd   : > { %v4119_v43 = vrot.slane %v4116_v18, 4 }
 0x2ff   : > { %v4121_v45 = vsel %vm253_vm2, %v4119_v43, %v4116_v18 }
 0x300   : > { %v4535_v27 = vpop.permute.xlu1 %4534 }
 0x301   : > { %v4538_v54 = vrot.slane %v4535_v27, 4 }
 0x303   : > { %v4540_v57 = vsel %vm681_vm3, %v4538_v54, %v4535_v27 }
 0x304   : > { %v9234_v58 = vpop.permute.xlu1 %4749 }
 0x305   : > { %v4072_v61 = vpop.permute.xlu0 %4071  ;;  %v4753_v46 = vrot.slane %v9234_v58, 4 }
 0x307   : > { %v4755_v55 = vsel %vm900_vm4, %v4753_v46, %v9234_v58 }
 0x308   : > { %v5153_v19 = vpop.permute.xlu1 %5152 }
 0x309   : > { %v9217_v62 = vpop.permute.xlu0 %4153  ;;  %v5156_v20 = vrot.slane %v5153_v19, 4 }
 0x30a   : > { %v4156_v48 = vrot.slane %v9217_v62, 4 }
 0x30c   : > { %v4158_v28 = vsel %vm255_vm1, %v4155_v42, %v4156_v48  ;;  %v7058_v42 = vrot.slane %v9226_v9, %v8567_v5 }
 0x30d   : > { %v9219_v63 = vpop.permute.xlu0 %4117 }
 0x311   : > { %v9221_v7 = vpop.permute.xlu0 %4536 }
 0x315   : > { %v9223_v8 = vpop.permute.xlu0 %4751 }
 0x316   : > { %v4754_v27 = vrot.slane %v9223_v8, 4 }
 0x319   : > { %v5155_v11 = vpop.permute.xlu0 %5154 }
 0x31a   : > { %v5157_v12 = vrot.slane %v5155_v11, 4 }
 0x31c   : > { %v5166_v15 = vmul.f32 %v5157_v12, %v5131_v10  ;;  %v5159_v30 = vsel %vm255_vm1, %v5156_v20, %v5157_v12  ;;  %v5158_v10 = vsel %vm927_vm5, %v5156_v20, %v5153_v19  ;;  %v4539_v12 = vrot.slane %v9221_v7, 4 }
 0x31d   : > { %v5160_v38 = vsel %vm927_vm5, %v5159_v30, %v5155_v11  ;;  %v4159_v11 = vsel %vm292_vm0, %v4158_v28, %v9217_v62  ;;  %v4756_v20 = vsel %vm255_vm1, %v4753_v46, %v4754_v27 }
 0x31e   : > { %5181 = vrot.lane.b32.xlu0 %v5166_v15, %s8510_s28 }
 0x322   : > { %7065 = vrot.lane.b32.xlu0 %v7063_v16, %s8511_s29  ;;  %v4541_v16 = vsel %vm255_vm1, %v4538_v54, %v4539_v12 }
 0x323   : > { %v4542_v58 = vsel %vm681_vm3, %v4541_v16, %v9221_v7 }
 0x3ca   : > { %v3988_v21 = vpop.f32.mrb[2].mxu0 }
 0x3cb   : > { %v4074_v22 = vadd.f32 %v4072_v61, %v3988_v21  ;;  %v3990_v23 = vpop.f32.mrb[3].mxu0  ;;  %v4059_v24 = vpop.f32.mrb[2].mxu1 }
 0x3cc   : > { %v4075_v25 = vadd.f32 %v4072_v61, %v3990_v23  ;;  %v4076_v26 = vadd.f32 %v4072_v61, %v4059_v24  ;;  %v4061_v29 = vpop.f32.mrb[3].mxu1  ;;  %v5368_v24 = vpop.permute.xlu1 %5367 }
 0x3cd   : > { %v4078_v31 = vmax.f32 %v4074_v22, 0.0  ;;  %v4077_v32 = vadd.f32 %v4072_v61, %v4061_v29  ;;  %v4120_v61 = vrot.slane %v9219_v63, 4  ;;  %v4757_v22 = vsel %vm900_vm4, %v4756_v20, %v9223_v8 }
 0x3ce   : > { %v4079_v33 = vmax.f32 %v4075_v25, 0.0  ;;  %v4080_v34 = vmax.f32 %v4076_v26, 0.0  ;;  %v5371_v26 = vrot.slane %v5368_v24, 4 }
 0x3cf   : > { %v4081_v35 = vmax.f32 %v4077_v32, 0.0  ;;  %v4122_v14 = vsel %vm255_vm1, %v4119_v43, %v4120_v61  ;;  %v7062_v43 = vrot.slane %v9226_v9, %v8570_v6 }
 0x3d0   : > { %v9237_v36 = vcombine.low %v4078_v31, %v4079_v33  ;;  %v9239_v37 = vcombine.high %v4078_v31, %v4079_v33  ;;  %v4123_v18 = vsel %vm253_vm2, %v4122_v14, %v9219_v63  ;;  %v5373_v30 = vsel %vm708_vm6, %v5371_v26, %v5368_v24  ;;  %v8318_v14 = vld [vmem:[%s8577_s20 + $0x7] ss:$8 sm:$0xf] }
 0x3d1   : > { %v9242_v39 = vcombine.low %v4080_v34, %v4081_v35  ;;  %v9244_v40 = vcombine.high %v4080_v34, %v4081_v35  ;;  %v5370_v35 = vpop.permute.xlu0 %5369 }
 0x3d2   : > { %4090 = vst [vmem:[#allocation2 + $0x4] sm:$0xff] %v9237_v36  ;;  %v5164_v15 = vmul.f32 %v5158_v10, %v9237_v36  ;;  %v5379_v33 = vmul.f32 %v5373_v30, %v9237_v36 }
 0x3d3   : > { %4091 = vst [vmem:[#allocation2 + $0xc] sm:$0xff] %v9242_v39  ;;  %v9249_v41 = vmul.f32 %v5160_v38, %v9242_v39  ;;  %v5372_v38 = vrot.slane %v5370_v35, 4 }
 0x3d4   : > { %v5171_v34 = vcombine.high %v5164_v15, %v5164_v15 }
 0x3d9   : > { %v4092_v47 = vld [vmem:[#allocation2] sm:$0xff] }
 0x3da   : > { %v4093_v49 = vld [vmem:[#allocation2 + $0x8] sm:$0xff]  ;;  %v4094_v50 = vld [vmem:[#allocation2 + $0x10] sm:$0xf]  ;;  %v4163_v52 = vmul.f32 %v4157_v44, %v4092_v47  ;;  %v4127_v53 = vmul.f32 %v4121_v45, %v4092_v47  ;;  %v4546_v59 = vmul.f32 %v4540_v57, %v4092_v47  ;;  %v4761_v60 = vmul.f32 %v4755_v55, %v4092_v47  ;;  %v5346_v57 = vld [vmem:[#allocation2 + $0x14] sm:$0xf] }
 0x3db   : > { %v4513_v51 = vld [vmem:[#allocation2 + $0x10] sm:$0xf]  ;;  %6003 = vst [vmem:[#allocation2 + $0x4] sm:$0xff] %v9239_v37  ;;  %v4164_v13 = vmul.f32 %v4159_v11, %v4093_v49  ;;  %v4165_v17 = vmul.f32 %v4156_v48, %v4094_v50  ;;  %v4128_v62 = vmul.f32 %v4123_v18, %v4093_v49  ;;  %v9282_v19 = vmul.f32 %v4542_v58, %v4093_v49  ;;  %v8310_v44 = vld [vmem:[%s8577_s20 + $0x6] ss:$8 sm:$0xf] }
 0x3dc   : > { %v4728_v56 = vld [vmem:[#allocation2 + $0x10] sm:$0xf]  ;;  %4172 = vrot.lane.b32.xlu1 %v4163_v52, %s8513_s5  ;;  %4344 = vrot.lane.b32.xlu0 %v4127_v53, %s8514_s6  ;;  %v4129_v21 = vmul.f32 %v4120_v61, %v4094_v50  ;;  %v4548_v63 = vmul.f32 %v4539_v12, %v4513_v51  ;;  %v4762_v23 = vmul.f32 %v4757_v22, %v4093_v49  ;;  %v5585_v51 = vpop.permute.xlu0 %5584  ;;  %v5561_v11 = vld [vmem:[#allocation2 + $0x14] sm:$0xf] }
 0x3dd   : > { %6004 = vst [vmem:[#allocation2 + $0xc] sm:$0xff] %v9244_v40  ;;  %v4763_v7 = vmul.f32 %v4754_v27, %v4728_v56  ;;  %v4342_v25 = vcombine.high %v4127_v53, %v4127_v53  ;;  %v4170_v29 = vcombine.high %v4163_v52, %v4163_v52  ;;  %v4768_v8 = vcombine.high %v4761_v60, %v4761_v60  ;;  %v5583_v52 = vpop.permute.xlu1 %5582 }
 0x3de   : > { %v4553_v31 = vcombine.high %v4546_v59, %v4546_v59  ;;  %v4343_v32 = vcombine.high %v4128_v62, %v4128_v62  ;;  %v5386_v45 = vcombine.high %v5379_v33, %v5379_v33  ;;  %v4171_v46 = vcombine.high %v4164_v13, %v4164_v13 }
 0x3df   : > { %v7273_v47 = vrot.slane %v8310_v44, %v8567_v5  ;;  %v7277_v48 = vrot.slane %v8310_v44, %v8570_v6  ;;  %v5374_v49 = vsel %vm255_vm1, %v5371_v26, %v5372_v38  ;;  %v7064_v50 = vcombine.low %v7058_v42, %v7062_v43 }
 0x3e0   : > { %4555 = vrot.lane.b32.xlu1 %v4546_v59, %s8512_s30  ;;  %4770 = vrot.lane.b32.xlu0 %v4761_v60, %s8511_s29  ;;  %v5587_v53 = vrot.slane %v5585_v51, 4  ;;  %v5586_v54 = vrot.slane %v5583_v52, 4  ;;  %v5375_v9 = vsel %vm708_vm6, %v5374_v49, %v5370_v35  ;;  %v4769_v59 = vcombine.high %v4762_v23, %v4762_v23 }
 0x3e1   : > { %v7279_v55 = vcombine.low %v7273_v47, %v7277_v48  ;;  %v5380_v56 = vmul.f32 %v5375_v9, %v9242_v39  ;;  %v5381_v60 = vmul.f32 %v5372_v38, %v5346_v57  ;;  %v5798_v10 = vpop.permute.xlu1 %5797  ;;  %v7265_v12 = vrot.slane %v8310_v44, %v8561_v3  ;;  %v5776_v48 = vld [vmem:[#allocation2 + $0x14] sm:$0xf] }
 0x3e2   : > { %v5589_v28 = vsel %vm255_vm1, %v5586_v54, %v5587_v53  ;;  %v5801_v16 = vrot.slane %v5798_v10, 4  ;;  %v5596_v18 = vmul.f32 %v5587_v53, %v5561_v11  ;;  %v5588_v27 = vsel %vm319_vm7, %v5586_v54, %v5583_v52 }
 0x3e3   : > { %v5590_v61 = vsel %vm319_vm7, %v5589_v28, %v5585_v51  ;;  %v7484_v58 = vrot.slane %v8318_v14, %v8564_v4  ;;  %v7492_v26 = vrot.slane %v8318_v14, %v8570_v6  ;;  %v5387_v35 = vcombine.high %v5380_v56, %v5380_v56 }
 0x3e4   : > { %4176 = vrot.lane.b32.xlu0 %v4164_v13, %s8513_s5  ;;  %5173 = vrot.lane.b32.xlu1 %v5164_v15, %s8510_s28  ;;  %v7269_v13 = vrot.slane %v8310_v44, %v8564_v4  ;;  %v9327_v15 = vmul.f32 %v5590_v61, %v9242_v39  ;;  %v5172_v47 = vcombine.high %v9249_v41, %v9249_v41  ;;  %v9365_v54 = vld [vmem:[#allocation2 + $0x8] sm:$0xff]  ;;  %v6007_v28 = vld [vmem:[#allocation2 + $0x10] sm:$0xf] }
 0x3e5   : > { %v6067_v42 = vpop.permute.xlu1 %6066 }
 0x3e6   : > { %v7278_v20 = vcombine.low %v7265_v12, %v7269_v13  ;;  %v5602_v12 = vcombine.high %v9327_v15, %v9327_v15 }
 0x3e8   : > { %4180 = vrot.lane.b32.xlu0 %v4165_v17, %s8513_s5  ;;  %4348 = vrot.lane.b32.xlu1 %v4128_v62, %s8514_s6  ;;  %v4554_v17 = vcombine.high %v9282_v19, %v9282_v19  ;;  %v7480_v62 = vrot.slane %v8318_v14, %v8561_v3 }
 0x3e9   : > { %v6029_v57 = vpop.permute.xlu1 %6028 }
 0x3ec   : > { %4559 = vrot.lane.b32.xlu0 %v9282_v19, %s8512_s30  ;;  %4352 = vrot.lane.b32.xlu1 %v4129_v21, %s8514_s6  ;;  %v5803_v21 = vsel %vm493_vm8, %v5801_v16, %v5798_v10  ;;  %v7493_v19 = vcombine.low %v7480_v62, %v7484_v58  ;;  %v6424_v10 = vld [vmem:[#allocation2] sm:$0xff] }
 0x3ed   : > { %v5809_v22 = vmul.f32 %v5803_v21, %v9237_v36 }
 0x3f0   : > { %4563 = vrot.lane.b32.xlu0 %v4548_v63, %s8512_s30  ;;  %4774 = vrot.lane.b32.xlu1 %v4762_v23, %s8511_s29  ;;  %v5594_v63 = vmul.f32 %v5588_v27, %v9237_v36 }
 0x3f2   : > { %v5601_v23 = vcombine.high %v5594_v63, %v5594_v63 }
 0x3f4   : > { %5177 = vrot.lane.b32.xlu0 %v9249_v41, %s8510_s28  ;;  %4778 = vrot.lane.b32.xlu1 %v4763_v7, %s8511_s29  ;;  %v5800_v7 = vpop.permute.xlu0 %5799 }
 0x3f5   : > { %v5802_v24 = vrot.slane %v5800_v7, 4 }
 0x3f7   : > { %v5811_v53 = vmul.f32 %v5802_v24, %v5776_v48 }
 0x3f8   : > { %4346 = vrot.lane.b32.xlu0 %v4342_v25, %s8514_s6  ;;  %4174 = vrot.lane.b32.xlu1 %v4170_v29, %s8513_s5  ;;  %v7488_v25 = vrot.slane %v8318_v14, %v8567_v5  ;;  %v5816_v29 = vcombine.high %v5809_v22, %v5809_v22  ;;  %v6065_v38 = vpop.permute.xlu0 %6064 }
 0x3f9   : > { %v6068_v44 = vrot.slane %v6065_v38, 4 }
 0x3fa   : > { %v7494_v30 = vcombine.low %v7488_v25, %v7492_v26 }
 0x3fb   : > { %v6070_v13 = vsel %vm292_vm0, %v6068_v44, %v6065_v38 }
 0x3fc   : > { %4772 = vrot.lane.b32.xlu0 %v4768_v8, %s8511_s29  ;;  %4557 = vrot.lane.b32.xlu1 %v4553_v31, %s8512_s30  ;;  %v5804_v8 = vsel %vm255_vm1, %v5801_v16, %v5802_v24  ;;  %v8326_v31 = vld [vmem:[%s8577_s20 + $0x20] ss:$8 sm:$0xf]  ;;  %v6076_v27 = vmul.f32 %v6424_v10, %v6070_v13 }
 0x3fd   : > { %v7699_v51 = vrot.slane %v8326_v31, %v8564_v4 }
 0x400   : > { %4350 = vrot.lane.b32.xlu0 %v4343_v32, %s8514_s6  ;;  %5175 = vrot.lane.b32.xlu1 %v5171_v34, %s8510_s28  ;;  %v5805_v32 = vsel %vm493_vm8, %v5804_v8, %v5800_v7  ;;  %v7707_v34 = vrot.slane %v8326_v31, %v8570_v6  ;;  %v6083_v7 = vcombine.high %v6076_v27, %v6076_v27 }
 0x401   : > { %v5810_v43 = vmul.f32 %v5805_v32, %v9242_v39 }
 0x403   : > { %v5817_v52 = vcombine.high %v5810_v43, %v5810_v43 }
 0x404   : > { %5390 = vrot.lane.b32.xlu0 %v5386_v45, %s8509_s27  ;;  %4178 = vrot.lane.b32.xlu1 %v4171_v46, %s8513_s5  ;;  %v6069_v45 = vrot.slane %v6067_v42, 4 }
 0x406   : > { %v6071_v49 = vsel %vm255_vm1, %v6068_v44, %v6069_v45  ;;  %v6078_v61 = vmul.f32 %v6069_v45, %v6007_v28 }
 0x407   : > { %v6072_v9 = vsel %vm292_vm0, %v6071_v49, %v6067_v42 }
 0x408   : > { %5388 = vrot.lane.b32.xlu0 %v5379_v33, %s8509_s27  ;;  %7067 = vrot.lane.b32.xlu1 %v7064_v50, %s8511_s29  ;;  %v7703_v33 = vrot.slane %v8326_v31, %v8567_v5  ;;  %v7695_v50 = vrot.slane %v8326_v31, %v8561_v3  ;;  %v6426_v31 = vld [vmem:[#allocation2 + $0x10] sm:$0xf] }
 0x40a   : > { %v7709_v46 = vcombine.low %v7703_v33, %v7707_v34  ;;  %v7708_v41 = vcombine.low %v7695_v50, %v7699_v51 }
 0x40c   : > { %7282 = vrot.lane.b32.xlu0 %v7279_v55, %s8512_s30  ;;  %5392 = vrot.lane.b32.xlu1 %v5380_v56, %s8509_s27  ;;  %v6031_v55 = vpop.permute.xlu0 %6030  ;;  %v6077_v56 = vmul.f32 %v6072_v9, %v9365_v54 }
 0x410   : > { %4776 = vrot.lane.b32.xlu0 %v4769_v59, %s8511_s29  ;;  %5396 = vrot.lane.b32.xlu1 %v5381_v60, %s8509_s27  ;;  %v6032_v59 = vrot.slane %v6029_v57, 4  ;;  %v6033_v60 = vrot.slane %v6031_v55, 4  ;;  %v6448_v14 = vpop.permute.xlu0 %6447 }
 0x411   : > { %v6451_v58 = vrot.slane %v6448_v14, 4 }
 0x412   : > { %v6034_v11 = vsel %vm253_vm2, %v6032_v59, %v6029_v57  ;;  %v6035_v16 = vsel %vm255_vm1, %v6032_v59, %v6033_v60  ;;  %v6042_v42 = vmul.f32 %v6033_v60, %v6007_v28  ;;  %v6641_v57 = vld [vmem:[#allocation2 + $0x10] sm:$0xf] }
 0x413   : > { %v6036_v62 = vsel %vm253_vm2, %v6035_v16, %v6031_v55  ;;  %v6453_v44 = vsel %vm681_vm3, %v6451_v58, %v6448_v14 }
 0x414   : > { %5607 = vrot.lane.b32.xlu0 %v9327_v15, %s8507_s25  ;;  %4561 = vrot.lane.b32.xlu1 %v4554_v17, %s8512_s30  ;;  %v6040_v17 = vmul.f32 %v6424_v10, %v6034_v11  ;;  %v6665_v21 = vpop.permute.xlu0 %6664  ;;  %v6459_v49 = vmul.f32 %v6453_v44, %v6424_v10 }
 0x415   : > { %v6667_v26 = vrot.slane %v6665_v21, 4 }
 0x416   : > { %v6255_v15 = vcombine.high %v6040_v17, %v6040_v17 }
 0x417   : > { %v6676_v60 = vmul.f32 %v6667_v26, %v6641_v57 }
 0x418   : > { %5611 = vrot.lane.b32.xlu0 %v5596_v18, %s8507_s25  ;;  %7280 = vrot.lane.b32.xlu1 %v7278_v20, %s8512_s30  ;;  %v6450_v18 = vpop.permute.xlu1 %6449 }
 0x419   : > { %v6452_v20 = vrot.slane %v6450_v18, 4 }
 0x41b   : > { %v6461_v34 = vmul.f32 %v6452_v20, %v6426_v31 }
 0x41c   : > { %7495 = vrot.lane.b32.xlu0 %v7493_v19, %s8513_s5  ;;  %5605 = vrot.lane.b32.xlu1 %v5601_v23, %s8507_s25  ;;  %v6454_v19 = vsel %vm255_vm1, %v6451_v58, %v6452_v20  ;;  %v8195_v58 = vld [vmem:[%s9827_s2 + $0x24] sm:$0xf] }
 0x41d   : > { %v6455_v24 = vsel %vm681_vm3, %v6454_v19, %v6450_v18 }
 0x41e   : > { %v6460_v8 = vmul.f32 %v6455_v24, %v9365_v54 }
 0x420   : > { %5820 = vrot.lane.b32.xlu0 %v5816_v29, %s8508_s26  ;;  %5603 = vrot.lane.b32.xlu1 %v5594_v63, %s8507_s25  ;;  %v6041_v63 = vmul.f32 %v6036_v62, %v9365_v54  ;;  %v9388_v29 = vpop.permute.xlu0 %5181 }
 0x422   : > { %v6256_v23 = vcombine.high %v6041_v63, %v6041_v63 }
 0x424   : > { %5818 = vrot.lane.b32.xlu0 %v5809_v22, %s8508_s26  ;;  %7497 = vrot.lane.b32.xlu1 %v7494_v30, %s8513_s5  ;;  %v6663_v22 = vpop.permute.xlu1 %6662  ;;  %v6084_v30 = vcombine.high %v6077_v56, %v6077_v56  ;;  %v9397_v38 = vpop.permute.xlu0 %7065 }
 0x425   : > { %v6666_v25 = vrot.slane %v6663_v22, 4  ;;  %v7069_v28 = vrot.slane %v9397_v38, 4 }
 0x427   : > { %v6668_v32 = vsel %vm900_vm4, %v6666_v25, %v6663_v22  ;;  %v6669_v33 = vsel %vm255_vm1, %v6666_v25, %v6667_v26  ;;  %v8224_v22 = vld [vmem:[%s8577_s20 + $0x4] ss:$8 sm:$0xf] }
 0x428   : > { %5394 = vrot.lane.b32.xlu0 %v5387_v35, %s8509_s27  ;;  %5822 = vrot.lane.b32.xlu1 %v5810_v43, %s8508_s26  ;;  %v6674_v35 = vmul.f32 %v6668_v32, %v6424_v10  ;;  %v6670_v43 = vsel %vm900_vm4, %v6669_v33, %v6665_v21  ;;  %v7071_v10 = vsel %vm927_vm5, %v7069_v28, %v9397_v38  ;;  %v4130_v26 = vld [vmem:[%s9827_s2 + $0xc] sm:$0xf] }
 0x429   : > { %v6675_v48 = vmul.f32 %v6670_v43, %v9365_v54  ;;  %v4948_v24 = vrot.slane %v8224_v22, %v8561_v3  ;;  %v4952_v25 = vrot.slane %v8224_v22, %v8564_v4 }
 0x42a   : > { %v6681_v45 = vcombine.high %v6674_v35, %v6674_v35 }
 0x42b   : > { %v4961_v32 = vcombine.low %v4948_v24, %v4952_v25 }
 0x42c   : > { %7712 = vrot.lane.b32.xlu0 %v7709_v46, %s8514_s6  ;;  %5179 = vrot.lane.b32.xlu1 %v5172_v47, %s8510_s28 }
 0x430   : > { %5824 = vrot.lane.b32.xlu0 %v5817_v52, %s8508_s26  ;;  %5826 = vrot.lane.b32.xlu1 %v5811_v53, %s8508_s26  ;;  %v6682_v52 = vcombine.high %v6675_v48, %v6675_v48  ;;  %v6466_v53 = vcombine.high %v6459_v49, %v6459_v49 }
 0x434   : > { %6089 = vrot.lane.b32.xlu0 %v6077_v56, %s8513_s5  ;;  %7710 = vrot.lane.b32.xlu1 %v7708_v41, %s8514_s6  ;;  %v6467_v41 = vcombine.high %v6460_v8, %v6460_v8 }
 0x438   : > { %6093 = vrot.lane.b32.xlu0 %v6078_v61, %s8513_s5  ;;  %5609 = vrot.lane.b32.xlu1 %v5602_v12, %s8507_s25  ;;  %v9424_v12 = vmul.f32 %v7071_v10, %v9239_v37 }
 0x43c   : > { %6257 = vrot.lane.b32.xlu0 %v6040_v17, %s8514_s6  ;;  %6085 = vrot.lane.b32.xlu1 %v6076_v27, %s8513_s5 }
 0x440   : > { %6259 = vrot.lane.b32.xlu0 %v6255_v15, %s8514_s6  ;;  %6261 = vrot.lane.b32.xlu1 %v6041_v63, %s8514_s6 }
 0x444   : > { %6263 = vrot.lane.b32.xlu0 %v6256_v23, %s8514_s6  ;;  %6087 = vrot.lane.b32.xlu1 %v6083_v7, %s8513_s5 }
 0x448   : > { %6472 = vrot.lane.b32.xlu0 %v6460_v8, %s8512_s30  ;;  %6091 = vrot.lane.b32.xlu1 %v6084_v30, %s8513_s5 }
 0x44c   : > { %6476 = vrot.lane.b32.xlu0 %v6461_v34, %s8512_s30  ;;  %6265 = vrot.lane.b32.xlu1 %v6042_v42, %s8514_s6 }
 0x44e   : > { %v4345_v46 = vpop.permute.xlu0 %4344  ;;  %v4173_v47 = vpop.permute.xlu1 %4172 }
 0x450   : > { %6685 = vrot.lane.b32.xlu0 %v6681_v45, %s8511_s29  ;;  %6468 = vrot.lane.b32.xlu1 %v6459_v49, %s8512_s30  ;;  %v4965_v45 = vmul.f32 %v4961_v32, %v9237_v36 }
 0x452   : > { %v9406_v50 = vpop.permute.xlu0 %4770  ;;  %v4556_v51 = vpop.permute.xlu1 %4555 }
 0x454   : > { %6689 = vrot.lane.b32.xlu0 %v6682_v52, %s8511_s29  ;;  %6470 = vrot.lane.b32.xlu1 %v6466_v53, %s8512_s30 }
 0x456   : > { %v4177_v9 = vpop.permute.xlu0 %4176  ;;  %v9410_v55 = vpop.permute.xlu1 %5173 }
 0x458   : > { %6683 = vrot.lane.b32.xlu0 %v6674_v35, %s8511_s29  ;;  %6474 = vrot.lane.b32.xlu1 %v6467_v41, %s8512_s30  ;;  %v4960_v41 = vrot.slane %v8224_v22, %v8570_v6 }
 0x45a   : > { %v4181_v54 = vpop.permute.xlu0 %4180  ;;  %v4349_v56 = vpop.permute.xlu1 %4348 }
 0x45c   : > { %6687 = vrot.lane.b32.xlu1 %v6675_v48, %s8511_s29 }
 0x45e   : > { %v9416_v59 = vpop.permute.xlu0 %4559  ;;  %v4353_v61 = vpop.permute.xlu1 %4352 }
 0x460   : > { %6691 = vrot.lane.b32.xlu1 %v6676_v60, %s8511_s29 }
 0x462   : > { %v9421_v11 = vpop.permute.xlu0 %4563  ;;  %v9426_v13 = vpop.permute.xlu1 %4774 }
 0x464   : > { %7086 = vrot.lane.b32.xlu1 %v9424_v12, %s8510_s28 }
 0x466   : > { %v9430_v14 = vpop.permute.xlu0 %5177  ;;  %v9432_v16 = vpop.permute.xlu1 %4778 }
 0x46a   : > { %v4347_v17 = vpop.permute.xlu0 %4346  ;;  %v4175_v18 = vpop.permute.xlu1 %4174 }
 0x46b   : > { %v4182_v27 = vsel %vm319_vm7, %v4173_v47, %v4175_v18  ;;  %v4183_v62 = vsel %vm319_vm7, %v4175_v18, %v4177_v9  ;;  %v4355_v20 = vsel %vm493_vm8, %v4347_v17, %v4349_v56  ;;  %v4354_v21 = vsel %vm493_vm8, %v4345_v46, %v4347_v17  ;;  %v8209_v47 = vld [vmem:[%s9827_s2 + $0x3c] sm:$0xf] }
 0x46c   : > { %8196 = vmatprep.subr.msk.mxu0 %vm255_vm1, %v4183_v62 }
 0x46d   : > { %8197 = vmatpush1.msk.msra.mxu0 %vm255_vm1, %v4182_v27 }
 0x46e   : > { %v4773_v15 = vpop.permute.xlu0 %4772  ;;  %8198 = vmatmul.mubr.msk.f32.vlgmr.msra.gmra.mrb[4].mxu0 %vm324_vm9, %v8195_v58  ;;  %8202 = vmatprep.subr.msk.mxu0 %vm255_vm1, %v4355_v20  ;;  %v4558_v63 = vpop.permute.xlu1 %4557 }
 0x46f   : > { %v4566_v19 = vsel %vm708_vm6, %v4558_v63, %v9416_v59  ;;  %8203 = vmatpush1.msk.msra.mxu0 %vm255_vm1, %v4354_v21  ;;  %4433 = vmatprep.mubr.f32.mxu0 %v8506_v1  ;;  %v4565_v30 = vsel %vm708_vm6, %v4556_v51, %v4558_v63  ;;  %v4781_v33 = vsel %vm927_vm5, %v4773_v15, %v9426_v13 }
 0x470   : > { %8210 = vmatprep.subr.msk.mxu0 %vm255_vm1, %v4566_v19  ;;  %v4956_v51 = vrot.slane %v8224_v22, %v8567_v5  ;;  %v4780_v52 = vsel %vm927_vm5, %v9406_v50, %v4773_v15 }
 0x472   : > { %v4351_v23 = vpop.permute.xlu0 %4350  ;;  %v9451_v7 = vpop.permute.xlu1 %5175 }
 0x473   : > { %v4357_v38 = vsel %vm493_vm8, %v4351_v23, %v4353_v61  ;;  %v4356_v43 = vsel %vm493_vm8, %v4349_v56, %v4351_v23  ;;  %v7044_v56 = vld [vmem:[#allocation2 + $0x14] sm:$0xf]  ;;  %v5184_v27 = vsel %vm900_vm4, %v9451_v7, %v9430_v14  ;;  %v5183_v23 = vsel %vm900_vm4, %v9410_v55, %v9451_v7 }
 0x474   : > { %v8217_v61 = vld [vmem:[%s9827_s2 + $0x54] sm:$0xf] }
 0x476   : > { %v9458_v8 = vpop.permute.xlu0 %5390  ;;  %8204 = vmatmul.mubr.msk.f32.vlgmr.msra.gmra.mrb[4].mxu0 %vm324_vm9, %v4130_v26  ;;  %v4179_v31 = vpop.permute.xlu1 %4178 }
 0x477   : > { %8211 = vmatpush1.msk.msra.mxu0 %vm255_vm1, %v4565_v30  ;;  %v4184_v34 = vsel %vm319_vm7, %v4177_v9, %v4179_v31  ;;  %v4185_v35 = vsel %vm319_vm7, %v4179_v31, %v4181_v54  ;;  %4644 = vmatprep.mubr.f32.mxu0 %v8506_v1  ;;  %v4970_v9 = vcombine.high %v4965_v45, %v4965_v45 }
 0x478   : > { %8218 = vmatprep.subr.msk.mxu0 %vm255_vm1, %v4781_v33  ;;  %8199 = vmatprep.subr.msk.mxu1 %vm255_vm1, %v4185_v35  ;;  %v7084_v33 = vcombine.high %v9424_v12, %v9424_v12 }
 0x479   : > { %8200 = vmatpush1.msk.msra.mxu1 %vm255_vm1, %v4184_v34  ;;  %v8233_v34 = vld [vmem:[%s9827_s2 + $0x84] sm:$0xf] }
 0x47a   : > { %v9472_v42 = vpop.permute.xlu0 %5388  ;;  %8201 = vmatmul.mubr.msk.f32.vlgmr.msra.gmra.mrb[4].mxu1 %vm324_vm9, %v8195_v58  ;;  %8205 = vmatprep.subr.msk.mxu1 %vm255_vm1, %v4357_v38  ;;  %v7068_v44 = vpop.permute.xlu1 %7067 }
 0x47b   : > { %v7070_v46 = vrot.slane %v7068_v44, 4  ;;  %8206 = vmatpush1.msk.msra.mxu1 %vm255_vm1, %v4356_v43  ;;  %4504 = vmatprep.mubr.f32.mxu1 %v8506_v1  ;;  %v5398_v38 = vsel %vm681_vm3, %v9472_v42, %v9458_v8 }
 0x47d   : > { %v7072_v48 = vsel %vm255_vm1, %v7069_v28, %v7070_v46  ;;  %v4962_v28 = vcombine.low %v4956_v51, %v4960_v41  ;;  %v7079_v60 = vmul.f32 %v7070_v46, %v7044_v56 }
 0x47e   : > { %v9484_v49 = vpop.permute.xlu0 %7282  ;;  %v7073_v36 = vsel %vm927_vm5, %v7072_v48, %v7068_v44  ;;  %8212 = vmatmul.mubr.msk.f32.vlgmr.msra.gmra.mrb[4].mxu0 %vm324_vm9, %v8209_v47  ;;  %v9491_v53 = vpop.permute.xlu1 %5392  ;;  %v7259_v48 = vld [vmem:[#allocation2 + $0x14] sm:$0xf] }
 0x47f   : > { %v9495_v54 = vmul.f32 %v7073_v36, %v9244_v40  ;;  %8219 = vmatpush1.msk.msra.mxu0 %vm255_vm1, %v4780_v52  ;;  %4859 = vmatprep.mubr.f32.mxu0 %v8506_v1  ;;  %v4966_v18 = vmul.f32 %v4962_v28, %v9242_v39  ;;  %v7285_v39 = vrot.slane %v9484_v49, 4  ;;  %v5399_v30 = vsel %vm681_vm3, %v9458_v8, %v9491_v53 }
 0x480   : > { %8226 = vmatprep.subr.msk.mxu0 %vm255_vm1, %v4970_v9  ;;  %v7474_v9 = vld [vmem:[#allocation2 + $0x14] sm:$0xf] }
 0x481   : > { %7090 = vrot.lane.b32.xlu0 %v9495_v54, %s8510_s28  ;;  %v4971_v21 = vcombine.high %v4966_v18, %v4966_v18  ;;  %v7085_v44 = vcombine.high %v9495_v54, %v9495_v54  ;;  %v7294_v52 = vmul.f32 %v7285_v39, %v7259_v48  ;;  %v8241_v54 = vld [vmem:[%s9827_s2 + $0x9c] sm:$0xf] }
 0x482   : > { %v4777_v50 = vpop.permute.xlu0 %4776  ;;  %8207 = vmatmul.mubr.msk.f32.vlgmr.msra.gmra.mrb[4].mxu1 %vm324_vm9, %v4130_v26  ;;  %v9503_v57 = vpop.permute.xlu1 %5396 }
 0x483   : > { %4715 = vmatprep.mubr.f32.mxu1 %v8506_v1  ;;  %v4783_v20 = vsel %vm927_vm5, %v4777_v50, %v9432_v16  ;;  %v8225_v16 = vld [vmem:[%s9827_s2 + $0x6c] sm:$0xf] }
 0x485   : > { %7094 = vrot.lane.b32.xlu0 %v7079_v60, %s8510_s28 }
 0x486   : > { %v9510_v10 = vpop.permute.xlu0 %5607  ;;  %8220 = vmatmul.mubr.msk.f32.vlgmr.msra.gmra.mrb[4].mxu0 %vm324_vm9, %v8217_v61  ;;  %v4562_v17 = vpop.permute.xlu1 %4561 }
 0x487   : > { %8227 = vmatpush1.msk.msra.mxu0 %vm255_vm1, %v4965_v45  ;;  %v4567_v62 = vsel %vm708_vm6, %v9416_v59, %v4562_v17  ;;  %v4568_v58 = vsel %vm708_vm6, %v4562_v17, %v9421_v11  ;;  %5047 = vmatprep.mubr.f32.mxu0 %v8506_v1  ;;  %v4782_v59 = vsel %vm927_vm5, %v9426_v13, %v4777_v50 }
 0x488   : > { %8234 = vmatprep.subr.msk.mxu0 %vm255_vm1, %v5184_v27  ;;  %8213 = vmatprep.subr.msk.mxu1 %vm255_vm1, %v4568_v58 }
 0x489   : > { %8214 = vmatpush1.msk.msra.mxu1 %vm255_vm1, %v4567_v62 }
 0x48a   : > { %v9529_v15 = vpop.permute.xlu0 %5611  ;;  %8215 = vmatmul.mubr.msk.f32.vlgmr.msra.gmra.mrb[4].mxu1 %vm324_vm9, %v8209_v47  ;;  %8221 = vmatprep.subr.msk.mxu1 %vm255_vm1, %v4783_v20  ;;  %v7281_v11 = vpop.permute.xlu1 %7280  ;;  %v8249_v20 = vld [vmem:[%s9827_s2 + $0xb4] sm:$0xf] }
 0x48b   : > { %v7284_v63 = vrot.slane %v7281_v11, 4  ;;  %8222 = vmatpush1.msk.msra.mxu1 %vm255_vm1, %v4782_v59  ;;  %4930 = vmatprep.mubr.f32.mxu1 %v8506_v1 }
 0x48c   : > { %8229 = vmatprep.subr.msk.mxu1 %vm255_vm1, %v4971_v21 }
 0x48d   : > { %v7286_v19 = vsel %vm708_vm6, %v7284_v63, %v7281_v11  ;;  %v7287_v13 = vsel %vm255_vm1, %v7284_v63, %v7285_v39 }
 0x48e   : > { %v7496_v22 = vpop.permute.xlu0 %7495  ;;  %v7292_v24 = vmul.f32 %v7286_v19, %v9239_v37  ;;  %8228 = vmatmul.mubr.msk.f32.vlgmr.msra.gmra.mrb[4].mxu0 %vm324_vm9, %v8225_v16  ;;  %v5606_v25 = vpop.permute.xlu1 %5605  ;;  %v7288_v26 = vsel %vm708_vm6, %v7287_v13, %v9484_v49 }
 0x48f   : > { %8235 = vmatpush1.msk.msra.mxu0 %vm255_vm1, %v5183_v23  ;;  %v7293_v31 = vmul.f32 %v7288_v26, %v9244_v40  ;;  %5262 = vmatprep.mubr.f32.mxu0 %v8506_v1  ;;  %v7499_v45 = vrot.slane %v7496_v22, 4  ;;  %v5614_v46 = vsel %vm292_vm0, %v5606_v25, %v9510_v10 }
 0x490   : > { %8242 = vmatprep.subr.msk.mxu0 %vm255_vm1, %v5399_v30  ;;  %7301 = vrot.lane.b32.xlu0 %v7292_v24, %s8509_s27  ;;  %v7299_v7 = vcombine.high %v7292_v24, %v7292_v24 }
 0x491   : > { %7305 = vrot.lane.b32.xlu1 %v7293_v31, %s8509_s27  ;;  %v7300_v43 = vcombine.high %v7293_v31, %v7293_v31  ;;  %v7501_v36 = vsel %vm319_vm7, %v7499_v45, %v7496_v22  ;;  %v8257_v31 = vld [vmem:[%s9827_s2 + $0xcc] sm:$0xf] }
 0x492   : > { %v9559_v55 = vpop.permute.xlu0 %5820  ;;  %8223 = vmatmul.mubr.msk.f32.vlgmr.msra.gmra.mrb[4].mxu1 %vm324_vm9, %v8217_v61  ;;  %v5604_v32 = vpop.permute.xlu1 %5603  ;;  %v7507_v50 = vmul.f32 %v7501_v36, %v9239_v37 }
 0x493   : > { %8230 = vmatpush1.msk.msra.mxu1 %vm255_vm1, %v4966_v18  ;;  %5118 = vmatprep.mubr.f32.mxu1 %v8506_v1  ;;  %v5613_v28 = vsel %vm292_vm0, %v5604_v32, %v5606_v25 }
 0x494   : > { %7303 = vrot.lane.b32.xlu0 %v7299_v7, %s8509_s27  ;;  %v7514_v39 = vcombine.high %v7507_v50, %v7507_v50 }
 0x495   : > { %7088 = vrot.lane.b32.xlu1 %v7084_v33, %s8510_s28 }
 0x496   : > { %v5819_v35 = vpop.permute.xlu0 %5818  ;;  %8236 = vmatmul.mubr.msk.f32.vlgmr.msra.gmra.mrb[4].mxu0 %vm324_vm9, %v8233_v34  ;;  %v7498_v12 = vpop.permute.xlu1 %7497 }
 0x497   : > { %8243 = vmatpush1.msk.msra.mxu0 %vm255_vm1, %v5398_v38  ;;  %v7500_v47 = vrot.slane %v7498_v12, 4  ;;  %5477 = vmatprep.mubr.f32.mxu0 %v8506_v1  ;;  %v5828_v11 = vsel %vm253_vm2, %v5819_v35, %v9559_v55 }
 0x498   : > { %8250 = vmatprep.subr.msk.mxu0 %vm255_vm1, %v5614_v46  ;;  %7307 = vrot.lane.b32.xlu0 %v7300_v43, %s8509_s27  ;;  %v8265_v46 = vld [vmem:[%s9827_s2 + $0x28] sm:$0x1f] }
 0x499   : > { %v7502_v8 = vsel %vm255_vm1, %v7499_v45, %v7500_v47  ;;  %7092 = vrot.lane.b32.xlu1 %v7085_v44, %s8510_s28  ;;  %v7509_v60 = vmul.f32 %v7500_v47, %v7474_v9  ;;  %v5989_v45 = vld [vmem:[%s9828_s3 + $0xc] sm:$0xf] }
 0x49a   : > { %v5395_v42 = vpop.permute.xlu0 %5394  ;;  %v7503_v49 = vsel %vm319_vm7, %v7502_v8, %v7498_v12  ;;  %8231 = vmatmul.mubr.msk.f32.vlgmr.msra.gmra.mrb[4].mxu1 %vm324_vm9, %v8225_v16  ;;  %v9587_v51 = vpop.permute.xlu1 %5822 }
 0x49b   : > { %v7508_v41 = vmul.f32 %v7503_v49, %v9244_v40  ;;  %5333 = vmatprep.mubr.f32.mxu1 %v8506_v1  ;;  %v5829_v17 = vsel %vm253_vm2, %v9559_v55, %v9587_v51  ;;  %v5401_v58 = vsel %vm681_vm3, %v5395_v42, %v9503_v57  ;;  %v7689_v55 = vld [vmem:[#allocation2 + $0x14] sm:$0xf] }
 0x49d   : > { %7309 = vrot.lane.b32.xlu1 %v7294_v52, %s8509_s27  ;;  %7520 = vrot.lane.b32.xlu0 %v7508_v41, %s8507_s25  ;;  %v7515_v21 = vcombine.high %v7508_v41, %v7508_v41  ;;  %v7902_v52 = vld [vmem:[%s9828_s3 + $0x10] sm:$0x1f] }
 0x49e   : > { %v7713_v56 = vpop.permute.xlu0 %7712  ;;  %8244 = vmatmul.mubr.msk.f32.vlgmr.msra.gmra.mrb[4].mxu0 %vm324_vm9, %v8241_v54  ;;  %v5180_v61 = vpop.permute.xlu1 %5179 }
 0x49f   : > { %8251 = vmatpush1.msk.msra.mxu0 %vm255_vm1, %v5613_v28  ;;  %v5185_v18 = vsel %vm900_vm4, %v9430_v14, %v5180_v61  ;;  %v5186_v27 = vsel %vm900_vm4, %v5180_v61, %v9388_v29  ;;  %5692 = vmatprep.mubr.f32.mxu0 %v8506_v1  ;;  %v5400_v29 = vsel %vm681_vm3, %v9491_v53, %v5395_v42  ;;  %v7715_v57 = vrot.slane %v7713_v56, 4  ;;  %v8294_v28 = vld [vmem:[%s8577_s20 + $0x4] ss:$8 sm:$0xf] }
 0x4a0   : > { %8258 = vmatprep.subr.msk.mxu0 %vm255_vm1, %v5829_v17  ;;  %8237 = vmatprep.subr.msk.mxu1 %vm255_vm1, %v5186_v27  ;;  %v6861_v61 = vrot.slane %v8294_v28, %v8561_v3  ;;  %v6865_v17 = vrot.slane %v8294_v28, %v8564_v4  ;;  %v6869_v3 = vrot.slane %v8294_v28, %v8567_v5  ;;  %v6855_v5 = vld [vmem:[#allocation2 + $0xc] sm:$0xff] }
 0x4a1   : > { %7516 = vrot.lane.b32.xlu1 %v7507_v50, %s8507_s25  ;;  %7524 = vrot.lane.b32.xlu0 %v7509_v60, %s8507_s25  ;;  %v6873_v4 = vrot.slane %v8294_v28, %v8570_v6 }
 0x4a2   : > { %v5825_v62 = vpop.permute.xlu0 %5824  ;;  %8238 = vmatpush1.msk.msra.mxu1 %vm255_vm1, %v5185_v18  ;;  %v5827_v14 = vpop.permute.xlu1 %5826 }
 0x4a3   : > { %8239 = vmatmul.mubr.msk.f32.vlgmr.msra.gmra.mrb[4].mxu1 %vm324_vm9, %v8233_v34  ;;  %8245 = vmatprep.subr.msk.mxu1 %vm255_vm1, %v5401_v58  ;;  %v5830_v35 = vsel %vm253_vm2, %v9587_v51, %v5825_v62 }
 0x4a4   : > { %8246 = vmatpush1.msk.msra.mxu1 %vm255_vm1, %v5400_v29  ;;  %5548 = vmatprep.mubr.f32.mxu1 %v8506_v1 }
 0x4a5   : > { %7518 = vrot.lane.b32.xlu1 %v7514_v39, %s8507_s25  ;;  %v6874_v39 = vcombine.low %v6861_v61, %v6865_v17 }
 0x4a6   : > { %v6090_v59 = vpop.permute.xlu0 %6089  ;;  %8252 = vmatmul.mubr.msk.f32.vlgmr.msra.gmra.mrb[4].mxu0 %vm324_vm9, %v8249_v20  ;;  %v7711_v53 = vpop.permute.xlu1 %7710 }
 0x4a7   : > { %8259 = vmatpush1.msk.msra.mxu0 %vm255_vm1, %v5828_v11  ;;  %v7714_v63 = vrot.slane %v7711_v53, 4  ;;  %5907 = vmatprep.mubr.f32.mxu0 %v8506_v1 }
 0x4a9   : > { %v7716_v16 = vsel %vm493_vm8, %v7714_v63, %v7711_v53  ;;  %v7717_v19 = vsel %vm255_vm1, %v7714_v63, %v7715_v57  ;;  %7522 = vrot.lane.b32.xlu1 %v7515_v21, %s8507_s25  ;;  %v6875_v53 = vcombine.low %v6869_v3, %v6873_v4 }
 0x4aa   : > { %v6094_v13 = vpop.permute.xlu0 %6093  ;;  %v7722_v22 = vmul.f32 %v7716_v16, %v9239_v37  ;;  %v5610_v23 = vpop.permute.xlu1 %5609  ;;  %v7718_v24 = vsel %vm493_vm8, %v7717_v19, %v7713_v56  ;;  %v6043_v56 = vld [vmem:[%s9827_s2 + $0x10] sm:$0x1f] }
 0x4ab   : > { %8247 = vmatmul.mubr.msk.f32.vlgmr.msra.gmra.mrb[4].mxu1 %vm324_vm9, %v8241_v54  ;;  %v5615_v25 = vsel %vm292_vm0, %v9510_v10, %v5610_v23  ;;  %v5616_v26 = vsel %vm292_vm0, %v5610_v23, %v9529_v15  ;;  %v7723_v30 = vmul.f32 %v7718_v24, %v9244_v40  ;;  %v5831_v10 = vsel %vm253_vm2, %v5825_v62, %v5827_v14  ;;  %v8279_v14 = vld [vmem:[%s9827_s2 + $0x40] sm:$0x1f] }
 0x4ac   : > { %v7729_v7 = vcombine.high %v7722_v22, %v7722_v22  ;;  %8253 = vmatprep.subr.msk.mxu1 %vm255_vm1, %v5616_v26  ;;  %5763 = vmatprep.mubr.f32.mxu1 %v8506_v1  ;;  %v7724_v15 = vmul.f32 %v7715_v57, %v7689_v55 }
 0x4ad   : > { %7735 = vrot.lane.b32.xlu1 %v7723_v30, %s8508_s26  ;;  %8254 = vmatpush1.msk.msra.mxu1 %vm255_vm1, %v5615_v25  ;;  %v7730_v32 = vcombine.high %v7723_v30, %v7723_v30  ;;  %v8295_v30 = vld [vmem:[%s9827_s2 + $0x70] sm:$0x1f] }
 0x4ae   : > { %v6258_v37 = vpop.permute.xlu0 %6257  ;;  %8260 = vmatmul.mubr.msk.f32.vlgmr.msra.gmra.mrb[4].mxu0 %vm324_vm9, %v8257_v31  ;;  %7733 = vrot.lane.b32.xlu0 %v7729_v7, %s8508_s26  ;;  %v6086_v40 = vpop.permute.xlu1 %6085 }
 0x4af   : > { %8261 = vmatprep.subr.msk.mxu1 %vm255_vm1, %v5831_v10  ;;  %6174 = vmatprep.mubr.f32.mxu0 %v8506_v1 }
 0x4b1   : > { %7739 = vrot.lane.b32.xlu1 %v7724_v15, %s8508_s26 }
 0x4b2   : > { %v6260_v33 = vpop.permute.xlu0 %6259  ;;  %7737 = vrot.lane.b32.xlu0 %v7730_v32, %s8508_s26  ;;  %v6262_v34 = vpop.permute.xlu1 %6261 }
 0x4b3   : > { %8255 = vmatmul.mubr.msk.f32.vlgmr.msra.gmra.mrb[4].mxu1 %vm324_vm9, %v8249_v20  ;;  %v6268_v47 = vsel %vm493_vm8, %v6260_v33, %v6262_v34  ;;  %v6267_v42 = vsel %vm493_vm8, %v6258_v37, %v6260_v33 }
 0x4b4   : > { %8262 = vmatpush1.msk.msra.mxu1 %vm255_vm1, %v5830_v35  ;;  %5978 = vmatprep.mubr.f32.mxu1 %v8506_v1 }
 0x4b5   : > { %7905 = vperm.xlu1 %8488, %v7902_v52  }
 0x4b6   : > { %v6264_v38 = vpop.permute.xlu0 %6263  ;;  %7731 = vrot.lane.b32.xlu0 %v7722_v22, %s8508_s26  ;;  %v6088_v12 = vpop.permute.xlu1 %6087  ;;  %v6879_v22 = vmul.f32 %v6875_v53, %v6855_v5 }
 0x4b7   : > { %v6095_v43 = vsel %vm319_vm7, %v6086_v40, %v6088_v12  ;;  %v6096_v44 = vsel %vm319_vm7, %v6088_v12, %v6090_v59  ;;  %v6269_v54 = vsel %vm493_vm8, %v6262_v34, %v6264_v38  ;;  %v8303_v34 = vld [vmem:[%s9827_s2 + $0x88] sm:$0x1f] }
 0x4b8   : > { %8266 = vmatprep.subr.msk.mxu0 %vm255_vm1, %v6096_v44  ;;  %v6884_v26 = vcombine.high %v6879_v22, %v6879_v22 }
 0x4b9   : > { %8267 = vmatpush1.msk.msra.mxu0 %vm255_vm1, %v6095_v43 }
 0x4ba   : > { %v6473_v48 = vpop.permute.xlu0 %6472  ;;  %5992 = vperm.xlu0 %8487, %v5989_v45   ;;  %8272 = vmatprep.subr.msk.mxu0 %vm255_vm1, %v6268_v47  ;;  %v6092_v8 = vpop.permute.xlu1 %6091 }
 0x4bb   : > { %8263 = vmatmul.mubr.msk.f32.vlgmr.msra.gmra.mrb[4].mxu1 %vm324_vm9, %v8257_v31  ;;  %v6097_v49 = vsel %vm319_vm7, %v6090_v59, %v6092_v8  ;;  %v6098_v51 = vsel %vm319_vm7, %v6092_v8, %v6094_v13  ;;  %8268 = vmatmul.mubr.msk.f32.vlgmr.msra.gmra.mrb[6].mxu0 %vm324_vm9, %v8265_v46  ;;  %v8497_v59 = vld [vmem:[#allocation2 + $0x4] sm:$0xff]  ;;  %v8287_v13 = vld [vmem:[%s9827_s2 + $0x58] sm:$0x1f] }
 0x4bc   : > { %8273 = vmatpush1.msk.msra.mxu0 %vm255_vm1, %v6267_v42  ;;  %8269 = vmatprep.subr.msk.mxu1 %vm255_vm1, %v6098_v51  ;;  %v6878_v11 = vmul.f32 %v8497_v59, %v6874_v39  ;;  %v8311_v8 = vld [vmem:[%s9827_s2 + $0xa0] sm:$0x1f] }
 0x4bd   : > { %8270 = vmatpush1.msk.msra.mxu1 %vm255_vm1, %v6097_v49  ;;  %6245 = vmatprep.mubr.f32.mxu1 %v8506_v1 }
 0x4be   : > { %v6477_v36 = vpop.permute.xlu0 %6476  ;;  %v6266_v9 = vpop.permute.xlu1 %6265  ;;  %6346 = vmatprep.mubr.f32.mxu0 %v8506_v1  ;;  %v6883_v19 = vcombine.high %v6878_v11, %v6878_v11 }
 0x4bf   : > { %v6270_v41 = vsel %vm493_vm8, %v6264_v38, %v6266_v9  ;;  %8271 = vmatmul.mubr.msk.f32.vlgmr.msra.gmra.mrb[6].mxu1 %vm324_vm9, %v8265_v46  ;;  %v8319_v9 = vld [vmem:[%s9827_s2 + $0xb8] sm:$0x1f] }
 0x4c0   : > { %8275 = vmatprep.subr.msk.mxu1 %vm255_vm1, %v6270_v41  ;;  %6417 = vmatprep.mubr.f32.mxu1 %v8506_v1 }
 0x4c1   : > { %8276 = vmatpush1.msk.msra.mxu1 %vm255_vm1, %v6269_v54 }
 0x4c2   : > { %v6686_v50 = vpop.permute.xlu0 %6685  ;;  %v6469_v60 = vpop.permute.xlu1 %6468 }
 0x4c3   : > { %8274 = vmatmul.mubr.msk.f32.vlgmr.msra.gmra.mrb[6].mxu0 %vm324_vm9, %v6043_v56 }
 0x4c4   : > { %6557 = vmatprep.mubr.f32.mxu0 %v8506_v1 }
 0x4c6   : > { %v6471_v18 = vpop.permute.xlu1 %6470  ;;  %v6690_v27 = vpop.permute.xlu0 %6689 }
 0x4c7   : > { %v6478_v62 = vsel %vm708_vm6, %v6469_v60, %v6471_v18  ;;  %v6479_v58 = vsel %vm708_vm6, %v6471_v18, %v6473_v48  ;;  %8277 = vmatmul.mubr.msk.f32.vlgmr.msra.gmra.mrb[6].mxu1 %vm324_vm9, %v6043_v56 }
 0x4c8   : > { %8280 = vmatprep.subr.msk.mxu0 %vm255_vm1, %v6479_v58  ;;  %6628 = vmatprep.mubr.f32.mxu1 %v8506_v1  ;;  %v8327_v58 = vld [vmem:[%s9827_s2 + $0xd0] sm:$0x1f] }
 0x4c9   : > { %8281 = vmatpush1.msk.msra.mxu0 %vm255_vm1, %v6478_v62 }
 0x4ca   : > { %v6475_v29 = vpop.permute.xlu1 %6474  ;;  %v6684_v21 = vpop.permute.xlu0 %6683 }
 0x4cb   : > { %v6480_v20 = vsel %vm708_vm6, %v6473_v48, %v6475_v29  ;;  %v6481_v57 = vsel %vm708_vm6, %v6475_v29, %v6477_v36  ;;  %8282 = vmatmul.mubr.msk.f32.vlgmr.msra.gmra.mrb[6].mxu0 %vm324_vm9, %v8279_v14  ;;  %v6693_v16 = vsel %vm927_vm5, %v6684_v21, %v6686_v50  ;;  %v8516_v21 = vmov 1966171168  }
 0x4cc   : > { %8283 = vmatprep.subr.msk.mxu1 %vm255_vm1, %v6481_v57  ;;  %6772 = vmatprep.mubr.f32.mxu0 %v8506_v1  ;;  %v7947_v5 = vunpack.c.l.s4 %v8516_v21 }
 0x4cd   : > { %8284 = vmatpush1.msk.msra.mxu1 %vm255_vm1, %v6480_v20 }
 0x4ce   : > { %v6688_v6 = vpop.permute.xlu1 %6687 }
 0x4cf   : > { %v6694_v63 = vsel %vm927_vm5, %v6686_v50, %v6688_v6  ;;  %8285 = vmatmul.mubr.msk.f32.vlgmr.msra.gmra.mrb[6].mxu1 %vm324_vm9, %v8279_v14  ;;  %v6695_v25 = vsel %vm927_vm5, %v6688_v6, %v6690_v27 }
 0x4d0   : > { %8288 = vmatprep.subr.msk.mxu0 %vm255_vm1, %v6694_v63  ;;  %6843 = vmatprep.mubr.f32.mxu1 %v8506_v1 }
 0x4d1   : > { %8289 = vmatpush1.msk.msra.mxu0 %vm255_vm1, %v6693_v16 }
 0x4d2   : > { %8296 = vmatprep.subr.msk.mxu0 %vm255_vm1, %v6883_v19  ;;  %v6692_v23 = vpop.permute.xlu1 %6691 }
 0x4d3   : > { %v6696_v24 = vsel %vm927_vm5, %v6690_v27, %v6692_v23  ;;  %8290 = vmatmul.mubr.msk.f32.vlgmr.msra.gmra.mrb[6].mxu0 %vm324_vm9, %v8287_v13 }
 0x4d4   : > { %8297 = vmatpush1.msk.msra.mxu0 %vm255_vm1, %v6878_v11  ;;  %8291 = vmatprep.subr.msk.mxu1 %vm255_vm1, %v6696_v24 }
 0x4d5   : > { %8292 = vmatpush1.msk.msra.mxu1 %vm255_vm1, %v6695_v25  ;;  %6960 = vmatprep.mubr.f32.mxu0 %v8506_v1 }
 0x4d6   : > { %8299 = vmatprep.subr.msk.mxu1 %vm255_vm1, %v6884_v26  ;;  %v7087_v7 = vpop.permute.xlu1 %7086 }
 0x4d7   : > { %8293 = vmatmul.mubr.msk.f32.vlgmr.msra.gmra.mrb[6].mxu1 %vm324_vm9, %v8287_v13  ;;  %v7948_v13 = vunpack.c.0.s8 %v7947_v5 }
 0x4d8   : > { %8300 = vmatpush1.msk.msra.mxu1 %vm255_vm1, %v6879_v22  ;;  %7031 = vmatprep.mubr.f32.mxu1 %v8506_v1 }
 0x4db   : > { %8298 = vmatmul.mubr.msk.f32.vlgmr.msra.gmra.mrb[6].mxu0 %vm324_vm9, %v8295_v30 }
 0x4dc   : > { %7175 = vmatprep.mubr.f32.mxu0 %v8506_v1 }
 0x4df   : > { %8301 = vmatmul.mubr.msk.f32.vlgmr.msra.gmra.mrb[6].mxu1 %vm324_vm9, %v8295_v30 }
 0x4e0   : > { %7246 = vmatprep.mubr.f32.mxu1 %v8506_v1 }
 0x4f3   : > { %v7091_v31 = vpop.permute.xlu0 %7090 }
 0x4f7   : > { %v7095_v55 = vpop.permute.xlu0 %7094 }
 0x502   : > { %v7302_v37 = vpop.permute.xlu0 %7301 }
 0x503   : > { %v7306_v10 = vpop.permute.xlu1 %7305 }
 0x506   : > { %v7304_v40 = vpop.permute.xlu0 %7303 }
 0x507   : > { %v7089_v15 = vpop.permute.xlu1 %7088  ;;  %v7312_v35 = vsel %vm681_vm3, %v7304_v40, %v7306_v10  ;;  %v7311_v38 = vsel %vm681_vm3, %v7302_v37, %v7304_v40 }
 0x508   : > { %v7096_v32 = vsel %vm900_vm4, %v7087_v7, %v7089_v15  ;;  %v7097_v33 = vsel %vm900_vm4, %v7089_v15, %v7091_v31 }
 0x509   : > { %8304 = vmatprep.subr.msk.mxu0 %vm255_vm1, %v7097_v33 }
 0x50a   : > { %8305 = vmatpush1.msk.msra.mxu0 %vm255_vm1, %v7096_v32  ;;  %v7308_v45 = vpop.permute.xlu0 %7307 }
 0x50b   : > { %8312 = vmatprep.subr.msk.mxu0 %vm255_vm1, %v7312_v35  ;;  %v7093_v12 = vpop.permute.xlu1 %7092  ;;  %8306 = vmatmul.mubr.msk.f32.vlgmr.msra.gmra.mrb[6].mxu0 %vm324_vm9, %v8303_v34  ;;  %v7313_v48 = vsel %vm681_vm3, %v7306_v10, %v7308_v45 }
 0x50c   : > { %v7098_v43 = vsel %vm900_vm4, %v7091_v31, %v7093_v12  ;;  %v7099_v44 = vsel %vm900_vm4, %v7093_v12, %v7095_v55  ;;  %8313 = vmatpush1.msk.msra.mxu0 %vm255_vm1, %v7311_v38  ;;  %7390 = vmatprep.mubr.f32.mxu0 %v8506_v1  ;;  %v7951_v55 = vsub.s32 %v7948_v13, %v8557_v2 }
 0x50d   : > { %8307 = vmatprep.subr.msk.mxu1 %vm255_vm1, %v7099_v44 }
 0x50e   : > { %8308 = vmatpush1.msk.msra.mxu1 %vm255_vm1, %v7098_v43 }
 0x50f   : > { %v7310_v46 = vpop.permute.xlu1 %7309  ;;  %8309 = vmatmul.mubr.msk.f32.vlgmr.msra.gmra.mrb[6].mxu1 %vm324_vm9, %v8303_v34  ;;  %v7521_v49 = vpop.permute.xlu0 %7520 }
 0x510   : > { %v7314_v47 = vsel %vm681_vm3, %v7308_v45, %v7310_v46  ;;  %7461 = vmatprep.mubr.f32.mxu1 %v8506_v1 }
 0x511   : > { %8315 = vmatprep.subr.msk.mxu1 %vm255_vm1, %v7314_v47 }
 0x512   : > { %8316 = vmatpush1.msk.msra.mxu1 %vm255_vm1, %v7313_v48 }
 0x513   : > { %v7517_v42 = vpop.permute.xlu1 %7516  ;;  %8314 = vmatmul.mubr.msk.f32.vlgmr.msra.gmra.mrb[6].mxu0 %vm324_vm9, %v8311_v8  ;;  %v7525_v41 = vpop.permute.xlu0 %7524 }
 0x514   : > { %7605 = vmatprep.mubr.f32.mxu0 %v8506_v1 }
 0x517   : > { %v7519_v51 = vpop.permute.xlu1 %7518  ;;  %8317 = vmatmul.mubr.msk.f32.vlgmr.msra.gmra.mrb[6].mxu1 %vm324_vm9, %v8311_v8 }
 0x518   : > { %v7526_v52 = vsel %vm292_vm0, %v7517_v42, %v7519_v51  ;;  %v7527_v36 = vsel %vm292_vm0, %v7519_v51, %v7521_v49  ;;  %7676 = vmatprep.mubr.f32.mxu1 %v8506_v1 }
 0x519   : > { %8320 = vmatprep.subr.msk.mxu0 %vm255_vm1, %v7527_v36 }
 0x51a   : > { %8321 = vmatpush1.msk.msra.mxu0 %vm255_vm1, %v7526_v52 }
 0x51b   : > { %v7523_v54 = vpop.permute.xlu1 %7522  ;;  %8322 = vmatmul.mubr.msk.f32.vlgmr.msra.gmra.mrb[6].mxu0 %vm324_vm9, %v8319_v9 }
 0x51c   : > { %v7528_v56 = vsel %vm292_vm0, %v7521_v49, %v7523_v54  ;;  %v7529_v50 = vsel %vm292_vm0, %v7523_v54, %v7525_v41  ;;  %7820 = vmatprep.mubr.f32.mxu0 %v8506_v1 }
 0x51d   : > { %8323 = vmatprep.subr.msk.mxu1 %vm255_vm1, %v7529_v50 }
 0x51e   : > { %8324 = vmatpush1.msk.msra.mxu1 %vm255_vm1, %v7528_v56 }
 0x51f   : > { %v7736_v28 = vpop.permute.xlu1 %7735  ;;  %8325 = vmatmul.mubr.msk.f32.vlgmr.msra.gmra.mrb[6].mxu1 %vm324_vm9, %v8319_v9 }
 0x520   : > { %v7734_v60 = vpop.permute.xlu0 %7733  ;;  %7891 = vmatprep.mubr.f32.mxu1 %v8506_v1 }
 0x521   : > { %v7742_v61 = vsel %vm253_vm2, %v7734_v60, %v7736_v28 }
 0x522   : > { %8328 = vmatprep.subr.msk.mxu0 %vm255_vm1, %v7742_v61 }
 0x523   : > { %v7740_v17 = vpop.permute.xlu1 %7739 }
 0x524   : > { %v7738_v18 = vpop.permute.xlu0 %7737 }
 0x525   : > { %v7743_v27 = vsel %vm253_vm2, %v7736_v28, %v7738_v18  ;;  %v7744_v62 = vsel %vm253_vm2, %v7738_v18, %v7740_v17 }
 0x526   : > { %8331 = vmatprep.subr.msk.mxu1 %vm255_vm1, %v7744_v62 }
 0x527   : > { %8332 = vmatpush1.msk.msra.mxu1 %vm255_vm1, %v7743_v27 }
 0x528   : > { %v7732_v1 = vpop.permute.xlu0 %7731  ;;  %8333 = vmatmul.mubr.msk.f32.vlgmr.msra.gmra.mrb[6].mxu1 %vm324_vm9, %v8327_v58 }
 0x529   : > { %v7741_v14 = vsel %vm253_vm2, %v7732_v1, %v7734_v60 }
 0x52a   : > { %8329 = vmatpush1.msk.msra.mxu0 %vm255_vm1, %v7741_v14 }
 0x52b   : > { %8330 = vmatmul.mubr.msk.f32.vlgmr.msra.gmra.mrb[6].mxu0 %vm324_vm9, %v8327_v58 }
 0x534   : > { %v7906_v6 = vpop.permute.xlu1 %7905 }
 0x539   : > { %v5993_v39 = vpop.permute.xlu0 %5992 }
 0x581   : > { %v5909_v3 = vpop.f32.mrb[4].mxu0 }
 0x582   : > { %v5995_v4 = vadd.f32 %v5993_v39, %v5909_v3  ;;  %v5911_v29 = vpop.f32.mrb[5].mxu0 }
 0x583   : > { %v5996_v20 = vadd.f32 %v5993_v39, %v5911_v29 }
 0x584   : > { %7920 = vst [vmem:[%s9809_s21] sm:$0xf] %v5995_v4 }
 0x585   : > { %7921 = vst [vmem:[%s9809_s21 + $0x8] sm:$0xf] %v5996_v20 }
 0x58e   : > { %v5980_v57 = vpop.f32.mrb[4].mxu1 }
 0x58f   : > { %v5997_v59 = vadd.f32 %v5993_v39, %v5980_v57  ;;  %v5982_v11 = vpop.f32.mrb[5].mxu1 }
 0x590   : > { %v5998_v53 = vadd.f32 %v5993_v39, %v5982_v11 }
 0x591   : > { %7922 = vst [vmem:[%s9809_s21 + $0x10] sm:$0xf] %v5997_v59 }
 0x592   : > { %7923 = vst [vmem:[%s9809_s21 + $0x18] sm:$0xf] %v5998_v53 }
 0x5fb   : > { %v7893_v63 = vpop.f32.mrb[6].mxu1 }
 0x5fc   : > { %v7910_v16 = vadd.f32 %v7906_v6, %v7893_v63  ;;  %v7895_v19 = vpop.f32.mrb[7].mxu1 }
 0x5fd   : > { %v7911_v22 = vadd.f32 %v7906_v6, %v7895_v19 }
 0x5fe   : > { %v7916_v23 = vmul.f32 1.442695, %v7910_v16  ;;  %v7822_v24 = vpop.f32.mrb[6].mxu0 }
 0x5ff   : > { %v7918_v25 = vmul.f32 1.442695, %v7911_v22  ;;  %v7945_v26 = vcombine.high %v7910_v16, %v7911_v22  ;;  %v7908_v30 = vadd.f32 %v7906_v6, %v7822_v24  ;;  %v7824_v31 = vpop.f32.mrb[7].mxu0 }
 0x600   : > { %8489 = vpow2.f32 %v7916_v23  ;;  %v7909_v7 = vadd.f32 %v7906_v6, %v7824_v31 }
 0x601   : > { %8491 = vpow2.f32 %v7918_v25  ;;  %v7912_v37 = vmul.f32 1.442695, %v7908_v30  ;;  %v7959_v15 = vrot.slane %v7945_v26, %v7951_v55 }
 0x602   : > { %v7914_v10 = vmul.f32 1.442695, %v7909_v7  ;;  %v7944_v40 = vcombine.high %v7908_v30, %v7909_v7 }
 0x603   : > { %8493 = vpow2.f32 %v7912_v37 }
 0x604   : > { %8495 = vpow2.f32 %v7914_v10  ;;  %v7952_v32 = vrot.slane %v7944_v40, %v7951_v55 }
 0x606   : > { %v7960_v33 = vcombine.low %v7952_v32, %v7959_v15 }
 0x608   : > { %v7967_v34 = vrot.slane %v7960_v33, %v7951_v55 }
 0x60a   : > { %v8490_v35 = vpop.eup %8489  ;;  %8334 = vst.msk [vmem:[%s9809_s21 + $0x20] ss:$8 sm:$0xf] %vm7971_vm10, %v7967_v34 }
 0x60b   : > { %v8492_v2 = vpop.eup %8491  ;;  %v7930_v38 = vrot.slane %v8490_v35, 4 }
 0x60c   : > { %v7931_v12 = vrot.slane %v8492_v2, 4 }
 0x60d   : > { %v8494_v43 = vpop.eup %8493  ;;  %7938 = vst [vmem:[%s9809_s21 + $0x10] sm:$0xf0] %v7930_v38 }
 0x60e   : > { %v8496_v44 = vpop.eup %8495  ;;  %7939 = vst [vmem:[%s9809_s21 + $0x18] sm:$0xf0] %v7931_v12  ;;  %v7928_v45 = vrot.slane %v8494_v43, 4 }
 0x60f   : > { %v7929_v46 = vrot.slane %v8496_v44, 4 }
 0x610   : > { %7936 = vst [vmem:[%s9809_s21] sm:$0xf0] %v7928_v45 }
 0x611   : > { %7937 = vst [vmem:[%s9809_s21 + $0x8] sm:$0xf0] %v7929_v46 }
 0x612 PF: > { %s14_s15 = sadd.s32 1, %s8504_s15  }
 0x613   : > { %p11_p4 = scmp.ge.s32.totalorder %s14_s15, 4  }
 0x615   :  { %13 = sbr.rel (!%p11_p4) target bundleno = 1 (0x1), region = 86 }

</bundles_post_ra>
